<compile_context>
chip_gen: v7x
topology: tpu7x:2x2x1
jax: 0.10.0
libtpu: 0.0.40
codegen_flags: <defaults>
</compile_context>

<pallas_src>
import functools

import jax
import jax.numpy as jnp
import numpy as np
from jax import lax
from jax.experimental import pallas as pl
from jax.experimental.pallas import tpu as pltpu

EPS = 1e-5          # nn.BatchNorm2d default eps
NEG_SLOPE = 0.2     # LeakyReLU(0.2)
VMEM_LIMIT = 32 * 1024 * 1024   # explicit scoped-VMEM budget (safe on v5e/v6e/v7x)


def _round_up(x, m):
    return (x + m - 1) // m * m


# ----------------------------------------------------------------------------
# GEMM kernels (fused activation epilogue)
# ----------------------------------------------------------------------------
def _apply_act(y, act):
    if act == "leaky_relu":
        return jnp.where(y >= 0, y, NEG_SLOPE * y)
    if act == "sigmoid":
        return jax.nn.sigmoid(y)
    return y


def _mm_single_kernel(a_ref, b_ref, o_ref, *, act):
    """Single K-block GEMM: compute, apply activation, store (no accumulator)."""
    y = jnp.dot(a_ref[...], b_ref[...], preferred_element_type=jnp.float32)
    o_ref[...] = _apply_act(y, act).astype(o_ref.dtype)


def _mm_multi_kernel(a_ref, b_ref, o_ref, *, act):
    """Tiled-K GEMM accumulating directly into the resident f32 output tile."""
    k = pl.program_id(2)

    @pl.when(k == 0)
    def _():
        o_ref[...] = jnp.zeros_like(o_ref)

    o_ref[...] += jnp.dot(a_ref[...], b_ref[...],
                          preferred_element_type=jnp.float32)

    if act is not None:
        @pl.when(k == pl.num_programs(2) - 1)
        def _():
            o_ref[...] = _apply_act(o_ref[...], act)


def matmul_act(a, b, act=None, out_dtype=jnp.float32, tm=512, tn=128, tk=512):
    """C = act(A @ B) with bf16 MXU operands, f32 accumulation, M/N/K tiling.

    tm=512/tk=512/tn=128 keeps worst-case VMEM per call to a few MiB
    (double-buffered A/B + resident out), well inside v7x's 64 MiB; on
    v5e/v6e (128 MiB) tm/tk can be swept upward.
    """
    M, K = a.shape
    K2, N = b.shape
    assert K == K2
    a = a.astype(jnp.bfloat16)
    b = b.astype(jnp.bfloat16)

    # Lane-dense output: pad N up to a multiple of tn (=128), slice afterwards.
    Np = _round_up(N, tn)
    if Np != N:
        b = jnp.pad(b, ((0, 0), (0, Np - N)))

    # M tiling (pad rows with zeros if needed).
    tm = min(tm, _round_up(M, 8))
    Mp = _round_up(M, tm)
    if Mp != M:
        a = jnp.pad(a, ((0, Mp - M), (0, 0)))

    # K tiling (fall back to a single full-K block for small / indivisible K).
    if K % tk != 0:
        tk = K
    kt = K // tk
    multi = kt > 1

    kern = functools.partial(_mm_multi_kernel if multi else _mm_single_kernel,
                             act=act)
    out_dt = jnp.float32 if multi else out_dtype   # multi-K accumulates in f32

    out = pl.pallas_call(
        kern,
        out_shape=jax.ShapeDtypeStruct((Mp, Np), out_dt),
        grid_spec=pltpu.PrefetchScalarGridSpec(
            num_scalar_prefetch=0,
            grid=(Mp // tm, Np // tn, kt),
            in_specs=[pl.BlockSpec((tm, tk), lambda i, j, k: (i, k)),
                      pl.BlockSpec((tk, tn), lambda i, j, k: (k, j))],
            out_specs=pl.BlockSpec((tm, tn), lambda i, j, k: (i, j))),
        compiler_params=pltpu.CompilerParams(
            dimension_semantics=("parallel", "parallel", "arbitrary"),
            vmem_limit_bytes=VMEM_LIMIT),
    )(a, b)

    out = out[:M, :N]
    if out.dtype != out_dtype:
        out = out.astype(out_dtype)
    return out


# ----------------------------------------------------------------------------
# BatchNorm kernels (tiled over M)
# ----------------------------------------------------------------------------
def _bn_stats_kernel(y_ref, sum_ref, ssq_ref):
    """Accumulate per-channel sum / sum-of-squares across M tiles."""
    @pl.when(pl.program_id(0) == 0)
    def _():
        sum_ref[...] = jnp.zeros_like(sum_ref)
        ssq_ref[...] = jnp.zeros_like(ssq_ref)

    y = y_ref[...]
    sum_ref[...] += jnp.sum(y, axis=0, keepdims=True)
    ssq_ref[...] += jnp.sum(y * y, axis=0, keepdims=True)


def _bn_lrelu_kernel(y_ref, scale_ref, shift_ref, o_ref):
    z = y_ref[...] * scale_ref[...] + shift_ref[...]
    o_ref[...] = jnp.where(z >= 0, z, NEG_SLOPE * z).astype(o_ref.dtype)


def _bn_lrelu_mm_sigmoid_kernel(y_ref, scale_ref, shift_ref, w_ref, o_ref):
    """BN + LeakyReLU + fused 1x1 conv (bf16 MXU) + sigmoid epilogue."""
    z = y_ref[...] * scale_ref[...] + shift_ref[...]
    z = jnp.where(z >= 0, z, NEG_SLOPE * z)
    logits = jnp.dot(z.astype(jnp.bfloat16), w_ref[...],
                     preferred_element_type=jnp.float32)
    o_ref[...] = jax.nn.sigmoid(logits).astype(o_ref.dtype)


def _bn_scale_shift(yp, true_m, gamma, beta, tm):
    """Two values per channel: scale = gamma*rsqrt(var+eps), shift = beta-mean*scale.

    Zero-padded rows contribute 0 to both sums, so dividing by the true M keeps
    the statistics exact.
    """
    Mp, C = yp.shape
    s, ssq = pl.pallas_call(
        _bn_stats_kernel,
        out_shape=(jax.ShapeDtypeStruct((1, C), jnp.float32),
                   jax.ShapeDtypeStruct((1, C), jnp.float32)),
        grid_spec=pltpu.PrefetchScalarGridSpec(
            num_scalar_prefetch=0,
            grid=(Mp // tm,),
            in_specs=[pl.BlockSpec((tm, C), lambda i: (i, 0))],
            out_specs=[pl.BlockSpec((1, C), lambda i: (0, 0)),
                       pl.BlockSpec((1, C), lambda i: (0, 0))]),
        compiler_params=pltpu.CompilerParams(
            dimension_semantics=("arbitrary",),
            vmem_limit_bytes=VMEM_LIMIT),
    )(yp)
    mean = s / true_m
    var = ssq / true_m - mean * mean          # biased variance (training-mode BN)
    scale = gamma.reshape(1, C) * lax.rsqrt(var + EPS)
    shift = beta.reshape(1, C) - mean * scale
    return scale, shift


def bn_lrelu(y, gamma, beta, tm=512):
    """Training-mode BatchNorm + LeakyReLU, tiled over M, bf16 output."""
    M, C = y.shape
    tm = min(tm, _round_up(M, 8))
    Mp = _round_up(M, tm)
    yp = jnp.pad(y, ((0, Mp - M), (0, 0))) if Mp != M else y
    scale, shift = _bn_scale_shift(yp, M, gamma, beta, tm)

    z = pl.pallas_call(
        _bn_lrelu_kernel,
        out_shape=jax.ShapeDtypeStruct((Mp, C), jnp.bfloat16),
        grid_spec=pltpu.PrefetchScalarGridSpec(
            num_scalar_prefetch=0,
            grid=(Mp // tm,),
            in_specs=[pl.BlockSpec((tm, C), lambda i: (i, 0)),
                      pl.BlockSpec((1, C), lambda i: (0, 0)),
                      pl.BlockSpec((1, C), lambda i: (0, 0))],
            out_specs=pl.BlockSpec((tm, C), lambda i: (i, 0))),
        compiler_params=pltpu.CompilerParams(
            dimension_semantics=("parallel",),
            vmem_limit_bytes=VMEM_LIMIT),
    )(yp, scale, shift)
    return z[:M]


def bn_lrelu_conv_sigmoid(y, gamma, beta, w_mat, tm=512):
    """Fused tail: BN + LeakyReLU + 1x1 conv (Cout padded to 128) + sigmoid."""
    M, C = y.shape
    Cout = w_mat.shape[1]
    Np = _round_up(Cout, 128)                        # lane-dense MXU output
    wp = jnp.pad(w_mat, ((0, 0), (0, Np - Cout))).astype(jnp.bfloat16)

    tm = min(tm, _round_up(M, 8))
    Mp = _round_up(M, tm)
    yp = jnp.pad(y, ((0, Mp - M), (0, 0))) if Mp != M else y
    scale, shift = _bn_scale_shift(yp, M, gamma, beta, tm)

    out = pl.pallas_call(
        _bn_lrelu_mm_sigmoid_kernel,
        out_shape=jax.ShapeDtypeStruct((Mp, Np), jnp.float32),
        grid_spec=pltpu.PrefetchScalarGridSpec(
            num_scalar_prefetch=0,
            grid=(Mp // tm,),
            in_specs=[pl.BlockSpec((tm, C), lambda i: (i, 0)),
                      pl.BlockSpec((1, C), lambda i: (0, 0)),
                      pl.BlockSpec((1, C), lambda i: (0, 0)),
                      pl.BlockSpec((C, Np), lambda i: (0, 0))],
            out_specs=pl.BlockSpec((tm, Np), lambda i: (i, 0))),
        compiler_params=pltpu.CompilerParams(
            dimension_semantics=("parallel",),
            vmem_limit_bytes=VMEM_LIMIT),
    )(yp, scale, shift, wp)
    return out[:M, :Cout]


# ----------------------------------------------------------------------------
# Glue: im2col, weight reshaping, parameter init
# ----------------------------------------------------------------------------
def im2col(x_nhwc, kh, kw, stride, pad):
    N, H, W, C = x_nhwc.shape
    xp = jnp.pad(x_nhwc, ((0, 0), (pad, pad), (pad, pad), (0, 0)))
    Ho = (H + 2 * pad - kh) // stride + 1
    Wo = (W + 2 * pad - kw) // stride + 1
    cols = []
    for i in range(kh):
        for j in range(kw):
            cols.append(xp[:, i:i + stride * (Ho - 1) + 1:stride,
                           j:j + stride * (Wo - 1) + 1:stride, :])
    patches = jnp.stack(cols, axis=3)              # (N, Ho, Wo, kh*kw, C)
    return patches.reshape(N * Ho * Wo, kh * kw * C), (N, Ho, Wo)


def w_to_mat(w_oihw):
    # PyTorch weight (Cout, Cin, KH, KW) -> (KH*KW*Cin, Cout) matching im2col order
    Cout, Cin, KH, KW = w_oihw.shape
    return jnp.transpose(w_oihw, (2, 3, 1, 0)).reshape(KH * KW * Cin, Cout)


def make_params(key):
    conv_shapes = [(64, 3, 4, 4), (128, 64, 4, 4), (256, 128, 4, 4),
                   (512, 256, 4, 4), (1, 512, 1, 1)]
    params = {}
    keys = jax.random.split(key, len(conv_shapes))
    for idx, (k, s) in enumerate(zip(keys, conv_shapes), start=1):
        params[f"conv{idx}"] = 0.05 * jax.random.normal(k, s, jnp.float32)
    for c, i in [(128, 2), (256, 3), (512, 4)]:
        params[f"bn{i}_gamma"] = jnp.ones((c,), jnp.float32)   # PyTorch default init
        params[f"bn{i}_beta"] = jnp.zeros((c,), jnp.float32)
    return params


# ----------------------------------------------------------------------------
# Forward pass
# ----------------------------------------------------------------------------
def discriminator70(x_nchw, params):
    x = jnp.transpose(x_nchw, (0, 2, 3, 1)).astype(jnp.bfloat16)   # NHWC bf16

    # conv1 + LeakyReLU (single-K GEMM, Cout lane-padded to 128, bf16 output)
    a, (N, Ho, Wo) = im2col(x, 4, 4, 2, 1)
    y = matmul_act(a, w_to_mat(params["conv1"]), act="leaky_relu",
                   out_dtype=jnp.bfloat16)
    x = y.reshape(N, Ho, Wo, -1)

    # conv2 / conv3 + BatchNorm + LeakyReLU (GEMM -> tiled BN, bf16 activations)
    for i in (2, 3):
        a, (N, Ho, Wo) = im2col(x, 4, 4, 2, 1)
        y = matmul_act(a, w_to_mat(params[f"conv{i}"]), act=None)     # f32 (M,C)
        z = bn_lrelu(y, params[f"bn{i}_gamma"], params[f"bn{i}_beta"])
        x = z.reshape(N, Ho, Wo, -1)

    # conv4 -> BN4 + LeakyReLU + conv5(1x1) + Sigmoid fused (no HBM round-trip
    # of the 512-channel activation, no 1-wide GEMM).
    a, (N, Ho, Wo) = im2col(x, 4, 4, 2, 1)
    y4 = matmul_act(a, w_to_mat(params["conv4"]), act=None)           # f32 (M,512)
    out = bn_lrelu_conv_sigmoid(y4, params["bn4_gamma"], params["bn4_beta"],
                                w_to_mat(params["conv5"]))            # (M,1) f32
    out = out.reshape(N, Ho, Wo, 1)
    return jnp.transpose(out, (0, 3, 1, 2)).astype(jnp.float32)       # NCHW


# ----------------------------------------------------------------------------
# Pure-JAX reference for correctness checking (f32, highest precision)
# ----------------------------------------------------------------------------
def reference(x_nchw, params):
    dn = ('NCHW', 'OIHW', 'NCHW')

    def conv(x, w, stride, pad):
        return lax.conv_general_dilated(
            x, w, (stride, stride), ((pad, pad), (pad, pad)),
            dimension_numbers=dn, precision=lax.Precision.HIGHEST)

    def bn(x, g, b):
        mean = jnp.mean(x, axis=(0, 2, 3), keepdims=True)
        var = jnp.mean(jnp.square(x - mean), axis=(0, 2, 3), keepdims=True)
        return ((x - mean) * lax.rsqrt(var + EPS)
                * g.reshape(1, -1, 1, 1) + b.reshape(1, -1, 1, 1))

    def lrelu(x):
        return jnp.where(x >= 0, x, NEG_SLOPE * x)

    x = lrelu(conv(x_nchw, params["conv1"], 2, 1))
    x = lrelu(bn(conv(x, params["conv2"], 2, 1),
                 params["bn2_gamma"], params["bn2_beta"]))
    x = lrelu(bn(conv(x, params["conv3"], 2, 1),
                 params["bn3_gamma"], params["bn3_beta"]))
    x = lrelu(bn(conv(x, params["conv4"], 2, 1),
                 params["bn4_gamma"], params["bn4_beta"]))
    return jax.nn.sigmoid(conv(x, params["conv5"], 1, 0))


# ----------------------------------------------------------------------------
if __name__ == "__main__":
    key = jax.random.PRNGKey(0)
    k_x, k_p = jax.random.split(key)
    x = jax.random.normal(k_x, (2, 3, 32, 32), jnp.float32)   # small NCHW input
    params = make_params(k_p)

    fwd = jax.jit(discriminator70)
    out = jax.block_until_ready(fwd(x, params))
    assert out.shape == (2, 1, 2, 2), out.shape

    ref = jax.block_until_ready(reference(x, params))
    # bf16 MXU operands / bf16 intermediate activations => looser tolerance than
    # the f32 HIGHEST-precision reference.
    np.testing.assert_allclose(np.asarray(out, np.float32), np.asarray(ref),
                               rtol=2e-2, atol=2e-2)
    print("KERNEL_OK")
</pallas_src>

<mosaic_0001>
module attributes {stable_mosaic.version = 11 : i64} {
  func.func @_mm_single_kernel(%arg0: i32, %arg1: i32, %arg2: i32, %arg3: memref<512x48xbf16, #tpu.memory_space<vmem>>, %arg4: memref<48x128xbf16, #tpu.memory_space<vmem>>, %arg5: memref<512x128xbf16, #tpu.memory_space<vmem>>) attributes {dimension_semantics = [#tpu.dimension_semantics<parallel>, #tpu.dimension_semantics<parallel>, #tpu.dimension_semantics<arbitrary>], iteration_bounds = array<i64: 1, 1, 1>, scalar_prefetch = 0 : i64, scratch_operands = 0 : i64, tpu.core_type = #tpu.core_type<tc>, window_params = [{transform_indices = @transform_0, window_bounds = array<i64: 512, 48>}, {transform_indices = @transform_1, window_bounds = array<i64: 48, 128>}, {transform_indices = @transform_2, window_bounds = array<i64: 512, 128>}]} {
    %c0 = arith.constant 0 : index
    %c0_0 = arith.constant 0 : index
    %0 = vector.load %arg3[%c0, %c0_0] : memref<512x48xbf16, #tpu.memory_space<vmem>>, vector<512x48xbf16>
    %c0_1 = arith.constant 0 : index
    %c0_2 = arith.constant 0 : index
    %1 = vector.load %arg4[%c0_1, %c0_2] : memref<48x128xbf16, #tpu.memory_space<vmem>>, vector<48x128xbf16>
    %cst = arith.constant dense<0.000000e+00> : vector<512x128xf32>
    %2 = tpu.matmul %0, %1, %cst {dimension_numbers = #tpu.dot_dimension_numbers<[1], [0], [0], [1], [0, 0, 1, 1], [], []>} : vector<512x48xbf16>, vector<48x128xbf16>, vector<512x128xf32> -> vector<512x128xf32>
    %cst_3 = arith.constant 0.000000e+00 : f32
    %3 = vector.broadcast %cst_3 : f32 to vector<512x128xf32>
    %4 = arith.cmpf oge, %2, %3 : vector<512x128xf32>
    %cst_4 = arith.constant 2.000000e-01 : f32
    %5 = vector.broadcast %cst_4 : f32 to vector<512x128xf32>
    %6 = arith.mulf %5, %2 : vector<512x128xf32>
    %7 = arith.select %4, %2, %6 : vector<512x128xi1>, vector<512x128xf32>
    %8 = arith.truncf %7 : vector<512x128xf32> to vector<512x128xbf16>
    %c0_5 = arith.constant 0 : index
    %c0_6 = arith.constant 0 : index
    %9 = vector.load %arg5[%c0_5, %c0_6] : memref<512x128xbf16, #tpu.memory_space<vmem>>, vector<512x128xbf16>
    tpu.vector_store %arg5[%c0_5, %c0_6], %8 {strides = array<i32>} : memref<512x128xbf16, #tpu.memory_space<vmem>>, vector<512x128xbf16>,
    return
  }
  func.func @transform_0(%arg0: i32, %arg1: i32, %arg2: i32) -> (i32, i32) {
    %c0_i32 = arith.constant 0 : i32
    return %arg0, %arg2 : i32, i32
  }
  func.func @transform_1(%arg0: i32, %arg1: i32, %arg2: i32) -> (i32, i32) {
    %c0_i32 = arith.constant 0 : i32
    return %arg2, %arg1 : i32, i32
  }
  func.func @transform_2(%arg0: i32, %arg1: i32, %arg2: i32) -> (i32, i32) {
    %c0_i32 = arith.constant 0 : i32
    return %arg0, %arg1 : i32, i32
  }
}

module attributes {stable_mosaic.version = 11 : i64} {
  func.func @_mm_multi_kernel(%arg0: i32, %arg1: i32, %arg2: i32, %arg3: memref<128x512xbf16, #tpu.memory_space<vmem>>, %arg4: memref<512x128xbf16, #tpu.memory_space<vmem>>, %arg5: memref<128x128xf32, #tpu.memory_space<vmem>>) attributes {dimension_semantics = [#tpu.dimension_semantics<parallel>, #tpu.dimension_semantics<parallel>, #tpu.dimension_semantics<arbitrary>], iteration_bounds = array<i64: 1, 1, 2>, scalar_prefetch = 0 : i64, scratch_operands = 0 : i64, tpu.core_type = #tpu.core_type<tc>, window_params = [{transform_indices = @transform_0, window_bounds = array<i64: 128, 512>}, {transform_indices = @transform_1, window_bounds = array<i64: 512, 128>}, {transform_indices = @transform_2, window_bounds = array<i64: 128, 128>}]} {
    %c0_i32 = arith.constant 0 : i32
    %0 = arith.cmpi eq, %arg2, %c0_i32 : i32
    %1 = arith.extui %0 : i1 to i32
    %c0_i32_0 = arith.constant 0 : i32
    %2 = arith.cmpi ne, %1, %c0_i32_0 : i32
    scf.if %2 {
      %cst_8 = arith.constant 0.000000e+00 : f32
      %9 = vector.broadcast %cst_8 : f32 to vector<128x128xf32>
      %c0_9 = arith.constant 0 : index
      %c0_10 = arith.constant 0 : index
      %10 = vector.load %arg5[%c0_9, %c0_10] : memref<128x128xf32, #tpu.memory_space<vmem>>, vector<128x128xf32>
      tpu.vector_store %arg5[%c0_9, %c0_10], %9 {strides = array<i32>} : memref<128x128xf32, #tpu.memory_space<vmem>>, vector<128x128xf32>,
    } else {
    }
    %c0 = arith.constant 0 : index
    %c0_1 = arith.constant 0 : index
    %3 = vector.load %arg5[%c0, %c0_1] : memref<128x128xf32, #tpu.memory_space<vmem>>, vector<128x128xf32>
    %c0_2 = arith.constant 0 : index
    %c0_3 = arith.constant 0 : index
    %4 = vector.load %arg3[%c0_2, %c0_3] : memref<128x512xbf16, #tpu.memory_space<vmem>>, vector<128x512xbf16>
    %c0_4 = arith.constant 0 : index
    %c0_5 = arith.constant 0 : index
    %5 = vector.load %arg4[%c0_4, %c0_5] : memref<512x128xbf16, #tpu.memory_space<vmem>>, vector<512x128xbf16>
    %cst = arith.constant dense<0.000000e+00> : vector<128x128xf32>
    %6 = tpu.matmul %4, %5, %cst {dimension_numbers = #tpu.dot_dimension_numbers<[1], [0], [0], [1], [0, 0, 1, 1], [], []>} : vector<128x512xbf16>, vector<512x128xbf16>, vector<128x128xf32> -> vector<128x128xf32>
    %7 = arith.addf %3, %6 : vector<128x128xf32>
    %c0_6 = arith.constant 0 : index
    %c0_7 = arith.constant 0 : index
    %8 = vector.load %arg5[%c0_6, %c0_7] : memref<128x128xf32, #tpu.memory_space<vmem>>, vector<128x128xf32>
    tpu.vector_store %arg5[%c0_6, %c0_7], %7 {strides = array<i32>} : memref<128x128xf32, #tpu.memory_space<vmem>>, vector<128x128xf32>,
    return
  }
  func.func @transform_0(%arg0: i32, %arg1: i32, %arg2: i32) -> (i32, i32) {
    %c0_i32 = arith.constant 0 : i32
    return %arg0, %arg2 : i32, i32
  }
  func.func @transform_1(%arg0: i32, %arg1: i32, %arg2: i32) -> (i32, i32) {
    %c0_i32 = arith.constant 0 : i32
    return %arg2, %arg1 : i32, i32
  }
  func.func @transform_2(%arg0: i32, %arg1: i32, %arg2: i32) -> (i32, i32) {
    %c0_i32 = arith.constant 0 : i32
    return %arg0, %arg1 : i32, i32
  }
}

module attributes {stable_mosaic.version = 11 : i64} {
  func.func @_bn_stats_kernel(%arg0: i32, %arg1: memref<128x128xf32, #tpu.memory_space<vmem>>, %arg2: memref<1x128xf32, #tpu.memory_space<vmem>>, %arg3: memref<1x128xf32, #tpu.memory_space<vmem>>) attributes {dimension_semantics = [#tpu.dimension_semantics<arbitrary>], iteration_bounds = array<i64: 1>, scalar_prefetch = 0 : i64, scratch_operands = 0 : i64, tpu.core_type = #tpu.core_type<tc>, window_params = [{transform_indices = @transform_0, window_bounds = array<i64: 128, 128>}, {pipeline_mode = #tpu.pipeline_mode<synchronous>, transform_indices = @transform_1, window_bounds = array<i64: 1, 128>}, {pipeline_mode = #tpu.pipeline_mode<synchronous>, transform_indices = @transform_2, window_bounds = array<i64: 1, 128>}]} {
    %c0_i32 = arith.constant 0 : i32
    %0 = arith.cmpi eq, %arg0, %c0_i32 : i32
    %1 = arith.extui %0 : i1 to i32
    %c0_i32_0 = arith.constant 0 : i32
    %2 = arith.cmpi ne, %1, %c0_i32_0 : i32
    scf.if %2 {
      %cst_11 = arith.constant 0.000000e+00 : f32
      %15 = vector.broadcast %cst_11 : f32 to vector<1x128xf32>
      %c0_12 = arith.constant 0 : index
      %c0_13 = arith.constant 0 : index
      %16 = vector.load %arg2[%c0_12, %c0_13] : memref<1x128xf32, #tpu.memory_space<vmem>>, vector<1x128xf32>
      tpu.vector_store %arg2[%c0_12, %c0_13], %15 {strides = array<i32>} : memref<1x128xf32, #tpu.memory_space<vmem>>, vector<1x128xf32>,
      %cst_14 = arith.constant 0.000000e+00 : f32
      %17 = vector.broadcast %cst_14 : f32 to vector<1x128xf32>
      %c0_15 = arith.constant 0 : index
      %c0_16 = arith.constant 0 : index
      %18 = vector.load %arg3[%c0_15, %c0_16] : memref<1x128xf32, #tpu.memory_space<vmem>>, vector<1x128xf32>
      tpu.vector_store %arg3[%c0_15, %c0_16], %17 {strides = array<i32>} : memref<1x128xf32, #tpu.memory_space<vmem>>, vector<1x128xf32>,
    } else {
    }
    %c0 = arith.constant 0 : index
    %c0_1 = arith.constant 0 : index
    %3 = vector.load %arg1[%c0, %c0_1] : memref<128x128xf32, #tpu.memory_space<vmem>>, vector<128x128xf32>
    %c0_2 = arith.constant 0 : index
    %c0_3 = arith.constant 0 : index
    %4 = vector.load %arg2[%c0_2, %c0_3] : memref<1x128xf32, #tpu.memory_space<vmem>>, vector<1x128xf32>
    %cst = arith.constant dense<0.000000e+00> : vector<128xf32>
    %5 = vector.multi_reduction <add>, %3, %cst [0] : vector<128x128xf32> to vector<128xf32>
    %6 = vector.shape_cast %5 : vector<128xf32> to vector<1x128xf32>
    %7 = arith.addf %4, %6 : vector<1x128xf32>
    %c0_4 = arith.constant 0 : index
    %c0_5 = arith.constant 0 : index
    %8 = vector.load %arg2[%c0_4, %c0_5] : memref<1x128xf32, #tpu.memory_space<vmem>>, vector<1x128xf32>
    tpu.vector_store %arg2[%c0_4, %c0_5], %7 {strides = array<i32>} : memref<1x128xf32, #tpu.memory_space<vmem>>, vector<1x128xf32>,
    %c0_6 = arith.constant 0 : index
    %c0_7 = arith.constant 0 : index
    %9 = vector.load %arg3[%c0_6, %c0_7] : memref<1x128xf32, #tpu.memory_space<vmem>>, vector<1x128xf32>
    %10 = arith.mulf %3, %3 : vector<128x128xf32>
    %cst_8 = arith.constant dense<0.000000e+00> : vector<128xf32>
    %11 = vector.multi_reduction <add>, %10, %cst_8 [0] : vector<128x128xf32> to vector<128xf32>
    %12 = vector.shape_cast %11 : vector<128xf32> to vector<1x128xf32>
    %13 = arith.addf %9, %12 : vector<1x128xf32>
    %c0_9 = arith.constant 0 : index
    %c0_10 = arith.constant 0 : index
    %14 = vector.load %arg3[%c0_9, %c0_10] : memref<1x128xf32, #tpu.memory_space<vmem>>, vector<1x128xf32>
    tpu.vector_store %arg3[%c0_9, %c0_10], %13 {strides = array<i32>} : memref<1x128xf32, #tpu.memory_space<vmem>>, vector<1x128xf32>,
    return
  }
  func.func @transform_0(%arg0: i32) -> (i32, i32) {
    %c0_i32 = arith.constant 0 : i32
    %c0_i32_0 = arith.constant 0 : i32
    return %arg0, %c0_i32 : i32, i32
  }
  func.func @transform_1(%arg0: i32) -> (i32, i32) {
    %c0_i32 = arith.constant 0 : i32
    %c0_i32_0 = arith.constant 0 : i32
    %c0_i32_1 = arith.constant 0 : i32
    return %c0_i32, %c0_i32_0 : i32, i32
  }
  func.func @transform_2(%arg0: i32) -> (i32, i32) {
    %c0_i32 = arith.constant 0 : i32
    %c0_i32_0 = arith.constant 0 : i32
    %c0_i32_1 = arith.constant 0 : i32
    return %c0_i32, %c0_i32_0 : i32, i32
  }
}

module attributes {stable_mosaic.version = 11 : i64} {
  func.func @_bn_lrelu_kernel(%arg0: i32, %arg1: memref<128x128xf32, #tpu.memory_space<vmem>>, %arg2: memref<1x128xf32, #tpu.memory_space<vmem>>, %arg3: memref<1x128xf32, #tpu.memory_space<vmem>>, %arg4: memref<128x128xbf16, #tpu.memory_space<vmem>>) attributes {dimension_semantics = [#tpu.dimension_semantics<parallel>], iteration_bounds = array<i64: 1>, scalar_prefetch = 0 : i64, scratch_operands = 0 : i64, tpu.core_type = #tpu.core_type<tc>, window_params = [{transform_indices = @transform_0, window_bounds = array<i64: 128, 128>}, {pipeline_mode = #tpu.pipeline_mode<synchronous>, transform_indices = @transform_1, window_bounds = array<i64: 1, 128>}, {pipeline_mode = #tpu.pipeline_mode<synchronous>, transform_indices = @transform_2, window_bounds = array<i64: 1, 128>}, {transform_indices = @transform_3, window_bounds = array<i64: 128, 128>}]} {
    %c0 = arith.constant 0 : index
    %c0_0 = arith.constant 0 : index
    %0 = vector.load %arg1[%c0, %c0_0] : memref<128x128xf32, #tpu.memory_space<vmem>>, vector<128x128xf32>
    %c0_1 = arith.constant 0 : index
    %c0_2 = arith.constant 0 : index
    %1 = vector.load %arg2[%c0_1, %c0_2] : memref<1x128xf32, #tpu.memory_space<vmem>>, vector<1x128xf32>
    %2 = vector.broadcast %1 : vector<1x128xf32> to vector<128x128xf32>
    %3 = arith.mulf %0, %2 : vector<128x128xf32>
    %c0_3 = arith.constant 0 : index
    %c0_4 = arith.constant 0 : index
    %4 = vector.load %arg3[%c0_3, %c0_4] : memref<1x128xf32, #tpu.memory_space<vmem>>, vector<1x128xf32>
    %5 = vector.broadcast %4 : vector<1x128xf32> to vector<128x128xf32>
    %6 = arith.addf %3, %5 : vector<128x128xf32>
    %cst = arith.constant 0.000000e+00 : f32
    %7 = vector.broadcast %cst : f32 to vector<128x128xf32>
    %8 = arith.cmpf oge, %6, %7 : vector<128x128xf32>
    %cst_5 = arith.constant 2.000000e-01 : f32
    %9 = vector.broadcast %cst_5 : f32 to vector<128x128xf32>
    %10 = arith.mulf %9, %6 : vector<128x128xf32>
    %11 = arith.select %8, %6, %10 : vector<128x128xi1>, vector<128x128xf32>
    %12 = arith.truncf %11 : vector<128x128xf32> to vector<128x128xbf16>
    %c0_6 = arith.constant 0 : index
    %c0_7 = arith.constant 0 : index
    %13 = vector.load %arg4[%c0_6, %c0_7] : memref<128x128xbf16, #tpu.memory_space<vmem>>, vector<128x128xbf16>
    tpu.vector_store %arg4[%c0_6, %c0_7], %12 {strides = array<i32>} : memref<128x128xbf16, #tpu.memory_space<vmem>>, vector<128x128xbf16>,
    return
  }
  func.func @transform_0(%arg0: i32) -> (i32, i32) {
    %c0_i32 = arith.constant 0 : i32
    %c0_i32_0 = arith.constant 0 : i32
    return %arg0, %c0_i32 : i32, i32
  }
  func.func @transform_1(%arg0: i32) -> (i32, i32) {
    %c0_i32 = arith.constant 0 : i32
    %c0_i32_0 = arith.constant 0 : i32
    %c0_i32_1 = arith.constant 0 : i32
    return %c0_i32, %c0_i32_0 : i32, i32
  }
  func.func @transform_2(%arg0: i32) -> (i32, i32) {
    %c0_i32 = arith.constant 0 : i32
    %c0_i32_0 = arith.constant 0 : i32
    %c0_i32_1 = arith.constant 0 : i32
    return %c0_i32, %c0_i32_0 : i32, i32
  }
  func.func @transform_3(%arg0: i32) -> (i32, i32) {
    %c0_i32 = arith.constant 0 : i32
    %c0_i32_0 = arith.constant 0 : i32
    return %arg0, %c0_i32 : i32, i32
  }
}

module attributes {stable_mosaic.version = 11 : i64} {
  func.func @_mm_multi_kernel(%arg0: i32, %arg1: i32, %arg2: i32, %arg3: memref<32x512xbf16, #tpu.memory_space<vmem>>, %arg4: memref<512x128xbf16, #tpu.memory_space<vmem>>, %arg5: memref<32x128xf32, #tpu.memory_space<vmem>>) attributes {dimension_semantics = [#tpu.dimension_semantics<parallel>, #tpu.dimension_semantics<parallel>, #tpu.dimension_semantics<arbitrary>], iteration_bounds = array<i64: 1, 2, 4>, scalar_prefetch = 0 : i64, scratch_operands = 0 : i64, tpu.core_type = #tpu.core_type<tc>, window_params = [{transform_indices = @transform_0, window_bounds = array<i64: 32, 512>}, {transform_indices = @transform_1, window_bounds = array<i64: 512, 128>}, {transform_indices = @transform_2, window_bounds = array<i64: 32, 128>}]} {
    %c0_i32 = arith.constant 0 : i32
    %0 = arith.cmpi eq, %arg2, %c0_i32 : i32
    %1 = arith.extui %0 : i1 to i32
    %c0_i32_0 = arith.constant 0 : i32
    %2 = arith.cmpi ne, %1, %c0_i32_0 : i32
    scf.if %2 {
      %cst_8 = arith.constant 0.000000e+00 : f32
      %9 = vector.broadcast %cst_8 : f32 to vector<32x128xf32>
      %c0_9 = arith.constant 0 : index
      %c0_10 = arith.constant 0 : index
      %10 = vector.load %arg5[%c0_9, %c0_10] : memref<32x128xf32, #tpu.memory_space<vmem>>, vector<32x128xf32>
      tpu.vector_store %arg5[%c0_9, %c0_10], %9 {strides = array<i32>} : memref<32x128xf32, #tpu.memory_space<vmem>>, vector<32x128xf32>,
    } else {
    }
    %c0 = arith.constant 0 : index
    %c0_1 = arith.constant 0 : index
    %3 = vector.load %arg5[%c0, %c0_1] : memref<32x128xf32, #tpu.memory_space<vmem>>, vector<32x128xf32>
    %c0_2 = arith.constant 0 : index
    %c0_3 = arith.constant 0 : index
    %4 = vector.load %arg3[%c0_2, %c0_3] : memref<32x512xbf16, #tpu.memory_space<vmem>>, vector<32x512xbf16>
    %c0_4 = arith.constant 0 : index
    %c0_5 = arith.constant 0 : index
    %5 = vector.load %arg4[%c0_4, %c0_5] : memref<512x128xbf16, #tpu.memory_space<vmem>>, vector<512x128xbf16>
    %cst = arith.constant dense<0.000000e+00> : vector<32x128xf32>
    %6 = tpu.matmul %4, %5, %cst {dimension_numbers = #tpu.dot_dimension_numbers<[1], [0], [0], [1], [0, 0, 1, 1], [], []>} : vector<32x512xbf16>, vector<512x128xbf16>, vector<32x128xf32> -> vector<32x128xf32>
    %7 = arith.addf %3, %6 : vector<32x128xf32>
    %c0_6 = arith.constant 0 : index
    %c0_7 = arith.constant 0 : index
    %8 = vector.load %arg5[%c0_6, %c0_7] : memref<32x128xf32, #tpu.memory_space<vmem>>, vector<32x128xf32>
    tpu.vector_store %arg5[%c0_6, %c0_7], %7 {strides = array<i32>} : memref<32x128xf32, #tpu.memory_space<vmem>>, vector<32x128xf32>,
    return
  }
  func.func @transform_0(%arg0: i32, %arg1: i32, %arg2: i32) -> (i32, i32) {
    %c0_i32 = arith.constant 0 : i32
    return %arg0, %arg2 : i32, i32
  }
  func.func @transform_1(%arg0: i32, %arg1: i32, %arg2: i32) -> (i32, i32) {
    %c0_i32 = arith.constant 0 : i32
    return %arg2, %arg1 : i32, i32
  }
  func.func @transform_2(%arg0: i32, %arg1: i32, %arg2: i32) -> (i32, i32) {
    %c0_i32 = arith.constant 0 : i32
    return %arg0, %arg1 : i32, i32
  }
}

module attributes {stable_mosaic.version = 11 : i64} {
  func.func @_bn_stats_kernel(%arg0: i32, %arg1: memref<32x256xf32, #tpu.memory_space<vmem>>, %arg2: memref<1x256xf32, #tpu.memory_space<vmem>>, %arg3: memref<1x256xf32, #tpu.memory_space<vmem>>) attributes {dimension_semantics = [#tpu.dimension_semantics<arbitrary>], iteration_bounds = array<i64: 1>, scalar_prefetch = 0 : i64, scratch_operands = 0 : i64, tpu.core_type = #tpu.core_type<tc>, window_params = [{transform_indices = @transform_0, window_bounds = array<i64: 32, 256>}, {pipeline_mode = #tpu.pipeline_mode<synchronous>, transform_indices = @transform_1, window_bounds = array<i64: 1, 256>}, {pipeline_mode = #tpu.pipeline_mode<synchronous>, transform_indices = @transform_2, window_bounds = array<i64: 1, 256>}]} {
    %c0_i32 = arith.constant 0 : i32
    %0 = arith.cmpi eq, %arg0, %c0_i32 : i32
    %1 = arith.extui %0 : i1 to i32
    %c0_i32_0 = arith.constant 0 : i32
    %2 = arith.cmpi ne, %1, %c0_i32_0 : i32
    scf.if %2 {
      %cst_11 = arith.constant 0.000000e+00 : f32
      %15 = vector.broadcast %cst_11 : f32 to vector<1x256xf32>
      %c0_12 = arith.constant 0 : index
      %c0_13 = arith.constant 0 : index
      %16 = vector.load %arg2[%c0_12, %c0_13] : memref<1x256xf32, #tpu.memory_space<vmem>>, vector<1x256xf32>
      tpu.vector_store %arg2[%c0_12, %c0_13], %15 {strides = array<i32>} : memref<1x256xf32, #tpu.memory_space<vmem>>, vector<1x256xf32>,
      %cst_14 = arith.constant 0.000000e+00 : f32
      %17 = vector.broadcast %cst_14 : f32 to vector<1x256xf32>
      %c0_15 = arith.constant 0 : index
      %c0_16 = arith.constant 0 : index
      %18 = vector.load %arg3[%c0_15, %c0_16] : memref<1x256xf32, #tpu.memory_space<vmem>>, vector<1x256xf32>
      tpu.vector_store %arg3[%c0_15, %c0_16], %17 {strides = array<i32>} : memref<1x256xf32, #tpu.memory_space<vmem>>, vector<1x256xf32>,
    } else {
    }
    %c0 = arith.constant 0 : index
    %c0_1 = arith.constant 0 : index
    %3 = vector.load %arg1[%c0, %c0_1] : memref<32x256xf32, #tpu.memory_space<vmem>>, vector<32x256xf32>
    %c0_2 = arith.constant 0 : index
    %c0_3 = arith.constant 0 : index
    %4 = vector.load %arg2[%c0_2, %c0_3] : memref<1x256xf32, #tpu.memory_space<vmem>>, vector<1x256xf32>
    %cst = arith.constant dense<0.000000e+00> : vector<256xf32>
    %5 = vector.multi_reduction <add>, %3, %cst [0] : vector<32x256xf32> to vector<256xf32>
    %6 = vector.shape_cast %5 : vector<256xf32> to vector<1x256xf32>
    %7 = arith.addf %4, %6 : vector<1x256xf32>
    %c0_4 = arith.constant 0 : index
    %c0_5 = arith.constant 0 : index
    %8 = vector.load %arg2[%c0_4, %c0_5] : memref<1x256xf32, #tpu.memory_space<vmem>>, vector<1x256xf32>
    tpu.vector_store %arg2[%c0_4, %c0_5], %7 {strides = array<i32>} : memref<1x256xf32, #tpu.memory_space<vmem>>, vector<1x256xf32>,
    %c0_6 = arith.constant 0 : index
    %c0_7 = arith.constant 0 : index
    %9 = vector.load %arg3[%c0_6, %c0_7] : memref<1x256xf32, #tpu.memory_space<vmem>>, vector<1x256xf32>
    %10 = arith.mulf %3, %3 : vector<32x256xf32>
    %cst_8 = arith.constant dense<0.000000e+00> : vector<256xf32>
    %11 = vector.multi_reduction <add>, %10, %cst_8 [0] : vector<32x256xf32> to vector<256xf32>
    %12 = vector.shape_cast %11 : vector<256xf32> to vector<1x256xf32>
    %13 = arith.addf %9, %12 : vector<1x256xf32>
    %c0_9 = arith.constant 0 : index
    %c0_10 = arith.constant 0 : index
    %14 = vector.load %arg3[%c0_9, %c0_10] : memref<1x256xf32, #tpu.memory_space<vmem>>, vector<1x256xf32>
    tpu.vector_store %arg3[%c0_9, %c0_10], %13 {strides = array<i32>} : memref<1x256xf32, #tpu.memory_space<vmem>>, vector<1x256xf32>,
    return
  }
  func.func @transform_0(%arg0: i32) -> (i32, i32) {
    %c0_i32 = arith.constant 0 : i32
    %c0_i32_0 = arith.constant 0 : i32
    return %arg0, %c0_i32 : i32, i32
  }
  func.func @transform_1(%arg0: i32) -> (i32, i32) {
    %c0_i32 = arith.constant 0 : i32
    %c0_i32_0 = arith.constant 0 : i32
    %c0_i32_1 = arith.constant 0 : i32
    return %c0_i32, %c0_i32_0 : i32, i32
  }
  func.func @transform_2(%arg0: i32) -> (i32, i32) {
    %c0_i32 = arith.constant 0 : i32
    %c0_i32_0 = arith.constant 0 : i32
    %c0_i32_1 = arith.constant 0 : i32
    return %c0_i32, %c0_i32_0 : i32, i32
  }
}

module attributes {stable_mosaic.version = 11 : i64} {
  func.func @_bn_lrelu_kernel(%arg0: i32, %arg1: memref<32x256xf32, #tpu.memory_space<vmem>>, %arg2: memref<1x256xf32, #tpu.memory_space<vmem>>, %arg3: memref<1x256xf32, #tpu.memory_space<vmem>>, %arg4: memref<32x256xbf16, #tpu.memory_space<vmem>>) attributes {dimension_semantics = [#tpu.dimension_semantics<parallel>], iteration_bounds = array<i64: 1>, scalar_prefetch = 0 : i64, scratch_operands = 0 : i64, tpu.core_type = #tpu.core_type<tc>, window_params = [{transform_indices = @transform_0, window_bounds = array<i64: 32, 256>}, {pipeline_mode = #tpu.pipeline_mode<synchronous>, transform_indices = @transform_1, window_bounds = array<i64: 1, 256>}, {pipeline_mode = #tpu.pipeline_mode<synchronous>, transform_indices = @transform_2, window_bounds = array<i64: 1, 256>}, {transform_indices = @transform_3, window_bounds = array<i64: 32, 256>}]} {
    %c0 = arith.constant 0 : index
    %c0_0 = arith.constant 0 : index
    %0 = vector.load %arg1[%c0, %c0_0] : memref<32x256xf32, #tpu.memory_space<vmem>>, vector<32x256xf32>
    %c0_1 = arith.constant 0 : index
    %c0_2 = arith.constant 0 : index
    %1 = vector.load %arg2[%c0_1, %c0_2] : memref<1x256xf32, #tpu.memory_space<vmem>>, vector<1x256xf32>
    %2 = vector.broadcast %1 : vector<1x256xf32> to vector<32x256xf32>
    %3 = arith.mulf %0, %2 : vector<32x256xf32>
    %c0_3 = arith.constant 0 : index
    %c0_4 = arith.constant 0 : index
    %4 = vector.load %arg3[%c0_3, %c0_4] : memref<1x256xf32, #tpu.memory_space<vmem>>, vector<1x256xf32>
    %5 = vector.broadcast %4 : vector<1x256xf32> to vector<32x256xf32>
    %6 = arith.addf %3, %5 : vector<32x256xf32>
    %cst = arith.constant 0.000000e+00 : f32
    %7 = vector.broadcast %cst : f32 to vector<32x256xf32>
    %8 = arith.cmpf oge, %6, %7 : vector<32x256xf32>
    %cst_5 = arith.constant 2.000000e-01 : f32
    %9 = vector.broadcast %cst_5 : f32 to vector<32x256xf32>
    %10 = arith.mulf %9, %6 : vector<32x256xf32>
    %11 = arith.select %8, %6, %10 : vector<32x256xi1>, vector<32x256xf32>
    %12 = arith.truncf %11 : vector<32x256xf32> to vector<32x256xbf16>
    %c0_6 = arith.constant 0 : index
    %c0_7 = arith.constant 0 : index
    %13 = vector.load %arg4[%c0_6, %c0_7] : memref<32x256xbf16, #tpu.memory_space<vmem>>, vector<32x256xbf16>
    tpu.vector_store %arg4[%c0_6, %c0_7], %12 {strides = array<i32>} : memref<32x256xbf16, #tpu.memory_space<vmem>>, vector<32x256xbf16>,
    return
  }
  func.func @transform_0(%arg0: i32) -> (i32, i32) {
    %c0_i32 = arith.constant 0 : i32
    %c0_i32_0 = arith.constant 0 : i32
    return %arg0, %c0_i32 : i32, i32
  }
  func.func @transform_1(%arg0: i32) -> (i32, i32) {
    %c0_i32 = arith.constant 0 : i32
    %c0_i32_0 = arith.constant 0 : i32
    %c0_i32_1 = arith.constant 0 : i32
    return %c0_i32, %c0_i32_0 : i32, i32
  }
  func.func @transform_2(%arg0: i32) -> (i32, i32) {
    %c0_i32 = arith.constant 0 : i32
    %c0_i32_0 = arith.constant 0 : i32
    %c0_i32_1 = arith.constant 0 : i32
    return %c0_i32, %c0_i32_0 : i32, i32
  }
  func.func @transform_3(%arg0: i32) -> (i32, i32) {
    %c0_i32 = arith.constant 0 : i32
    %c0_i32_0 = arith.constant 0 : i32
    return %arg0, %c0_i32 : i32, i32
  }
}

module attributes {stable_mosaic.version = 11 : i64} {
  func.func @_mm_multi_kernel(%arg0: i32, %arg1: i32, %arg2: i32, %arg3: memref<8x512xbf16, #tpu.memory_space<vmem>>, %arg4: memref<512x128xbf16, #tpu.memory_space<vmem>>, %arg5: memref<8x128xf32, #tpu.memory_space<vmem>>) attributes {dimension_semantics = [#tpu.dimension_semantics<parallel>, #tpu.dimension_semantics<parallel>, #tpu.dimension_semantics<arbitrary>], iteration_bounds = array<i64: 1, 4, 8>, scalar_prefetch = 0 : i64, scratch_operands = 0 : i64, tpu.core_type = #tpu.core_type<tc>, window_params = [{transform_indices = @transform_0, window_bounds = array<i64: 8, 512>}, {transform_indices = @transform_1, window_bounds = array<i64: 512, 128>}, {transform_indices = @transform_2, window_bounds = array<i64: 8, 128>}]} {
    %c0_i32 = arith.constant 0 : i32
    %0 = arith.cmpi eq, %arg2, %c0_i32 : i32
    %1 = arith.extui %0 : i1 to i32
    %c0_i32_0 = arith.constant 0 : i32
    %2 = arith.cmpi ne, %1, %c0_i32_0 : i32
    scf.if %2 {
      %cst_8 = arith.constant 0.000000e+00 : f32
      %9 = vector.broadcast %cst_8 : f32 to vector<8x128xf32>
      %c0_9 = arith.constant 0 : index
      %c0_10 = arith.constant 0 : index
      %10 = vector.load %arg5[%c0_9, %c0_10] : memref<8x128xf32, #tpu.memory_space<vmem>>, vector<8x128xf32>
      tpu.vector_store %arg5[%c0_9, %c0_10], %9 {strides = array<i32>} : memref<8x128xf32, #tpu.memory_space<vmem>>, vector<8x128xf32>,
    } else {
    }
    %c0 = arith.constant 0 : index
    %c0_1 = arith.constant 0 : index
    %3 = vector.load %arg5[%c0, %c0_1] : memref<8x128xf32, #tpu.memory_space<vmem>>, vector<8x128xf32>
    %c0_2 = arith.constant 0 : index
    %c0_3 = arith.constant 0 : index
    %4 = vector.load %arg3[%c0_2, %c0_3] : memref<8x512xbf16, #tpu.memory_space<vmem>>, vector<8x512xbf16>
    %c0_4 = arith.constant 0 : index
    %c0_5 = arith.constant 0 : index
    %5 = vector.load %arg4[%c0_4, %c0_5] : memref<512x128xbf16, #tpu.memory_space<vmem>>, vector<512x128xbf16>
    %cst = arith.constant dense<0.000000e+00> : vector<8x128xf32>
    %6 = tpu.matmul %4, %5, %cst {dimension_numbers = #tpu.dot_dimension_numbers<[1], [0], [0], [1], [0, 0, 1, 1], [], []>} : vector<8x512xbf16>, vector<512x128xbf16>, vector<8x128xf32> -> vector<8x128xf32>
    %7 = arith.addf %3, %6 : vector<8x128xf32>
    %c0_6 = arith.constant 0 : index
    %c0_7 = arith.constant 0 : index
    %8 = vector.load %arg5[%c0_6, %c0_7] : memref<8x128xf32, #tpu.memory_space<vmem>>, vector<8x128xf32>
    tpu.vector_store %arg5[%c0_6, %c0_7], %7 {strides = array<i32>} : memref<8x128xf32, #tpu.memory_space<vmem>>, vector<8x128xf32>,
    return
  }
  func.func @transform_0(%arg0: i32, %arg1: i32, %arg2: i32) -> (i32, i32) {
    %c0_i32 = arith.constant 0 : i32
    return %arg0, %arg2 : i32, i32
  }
  func.func @transform_1(%arg0: i32, %arg1: i32, %arg2: i32) -> (i32, i32) {
    %c0_i32 = arith.constant 0 : i32
    return %arg2, %arg1 : i32, i32
  }
  func.func @transform_2(%arg0: i32, %arg1: i32, %arg2: i32) -> (i32, i32) {
    %c0_i32 = arith.constant 0 : i32
    return %arg0, %arg1 : i32, i32
  }
}

module attributes {stable_mosaic.version = 11 : i64} {
  func.func @_bn_stats_kernel(%arg0: i32, %arg1: memref<8x512xf32, #tpu.memory_space<vmem>>, %arg2: memref<1x512xf32, #tpu.memory_space<vmem>>, %arg3: memref<1x512xf32, #tpu.memory_space<vmem>>) attributes {dimension_semantics = [#tpu.dimension_semantics<arbitrary>], iteration_bounds = array<i64: 1>, scalar_prefetch = 0 : i64, scratch_operands = 0 : i64, tpu.core_type = #tpu.core_type<tc>, window_params = [{transform_indices = @transform_0, window_bounds = array<i64: 8, 512>}, {pipeline_mode = #tpu.pipeline_mode<synchronous>, transform_indices = @transform_1, window_bounds = array<i64: 1, 512>}, {pipeline_mode = #tpu.pipeline_mode<synchronous>, transform_indices = @transform_2, window_bounds = array<i64: 1, 512>}]} {
    %c0_i32 = arith.constant 0 : i32
    %0 = arith.cmpi eq, %arg0, %c0_i32 : i32
    %1 = arith.extui %0 : i1 to i32
    %c0_i32_0 = arith.constant 0 : i32
    %2 = arith.cmpi ne, %1, %c0_i32_0 : i32
    scf.if %2 {
      %cst_11 = arith.constant 0.000000e+00 : f32
      %15 = vector.broadcast %cst_11 : f32 to vector<1x512xf32>
      %c0_12 = arith.constant 0 : index
      %c0_13 = arith.constant 0 : index
      %16 = vector.load %arg2[%c0_12, %c0_13] : memref<1x512xf32, #tpu.memory_space<vmem>>, vector<1x512xf32>
      tpu.vector_store %arg2[%c0_12, %c0_13], %15 {strides = array<i32>} : memref<1x512xf32, #tpu.memory_space<vmem>>, vector<1x512xf32>,
      %cst_14 = arith.constant 0.000000e+00 : f32
      %17 = vector.broadcast %cst_14 : f32 to vector<1x512xf32>
      %c0_15 = arith.constant 0 : index
      %c0_16 = arith.constant 0 : index
      %18 = vector.load %arg3[%c0_15, %c0_16] : memref<1x512xf32, #tpu.memory_space<vmem>>, vector<1x512xf32>
      tpu.vector_store %arg3[%c0_15, %c0_16], %17 {strides = array<i32>} : memref<1x512xf32, #tpu.memory_space<vmem>>, vector<1x512xf32>,
    } else {
    }
    %c0 = arith.constant 0 : index
    %c0_1 = arith.constant 0 : index
    %3 = vector.load %arg1[%c0, %c0_1] : memref<8x512xf32, #tpu.memory_space<vmem>>, vector<8x512xf32>
    %c0_2 = arith.constant 0 : index
    %c0_3 = arith.constant 0 : index
    %4 = vector.load %arg2[%c0_2, %c0_3] : memref<1x512xf32, #tpu.memory_space<vmem>>, vector<1x512xf32>
    %cst = arith.constant dense<0.000000e+00> : vector<512xf32>
    %5 = vector.multi_reduction <add>, %3, %cst [0] : vector<8x512xf32> to vector<512xf32>
    %6 = vector.shape_cast %5 : vector<512xf32> to vector<1x512xf32>
    %7 = arith.addf %4, %6 : vector<1x512xf32>
    %c0_4 = arith.constant 0 : index
    %c0_5 = arith.constant 0 : index
    %8 = vector.load %arg2[%c0_4, %c0_5] : memref<1x512xf32, #tpu.memory_space<vmem>>, vector<1x512xf32>
    tpu.vector_store %arg2[%c0_4, %c0_5], %7 {strides = array<i32>} : memref<1x512xf32, #tpu.memory_space<vmem>>, vector<1x512xf32>,
    %c0_6 = arith.constant 0 : index
    %c0_7 = arith.constant 0 : index
    %9 = vector.load %arg3[%c0_6, %c0_7] : memref<1x512xf32, #tpu.memory_space<vmem>>, vector<1x512xf32>
    %10 = arith.mulf %3, %3 : vector<8x512xf32>
    %cst_8 = arith.constant dense<0.000000e+00> : vector<512xf32>
    %11 = vector.multi_reduction <add>, %10, %cst_8 [0] : vector<8x512xf32> to vector<512xf32>
    %12 = vector.shape_cast %11 : vector<512xf32> to vector<1x512xf32>
    %13 = arith.addf %9, %12 : vector<1x512xf32>
    %c0_9 = arith.constant 0 : index
    %c0_10 = arith.constant 0 : index
    %14 = vector.load %arg3[%c0_9, %c0_10] : memref<1x512xf32, #tpu.memory_space<vmem>>, vector<1x512xf32>
    tpu.vector_store %arg3[%c0_9, %c0_10], %13 {strides = array<i32>} : memref<1x512xf32, #tpu.memory_space<vmem>>, vector<1x512xf32>,
    return
  }
  func.func @transform_0(%arg0: i32) -> (i32, i32) {
    %c0_i32 = arith.constant 0 : i32
    %c0_i32_0 = arith.constant 0 : i32
    return %arg0, %c0_i32 : i32, i32
  }
  func.func @transform_1(%arg0: i32) -> (i32, i32) {
    %c0_i32 = arith.constant 0 : i32
    %c0_i32_0 = arith.constant 0 : i32
    %c0_i32_1 = arith.constant 0 : i32
    return %c0_i32, %c0_i32_0 : i32, i32
  }
  func.func @transform_2(%arg0: i32) -> (i32, i32) {
    %c0_i32 = arith.constant 0 : i32
    %c0_i32_0 = arith.constant 0 : i32
    %c0_i32_1 = arith.constant 0 : i32
    return %c0_i32, %c0_i32_0 : i32, i32
  }
}

module attributes {stable_mosaic.version = 11 : i64} {
  func.func @_bn_lrelu_mm_sigmoid_kernel(%arg0: i32, %arg1: memref<8x512xf32, #tpu.memory_space<vmem>>, %arg2: memref<1x512xf32, #tpu.memory_space<vmem>>, %arg3: memref<1x512xf32, #tpu.memory_space<vmem>>, %arg4: memref<512x128xbf16, #tpu.memory_space<vmem>>, %arg5: memref<8x128xf32, #tpu.memory_space<vmem>>) attributes {dimension_semantics = [#tpu.dimension_semantics<parallel>], iteration_bounds = array<i64: 1>, scalar_prefetch = 0 : i64, scratch_operands = 0 : i64, tpu.core_type = #tpu.core_type<tc>, window_params = [{transform_indices = @transform_0, window_bounds = array<i64: 8, 512>}, {pipeline_mode = #tpu.pipeline_mode<synchronous>, transform_indices = @transform_1, window_bounds = array<i64: 1, 512>}, {pipeline_mode = #tpu.pipeline_mode<synchronous>, transform_indices = @transform_2, window_bounds = array<i64: 1, 512>}, {pipeline_mode = #tpu.pipeline_mode<synchronous>, transform_indices = @transform_3, window_bounds = array<i64: 512, 128>}, {transform_indices = @transform_4, window_bounds = array<i64: 8, 128>}]} {
    %c0 = arith.constant 0 : index
    %c0_0 = arith.constant 0 : index
    %0 = vector.load %arg1[%c0, %c0_0] : memref<8x512xf32, #tpu.memory_space<vmem>>, vector<8x512xf32>
    %c0_1 = arith.constant 0 : index
    %c0_2 = arith.constant 0 : index
    %1 = vector.load %arg2[%c0_1, %c0_2] : memref<1x512xf32, #tpu.memory_space<vmem>>, vector<1x512xf32>
    %2 = vector.broadcast %1 : vector<1x512xf32> to vector<8x512xf32>
    %3 = arith.mulf %0, %2 : vector<8x512xf32>
    %c0_3 = arith.constant 0 : index
    %c0_4 = arith.constant 0 : index
    %4 = vector.load %arg3[%c0_3, %c0_4] : memref<1x512xf32, #tpu.memory_space<vmem>>, vector<1x512xf32>
    %5 = vector.broadcast %4 : vector<1x512xf32> to vector<8x512xf32>
    %6 = arith.addf %3, %5 : vector<8x512xf32>
    %cst = arith.constant 0.000000e+00 : f32
    %7 = vector.broadcast %cst : f32 to vector<8x512xf32>
    %8 = arith.cmpf oge, %6, %7 : vector<8x512xf32>
    %cst_5 = arith.constant 2.000000e-01 : f32
    %9 = vector.broadcast %cst_5 : f32 to vector<8x512xf32>
    %10 = arith.mulf %9, %6 : vector<8x512xf32>
    %11 = arith.select %8, %6, %10 : vector<8x512xi1>, vector<8x512xf32>
    %12 = arith.truncf %11 : vector<8x512xf32> to vector<8x512xbf16>
    %c0_6 = arith.constant 0 : index
    %c0_7 = arith.constant 0 : index
    %13 = vector.load %arg4[%c0_6, %c0_7] : memref<512x128xbf16, #tpu.memory_space<vmem>>, vector<512x128xbf16>
    %cst_8 = arith.constant dense<0.000000e+00> : vector<8x128xf32>
    %14 = tpu.matmul %12, %13, %cst_8 {dimension_numbers = #tpu.dot_dimension_numbers<[1], [0], [0], [1], [0, 0, 1, 1], [], []>} : vector<8x512xbf16>, vector<512x128xbf16>, vector<8x128xf32> -> vector<8x128xf32>
    %15 = arith.negf %14 : vector<8x128xf32>
    %16 = math.exp %15 : vector<8x128xf32>
    %cst_9 = arith.constant 1.000000e+00 : f32
    %17 = vector.broadcast %cst_9 : f32 to vector<8x128xf32>
    %18 = arith.addf %17, %16 : vector<8x128xf32>
    %19 = arith.divf %17, %18 : vector<8x128xf32>
    %c0_10 = arith.constant 0 : index
    %c0_11 = arith.constant 0 : index
    %20 = vector.load %arg5[%c0_10, %c0_11] : memref<8x128xf32, #tpu.memory_space<vmem>>, vector<8x128xf32>
    tpu.vector_store %arg5[%c0_10, %c0_11], %19 {strides = array<i32>} : memref<8x128xf32, #tpu.memory_space<vmem>>, vector<8x128xf32>,
    return
  }
  func.func @transform_0(%arg0: i32) -> (i32, i32) {
    %c0_i32 = arith.constant 0 : i32
    %c0_i32_0 = arith.constant 0 : i32
    return %arg0, %c0_i32 : i32, i32
  }
  func.func @transform_1(%arg0: i32) -> (i32, i32) {
    %c0_i32 = arith.constant 0 : i32
    %c0_i32_0 = arith.constant 0 : i32
    %c0_i32_1 = arith.constant 0 : i32
    return %c0_i32, %c0_i32_0 : i32, i32
  }
  func.func @transform_2(%arg0: i32) -> (i32, i32) {
    %c0_i32 = arith.constant 0 : i32
    %c0_i32_0 = arith.constant 0 : i32
    %c0_i32_1 = arith.constant 0 : i32
    return %c0_i32, %c0_i32_0 : i32, i32
  }
  func.func @transform_3(%arg0: i32) -> (i32, i32) {
    %c0_i32 = arith.constant 0 : i32
    %c0_i32_0 = arith.constant 0 : i32
    %c0_i32_1 = arith.constant 0 : i32
    return %c0_i32, %c0_i32_0 : i32, i32
  }
  func.func @transform_4(%arg0: i32) -> (i32, i32) {
    %c0_i32 = arith.constant 0 : i32
    %c0_i32_0 = arith.constant 0 : i32
    return %arg0, %c0_i32 : i32, i32
  }
}

</mosaic_0001>

<bundles_post_ra>
// kernel: discriminator70.10
= control target key start
LH: loop header
LB: loop body
LE: loop exit
PB: predicated region body
PF: predicated region fallthrough
CT: control target
= control target key end

     0   :  { %vm260_vm0 = vcmask 392192   ;;  %s1949_s1 = inlined_call_operand.vmem [shape: bf16[48,128], index: 1, kind: input, shape index: {}]   ;;  %s1950_s0 = inlined_call_operand.vmem [shape: bf16[512,48], index: 0, kind: input, shape index: {}]   ;;  %s1951_s2 = inlined_call_operand.vmem [shape: bf16[512,128], index: 2, kind: output, shape index: {}]  }
   0x1   :  { %v1659_v0 = vld [vmem:[%s1949_s1] sm:$0xff]   ;;  %v1660_v1 = vld [vmem:[%s1949_s1 + $0x8] sm:$0xff]   ;;  %v1661_v2 = vld [vmem:[%s1949_s1 + $0x10] sm:$0xff]  }
   0x2   :  { %1583 = vmatprep.subr.bf16.mxu0 %v1659_v0  ;;  %1653 = vmatprep.subr.bf16.mxu1 %v1659_v0  ;;  %v1662_v3 = vld [vmem:[%s1950_s0] sm:$0xff]   ;;  %v1664_v5 = vld [vmem:[%s1950_s0 + $0x8] sm:$0xff]   ;;  %v1666_v7 = vld [vmem:[%s1950_s0 + $0x10] sm:$0xff]  }
   0x3   :  { %1584 = vmatpush3.bf16.msra.mxu0 %v1659_v0  ;;  %1656 = vmatpush3.bf16.msra.mxu1 %v1659_v0  ;;  %v1663_v4 = vld [vmem:[%s1950_s0 + $0x80] sm:$0xff]   ;;  %v1665_v6 = vld [vmem:[%s1950_s0 + $0x88] sm:$0xff]   ;;  %v1667_v8 = vld [vmem:[%s1950_s0 + $0x90] sm:$0xff]  }
   0x4   :  { %1585 = vmatprep.subr.bf16.mxu0 %v1660_v1  ;;  %1654 = vmatprep.subr.bf16.mxu1 %v1660_v1  ;;  %v1668_v9 = vld [vmem:[%s1950_s0 + $0x18] sm:$0xff]   ;;  %v1670_v11 = vld [vmem:[%s1950_s0 + $0x20] sm:$0xff]   ;;  %v1672_v13 = vld [vmem:[%s1950_s0 + $0x28] sm:$0xff]  }
   0x5   :  { %1589 = vmatprep.mubr.msk.bf16.mxu0 %vm260_vm0, %v1662_v3  ;;  %1621 = vmatprep.mubr.msk.bf16.mxu1 %vm260_vm0, %v1663_v4  ;;  %v1669_v10 = vld [vmem:[%s1950_s0 + $0x98] sm:$0xff]   ;;  %v1671_v12 = vld [vmem:[%s1950_s0 + $0xa0] sm:$0xff]   ;;  %v1673_v14 = vld [vmem:[%s1950_s0 + $0xa8] sm:$0xff]  }
   0x6   :  { %v1674_v15 = vld [vmem:[%s1950_s0 + $0x30] sm:$0xff]   ;;  %v1676_v17 = vld [vmem:[%s1950_s0 + $0x38] sm:$0xff]   ;;  %v1678_v19 = vld [vmem:[%s1950_s0 + $0x40] sm:$0xff]  }
   0x7   :  { %1586 = vmatpush3.bf16.msra.mxu0 %v1660_v1  ;;  %1657 = vmatpush3.bf16.msra.mxu1 %v1660_v1  ;;  %v1675_v16 = vld [vmem:[%s1950_s0 + $0xb0] sm:$0xff]   ;;  %v1677_v18 = vld [vmem:[%s1950_s0 + $0xb8] sm:$0xff]   ;;  %v1679_v20 = vld [vmem:[%s1950_s0 + $0xc0] sm:$0xff]  }
   0x8   :  { %1587 = vmatprep.subr.bf16.mxu0 %v1661_v2  ;;  %1655 = vmatprep.subr.bf16.mxu1 %v1661_v2  ;;  %v1680_v21 = vld [vmem:[%s1950_s0 + $0x48] sm:$0xff]   ;;  %v1682_v23 = vld [vmem:[%s1950_s0 + $0x50] sm:$0xff]   ;;  %v1684_v25 = vld [vmem:[%s1950_s0 + $0x58] sm:$0xff]  }
   0x9   :  { %v1681_v22 = vld [vmem:[%s1950_s0 + $0xc8] sm:$0xff]   ;;  %v1683_v24 = vld [vmem:[%s1950_s0 + $0xd0] sm:$0xff]   ;;  %v1685_v26 = vld [vmem:[%s1950_s0 + $0xd8] sm:$0xff]  }
   0xa   :  { %v1686_v27 = vld [vmem:[%s1950_s0 + $0x60] sm:$0xff]   ;;  %v1688_v29 = vld [vmem:[%s1950_s0 + $0x68] sm:$0xff]   ;;  %v1690_v31 = vld [vmem:[%s1950_s0 + $0x70] sm:$0xff]  }
   0xb   :  { %1588 = vmatpush3.bf16.msra.mxu0 %v1661_v2  ;;  %1658 = vmatpush3.bf16.msra.mxu1 %v1661_v2  ;;  %v1687_v28 = vld [vmem:[%s1950_s0 + $0xe0] sm:$0xff]   ;;  %v1689_v30 = vld [vmem:[%s1950_s0 + $0xe8] sm:$0xff]   ;;  %v1691_v32 = vld [vmem:[%s1950_s0 + $0xf0] sm:$0xff]  }
   0xc   :  { %v1692_v33 = vld [vmem:[%s1950_s0 + $0x78] sm:$0xff]  }
   0xd   :  { %v1693_v34 = vld [vmem:[%s1950_s0 + $0xf8] sm:$0xff]  }
   0xe   :  { %1590 = vmatmul.mubr.msk.bf16.vlgmr.msra.gmra.mrb[0].mxu0 %vm260_vm0, %v1664_v5  ;;  %1622 = vmatmul.mubr.msk.bf16.vlgmr.msra.gmra.mrb[0].mxu1 %vm260_vm0, %v1665_v6 }
   0xf   :  { %1593 = vmatprep.mubr.msk.bf16.mxu0 %vm260_vm0, %v1666_v7  ;;  %1625 = vmatprep.mubr.msk.bf16.mxu1 %vm260_vm0, %v1667_v8 }
  0x16   :  { %1594 = vmatmul.mubr.msk.bf16.gmra.mrb[4].mxu0 %vm260_vm0, %v1668_v9  ;;  %1626 = vmatmul.mubr.msk.bf16.gmra.mrb[4].mxu1 %vm260_vm0, %v1669_v10 }
  0x17   :  { %1597 = vmatprep.mubr.msk.bf16.mxu0 %vm260_vm0, %v1670_v11  ;;  %1629 = vmatprep.mubr.msk.bf16.mxu1 %vm260_vm0, %v1671_v12 }
  0x1e   :  { %1598 = vmatmul.mubr.msk.bf16.gmra.mrb[8].mxu0 %vm260_vm0, %v1672_v13  ;;  %1630 = vmatmul.mubr.msk.bf16.gmra.mrb[8].mxu1 %vm260_vm0, %v1673_v14 }
  0x1f   :  { %1601 = vmatprep.mubr.msk.bf16.mxu0 %vm260_vm0, %v1674_v15  ;;  %1633 = vmatprep.mubr.msk.bf16.mxu1 %vm260_vm0, %v1675_v16 }
  0x26   :  { %1602 = vmatmul.mubr.msk.bf16.gmra.mrb[12].mxu0 %vm260_vm0, %v1676_v17  ;;  %1634 = vmatmul.mubr.msk.bf16.gmra.mrb[12].mxu1 %vm260_vm0, %v1677_v18 }
  0x27   :  { %1605 = vmatprep.mubr.msk.bf16.mxu0 %vm260_vm0, %v1678_v19  ;;  %1637 = vmatprep.mubr.msk.bf16.mxu1 %vm260_vm0, %v1679_v20 }
  0x2e   :  { %1606 = vmatmul.mubr.msk.bf16.gmra.mrb[16].mxu0 %vm260_vm0, %v1680_v21  ;;  %1638 = vmatmul.mubr.msk.bf16.gmra.mrb[16].mxu1 %vm260_vm0, %v1681_v22 }
  0x2f   :  { %1609 = vmatprep.mubr.msk.bf16.mxu0 %vm260_vm0, %v1682_v23  ;;  %1641 = vmatprep.mubr.msk.bf16.mxu1 %vm260_vm0, %v1683_v24 }
  0x36   :  { %1610 = vmatmul.mubr.msk.bf16.gmra.mrb[20].mxu0 %vm260_vm0, %v1684_v25  ;;  %1642 = vmatmul.mubr.msk.bf16.gmra.mrb[20].mxu1 %vm260_vm0, %v1685_v26 }
  0x37   :  { %1613 = vmatprep.mubr.msk.bf16.mxu0 %vm260_vm0, %v1686_v27  ;;  %1645 = vmatprep.mubr.msk.bf16.mxu1 %vm260_vm0, %v1687_v28 }
  0x3e   :  { %1614 = vmatmul.mubr.msk.bf16.gmra.mrb[24].mxu0 %vm260_vm0, %v1688_v29  ;;  %1646 = vmatmul.mubr.msk.bf16.gmra.mrb[24].mxu1 %vm260_vm0, %v1689_v30 }
  0x3f   :  { %1617 = vmatprep.mubr.msk.bf16.mxu0 %vm260_vm0, %v1690_v31  ;;  %1649 = vmatprep.mubr.msk.bf16.mxu1 %vm260_vm0, %v1691_v32 }
  0x46   :  { %1618 = vmatmul.mubr.msk.bf16.gmra.mrb[28].mxu0 %vm260_vm0, %v1692_v33  ;;  %1650 = vmatmul.mubr.msk.bf16.gmra.mrb[28].mxu1 %vm260_vm0, %v1693_v34 }
  0xe1   :  { %v1591_v35 = vpop.f32.mrb[0].mxu0  ;;  %v1623_v36 = vpop.f32.mrb[0].mxu1 }
  0xe2   :  { %vm648_vm1 = vcmp.ge.f32.partialorder %v1591_v35, 0.0  ;;  %v712_v37 = vmul.f32 0.2, %v1591_v35  ;;  %v744_v38 = vmul.f32 0.2, %v1623_v36  ;;  %vm680_vm2 = vcmp.ge.f32.partialorder %v1623_v36, 0.0 }
  0xe3   :  { %v391_v39 = vpop.f32.mrb[1].mxu0  ;;  %v519_v40 = vpop.f32.mrb[1].mxu1 }
  0xe4   :  { %v710_v41 = vmul.f32 0.2, %v391_v39  ;;  %v1592_v42 = vpop.f32.mrb[2].mxu0  ;;  %v1624_v43 = vpop.f32.mrb[2].mxu1  ;;  %v776_v44 = vsel %vm648_vm1, %v1591_v35, %v712_v37  ;;  %v742_v45 = vmul.f32 0.2, %v519_v40  ;;  %v808_v47 = vsel %vm680_vm2, %v1623_v36, %v744_v38 }
  0xe5   :  { %vm649_vm3 = vcmp.ge.f32.partialorder %v1592_v42, 0.0  ;;  %v713_v46 = vmul.f32 0.2, %v1592_v42  ;;  %vm646_vm4 = vcmp.ge.f32.partialorder %v391_v39, 0.0  ;;  %vm681_vm5 = vcmp.ge.f32.partialorder %v1624_v43, 0.0  ;;  %v394_v49 = vpop.f32.mrb[3].mxu0 }
  0xe6   :  { %v745_v48 = vmul.f32 0.2, %v1624_v43  ;;  %v522_v50 = vpop.f32.mrb[3].mxu1  ;;  %vm678_vm6 = vcmp.ge.f32.partialorder %v519_v40, 0.0  ;;  %vm647_vm7 = vcmp.ge.f32.partialorder %v394_v49, 0.0  ;;  %v774_v56 = vsel %vm646_vm4, %v391_v39, %v710_v41 }
  0xe7   :  { %v777_v51 = vsel %vm649_vm3, %v1592_v42, %v713_v46  ;;  %v711_v52 = vmul.f32 0.2, %v394_v49  ;;  %vm679_vm8 = vcmp.ge.f32.partialorder %v522_v50, 0.0  ;;  %v743_v55 = vmul.f32 0.2, %v522_v50 }
  0xe8   :  { %v1365_v53 = vpack.c.bf16 %v777_v51, %v776_v44  ;;  %v809_v54 = vsel %vm681_vm5, %v1624_v43, %v745_v48  ;;  %v806_v61 = vsel %vm678_vm6, %v519_v40, %v742_v45 }
  0xe9   :  { %v1445_v57 = vpack.c.bf16 %v809_v54, %v808_v47  ;;  %v775_v58 = vsel %vm647_vm7, %v394_v49, %v711_v52  ;;  %v1595_v59 = vpop.f32.mrb[4].mxu0  ;;  %v1627_v60 = vpop.f32.mrb[4].mxu1  ;;  %v807_v63 = vsel %vm679_vm8, %v522_v50, %v743_v55 }
  0xea   :  { %1517 = vst [vmem:[%s1951_s2 + $0x8] sm:$0xff] %v1365_v53   ;;  %v1360_v62 = vpack.c.bf16 %v775_v58, %v774_v56  ;;  %v716_v0 = vmul.f32 0.2, %v1595_v59  ;;  %v407_v1 = vpop.f32.mrb[5].mxu0  ;;  %v535_v2 = vpop.f32.mrb[5].mxu1  ;;  %v1440_v3 = vpack.c.bf16 %v807_v63, %v806_v61  ;;  %vm652_vm9 = vcmp.ge.f32.partialorder %v1595_v59, 0.0 }
  0xeb   :  { %1533 = vst [vmem:[%s1951_s2 + $0x88] sm:$0xff] %v1445_v57   ;;  %v748_v4 = vmul.f32 0.2, %v1627_v60  ;;  %v1596_v5 = vpop.f32.mrb[6].mxu0  ;;  %v1628_v6 = vpop.f32.mrb[6].mxu1  ;;  %vm684_vm10 = vcmp.ge.f32.partialorder %v1627_v60, 0.0 }
  0xec   :  { %1361 = vst [vmem:[%s1951_s2] sm:$0xff] %v1360_v62   ;;  %v714_v7 = vmul.f32 0.2, %v407_v1  ;;  %v746_v8 = vmul.f32 0.2, %v535_v2  ;;  %v410_v9 = vpop.f32.mrb[7].mxu0  ;;  %1532 = vst [vmem:[%s1951_s2 + $0x80] sm:$0xff] %v1440_v3   ;;  %v780_v12 = vsel %vm652_vm9, %v1595_v59, %v716_v0 }
  0xed   :  { %vm650_vm11 = vcmp.ge.f32.partialorder %v407_v1, 0.0  ;;  %vm653_vm12 = vcmp.ge.f32.partialorder %v1596_v5, 0.0  ;;  %v717_v10 = vmul.f32 0.2, %v1596_v5  ;;  %vm685_vm13 = vcmp.ge.f32.partialorder %v1628_v6, 0.0  ;;  %v538_v11 = vpop.f32.mrb[7].mxu1 }
  0xee   :  { %vm682_vm14 = vcmp.ge.f32.partialorder %v535_v2, 0.0  ;;  %v749_v13 = vmul.f32 0.2, %v1628_v6  ;;  %vm651_vm15 = vcmp.ge.f32.partialorder %v410_v9, 0.0  ;;  %v715_v15 = vmul.f32 0.2, %v410_v9 }
  0xef   :  { %v781_v14 = vsel %vm653_vm12, %v1596_v5, %v717_v10  ;;  %vm683_vm0 = vcmp.ge.f32.partialorder %v538_v11, 0.0  ;;  %v747_v16 = vmul.f32 0.2, %v538_v11  ;;  %v812_v17 = vsel %vm684_vm10, %v1627_v60, %v748_v4 }
  0xf0   :  { %v778_v18 = vsel %vm650_vm11, %v407_v1, %v714_v7  ;;  %v1375_v19 = vpack.c.bf16 %v781_v14, %v780_v12  ;;  %v813_v20 = vsel %vm685_vm13, %v1628_v6, %v749_v13  ;;  %v810_v21 = vsel %vm682_vm14, %v535_v2, %v746_v8 }
  0xf1   :  { %v1455_v22 = vpack.c.bf16 %v813_v20, %v812_v17  ;;  %v779_v23 = vsel %vm651_vm15, %v410_v9, %v715_v15  ;;  %v811_v24 = vsel %vm683_vm0, %v538_v11, %v747_v16  ;;  %v1599_v25 = vpop.f32.mrb[8].mxu0  ;;  %v1631_v26 = vpop.f32.mrb[8].mxu1 }
  0xf2   :  { %1519 = vst [vmem:[%s1951_s2 + $0x18] sm:$0xff] %v1375_v19   ;;  %v1370_v27 = vpack.c.bf16 %v779_v23, %v778_v18  ;;  %v1450_v28 = vpack.c.bf16 %v811_v24, %v810_v21  ;;  %vm656_vm1 = vcmp.ge.f32.partialorder %v1599_v25, 0.0  ;;  %v720_v29 = vmul.f32 0.2, %v1599_v25  ;;  %v423_v30 = vpop.f32.mrb[9].mxu0  ;;  %v551_v31 = vpop.f32.mrb[9].mxu1 }
  0xf3   :  { %1535 = vst [vmem:[%s1951_s2 + $0x98] sm:$0xff] %v1455_v22   ;;  %vm688_vm2 = vcmp.ge.f32.partialorder %v1631_v26, 0.0  ;;  %v752_v32 = vmul.f32 0.2, %v1631_v26  ;;  %v718_v33 = vmul.f32 0.2, %v423_v30 }
  0xf4   :  { %1518 = vst [vmem:[%s1951_s2 + $0x10] sm:$0xff] %v1370_v27   ;;  %1534 = vst [vmem:[%s1951_s2 + $0x90] sm:$0xff] %v1450_v28   ;;  %v750_v34 = vmul.f32 0.2, %v551_v31  ;;  %v1600_v35 = vpop.f32.mrb[10].mxu0  ;;  %v1632_v36 = vpop.f32.mrb[10].mxu1  ;;  %v784_v37 = vsel %vm656_vm1, %v1599_v25, %v720_v29 }
  0xf5   :  { %vm654_vm3 = vcmp.ge.f32.partialorder %v423_v30, 0.0  ;;  %vm657_vm4 = vcmp.ge.f32.partialorder %v1600_v35, 0.0  ;;  %v721_v38 = vmul.f32 0.2, %v1600_v35  ;;  %v426_v39 = vpop.f32.mrb[11].mxu0  ;;  %v554_v40 = vpop.f32.mrb[11].mxu1  ;;  %v816_v45 = vsel %vm688_vm2, %v1631_v26, %v752_v32 }
  0xf6   :  { %vm686_vm5 = vcmp.ge.f32.partialorder %v551_v31, 0.0  ;;  %vm689_vm6 = vcmp.ge.f32.partialorder %v1632_v36, 0.0  ;;  %v753_v41 = vmul.f32 0.2, %v1632_v36  ;;  %vm655_vm7 = vcmp.ge.f32.partialorder %v426_v39, 0.0 }
  0xf7   :  { %v785_v42 = vsel %vm657_vm4, %v1600_v35, %v721_v38  ;;  %v719_v43 = vmul.f32 0.2, %v426_v39  ;;  %vm687_vm8 = vcmp.ge.f32.partialorder %v554_v40, 0.0  ;;  %v751_v44 = vmul.f32 0.2, %v554_v40 }
  0xf8   :  { %v782_v46 = vsel %vm654_vm3, %v423_v30, %v718_v33  ;;  %v1385_v47 = vpack.c.bf16 %v785_v42, %v784_v37  ;;  %v817_v48 = vsel %vm689_vm6, %v1632_v36, %v753_v41  ;;  %v814_v49 = vsel %vm686_vm5, %v551_v31, %v750_v34 }
  0xf9   :  { %v1465_v50 = vpack.c.bf16 %v817_v48, %v816_v45  ;;  %v783_v51 = vsel %vm655_vm7, %v426_v39, %v719_v43  ;;  %v815_v52 = vsel %vm687_vm8, %v554_v40, %v751_v44  ;;  %v1603_v53 = vpop.f32.mrb[12].mxu0  ;;  %v1635_v54 = vpop.f32.mrb[12].mxu1 }
  0xfa   :  { %1521 = vst [vmem:[%s1951_s2 + $0x28] sm:$0xff] %v1385_v47   ;;  %v1380_v55 = vpack.c.bf16 %v783_v51, %v782_v46  ;;  %v1460_v56 = vpack.c.bf16 %v815_v52, %v814_v49  ;;  %vm660_vm9 = vcmp.ge.f32.partialorder %v1603_v53, 0.0  ;;  %v724_v57 = vmul.f32 0.2, %v1603_v53  ;;  %v439_v58 = vpop.f32.mrb[13].mxu0  ;;  %v567_v59 = vpop.f32.mrb[13].mxu1 }
  0xfb   :  { %1537 = vst [vmem:[%s1951_s2 + $0xa8] sm:$0xff] %v1465_v50   ;;  %vm692_vm10 = vcmp.ge.f32.partialorder %v1635_v54, 0.0  ;;  %v756_v60 = vmul.f32 0.2, %v1635_v54  ;;  %v722_v61 = vmul.f32 0.2, %v439_v58 }
  0xfc   :  { %1520 = vst [vmem:[%s1951_s2 + $0x20] sm:$0xff] %v1380_v55   ;;  %1536 = vst [vmem:[%s1951_s2 + $0xa0] sm:$0xff] %v1460_v56   ;;  %v754_v62 = vmul.f32 0.2, %v567_v59  ;;  %v1604_v63 = vpop.f32.mrb[14].mxu0  ;;  %v1636_v0 = vpop.f32.mrb[14].mxu1  ;;  %v788_v1 = vsel %vm660_vm9, %v1603_v53, %v724_v57 }
  0xfd   :  { %vm658_vm11 = vcmp.ge.f32.partialorder %v439_v58, 0.0  ;;  %vm661_vm12 = vcmp.ge.f32.partialorder %v1604_v63, 0.0  ;;  %v725_v2 = vmul.f32 0.2, %v1604_v63  ;;  %v442_v3 = vpop.f32.mrb[15].mxu0  ;;  %v570_v4 = vpop.f32.mrb[15].mxu1  ;;  %v820_v9 = vsel %vm692_vm10, %v1635_v54, %v756_v60 }
  0xfe   :  { %vm690_vm13 = vcmp.ge.f32.partialorder %v567_v59, 0.0  ;;  %vm693_vm14 = vcmp.ge.f32.partialorder %v1636_v0, 0.0  ;;  %v757_v5 = vmul.f32 0.2, %v1636_v0  ;;  %vm659_vm15 = vcmp.ge.f32.partialorder %v442_v3, 0.0 }
  0xff   :  { %v789_v6 = vsel %vm661_vm12, %v1604_v63, %v725_v2  ;;  %v723_v7 = vmul.f32 0.2, %v442_v3  ;;  %vm691_vm0 = vcmp.ge.f32.partialorder %v570_v4, 0.0  ;;  %v755_v8 = vmul.f32 0.2, %v570_v4 }
 0x100   :  { %v786_v10 = vsel %vm658_vm11, %v439_v58, %v722_v61  ;;  %v1395_v11 = vpack.c.bf16 %v789_v6, %v788_v1  ;;  %v821_v12 = vsel %vm693_vm14, %v1636_v0, %v757_v5  ;;  %v818_v13 = vsel %vm690_vm13, %v567_v59, %v754_v62 }
 0x101   :  { %v1475_v14 = vpack.c.bf16 %v821_v12, %v820_v9  ;;  %v787_v15 = vsel %vm659_vm15, %v442_v3, %v723_v7  ;;  %v819_v16 = vsel %vm691_vm0, %v570_v4, %v755_v8  ;;  %v1607_v17 = vpop.f32.mrb[16].mxu0  ;;  %v1639_v18 = vpop.f32.mrb[16].mxu1 }
 0x102   :  { %1523 = vst [vmem:[%s1951_s2 + $0x38] sm:$0xff] %v1395_v11   ;;  %v1390_v19 = vpack.c.bf16 %v787_v15, %v786_v10  ;;  %v1470_v20 = vpack.c.bf16 %v819_v16, %v818_v13  ;;  %vm664_vm1 = vcmp.ge.f32.partialorder %v1607_v17, 0.0  ;;  %v728_v21 = vmul.f32 0.2, %v1607_v17  ;;  %v455_v22 = vpop.f32.mrb[17].mxu0  ;;  %v583_v23 = vpop.f32.mrb[17].mxu1 }
 0x103   :  { %1539 = vst [vmem:[%s1951_s2 + $0xb8] sm:$0xff] %v1475_v14   ;;  %vm696_vm2 = vcmp.ge.f32.partialorder %v1639_v18, 0.0  ;;  %v760_v24 = vmul.f32 0.2, %v1639_v18  ;;  %v726_v25 = vmul.f32 0.2, %v455_v22 }
 0x104   :  { %1522 = vst [vmem:[%s1951_s2 + $0x30] sm:$0xff] %v1390_v19   ;;  %1538 = vst [vmem:[%s1951_s2 + $0xb0] sm:$0xff] %v1470_v20   ;;  %v758_v26 = vmul.f32 0.2, %v583_v23  ;;  %v1608_v27 = vpop.f32.mrb[18].mxu0  ;;  %v1640_v28 = vpop.f32.mrb[18].mxu1  ;;  %v792_v29 = vsel %vm664_vm1, %v1607_v17, %v728_v21 }
 0x105   :  { %vm662_vm3 = vcmp.ge.f32.partialorder %v455_v22, 0.0  ;;  %vm665_vm4 = vcmp.ge.f32.partialorder %v1608_v27, 0.0  ;;  %v729_v30 = vmul.f32 0.2, %v1608_v27  ;;  %v458_v31 = vpop.f32.mrb[19].mxu0  ;;  %v586_v32 = vpop.f32.mrb[19].mxu1  ;;  %v824_v37 = vsel %vm696_vm2, %v1639_v18, %v760_v24 }
 0x106   :  { %vm694_vm5 = vcmp.ge.f32.partialorder %v583_v23, 0.0  ;;  %vm697_vm6 = vcmp.ge.f32.partialorder %v1640_v28, 0.0  ;;  %v761_v33 = vmul.f32 0.2, %v1640_v28  ;;  %vm663_vm7 = vcmp.ge.f32.partialorder %v458_v31, 0.0 }
 0x107   :  { %v793_v34 = vsel %vm665_vm4, %v1608_v27, %v729_v30  ;;  %v727_v35 = vmul.f32 0.2, %v458_v31  ;;  %vm695_vm8 = vcmp.ge.f32.partialorder %v586_v32, 0.0  ;;  %v759_v36 = vmul.f32 0.2, %v586_v32 }
 0x108   :  { %v790_v38 = vsel %vm662_vm3, %v455_v22, %v726_v25  ;;  %v1405_v39 = vpack.c.bf16 %v793_v34, %v792_v29  ;;  %v825_v40 = vsel %vm697_vm6, %v1640_v28, %v761_v33  ;;  %v822_v41 = vsel %vm694_vm5, %v583_v23, %v758_v26 }
 0x109   :  { %v1485_v42 = vpack.c.bf16 %v825_v40, %v824_v37  ;;  %v791_v43 = vsel %vm663_vm7, %v458_v31, %v727_v35  ;;  %v823_v44 = vsel %vm695_vm8, %v586_v32, %v759_v36  ;;  %v1611_v45 = vpop.f32.mrb[20].mxu0  ;;  %v1643_v46 = vpop.f32.mrb[20].mxu1 }
 0x10a   :  { %1525 = vst [vmem:[%s1951_s2 + $0x48] sm:$0xff] %v1405_v39   ;;  %v1400_v47 = vpack.c.bf16 %v791_v43, %v790_v38  ;;  %v1480_v48 = vpack.c.bf16 %v823_v44, %v822_v41  ;;  %vm668_vm9 = vcmp.ge.f32.partialorder %v1611_v45, 0.0  ;;  %v732_v49 = vmul.f32 0.2, %v1611_v45  ;;  %v471_v50 = vpop.f32.mrb[21].mxu0  ;;  %v599_v51 = vpop.f32.mrb[21].mxu1 }
 0x10b   :  { %1541 = vst [vmem:[%s1951_s2 + $0xc8] sm:$0xff] %v1485_v42   ;;  %vm700_vm10 = vcmp.ge.f32.partialorder %v1643_v46, 0.0  ;;  %v764_v52 = vmul.f32 0.2, %v1643_v46  ;;  %v730_v53 = vmul.f32 0.2, %v471_v50 }
 0x10c   :  { %1524 = vst [vmem:[%s1951_s2 + $0x40] sm:$0xff] %v1400_v47   ;;  %1540 = vst [vmem:[%s1951_s2 + $0xc0] sm:$0xff] %v1480_v48   ;;  %v762_v54 = vmul.f32 0.2, %v599_v51  ;;  %v1612_v55 = vpop.f32.mrb[22].mxu0  ;;  %v1644_v56 = vpop.f32.mrb[22].mxu1  ;;  %v796_v57 = vsel %vm668_vm9, %v1611_v45, %v732_v49 }
 0x10d   :  { %vm666_vm11 = vcmp.ge.f32.partialorder %v471_v50, 0.0  ;;  %vm669_vm12 = vcmp.ge.f32.partialorder %v1612_v55, 0.0  ;;  %v733_v58 = vmul.f32 0.2, %v1612_v55  ;;  %v474_v59 = vpop.f32.mrb[23].mxu0  ;;  %v602_v60 = vpop.f32.mrb[23].mxu1  ;;  %v828_v1 = vsel %vm700_vm10, %v1643_v46, %v764_v52 }
 0x10e   :  { %vm698_vm13 = vcmp.ge.f32.partialorder %v599_v51, 0.0  ;;  %vm701_vm14 = vcmp.ge.f32.partialorder %v1644_v56, 0.0  ;;  %v765_v61 = vmul.f32 0.2, %v1644_v56  ;;  %vm667_vm15 = vcmp.ge.f32.partialorder %v474_v59, 0.0 }
 0x10f   :  { %v797_v62 = vsel %vm669_vm12, %v1612_v55, %v733_v58  ;;  %v731_v63 = vmul.f32 0.2, %v474_v59  ;;  %vm699_vm0 = vcmp.ge.f32.partialorder %v602_v60, 0.0  ;;  %v763_v0 = vmul.f32 0.2, %v602_v60 }
 0x110   :  { %v794_v2 = vsel %vm666_vm11, %v471_v50, %v730_v53  ;;  %v1415_v3 = vpack.c.bf16 %v797_v62, %v796_v57  ;;  %v829_v4 = vsel %vm701_vm14, %v1644_v56, %v765_v61  ;;  %v826_v5 = vsel %vm698_vm13, %v599_v51, %v762_v54 }
 0x111   :  { %v1495_v6 = vpack.c.bf16 %v829_v4, %v828_v1  ;;  %v795_v7 = vsel %vm667_vm15, %v474_v59, %v731_v63  ;;  %v827_v8 = vsel %vm699_vm0, %v602_v60, %v763_v0  ;;  %v1615_v9 = vpop.f32.mrb[24].mxu0  ;;  %v1647_v10 = vpop.f32.mrb[24].mxu1 }
 0x112   :  { %1527 = vst [vmem:[%s1951_s2 + $0x58] sm:$0xff] %v1415_v3   ;;  %v1410_v11 = vpack.c.bf16 %v795_v7, %v794_v2  ;;  %v1490_v12 = vpack.c.bf16 %v827_v8, %v826_v5  ;;  %vm672_vm1 = vcmp.ge.f32.partialorder %v1615_v9, 0.0  ;;  %v736_v13 = vmul.f32 0.2, %v1615_v9  ;;  %v487_v14 = vpop.f32.mrb[25].mxu0  ;;  %v615_v15 = vpop.f32.mrb[25].mxu1 }
 0x113   :  { %1543 = vst [vmem:[%s1951_s2 + $0xd8] sm:$0xff] %v1495_v6   ;;  %vm704_vm2 = vcmp.ge.f32.partialorder %v1647_v10, 0.0  ;;  %v768_v16 = vmul.f32 0.2, %v1647_v10  ;;  %v734_v17 = vmul.f32 0.2, %v487_v14 }
 0x114   :  { %1526 = vst [vmem:[%s1951_s2 + $0x50] sm:$0xff] %v1410_v11   ;;  %1542 = vst [vmem:[%s1951_s2 + $0xd0] sm:$0xff] %v1490_v12   ;;  %v766_v18 = vmul.f32 0.2, %v615_v15  ;;  %v1616_v19 = vpop.f32.mrb[26].mxu0  ;;  %v1648_v20 = vpop.f32.mrb[26].mxu1  ;;  %v800_v21 = vsel %vm672_vm1, %v1615_v9, %v736_v13 }
 0x115   :  { %vm670_vm3 = vcmp.ge.f32.partialorder %v487_v14, 0.0  ;;  %vm673_vm4 = vcmp.ge.f32.partialorder %v1616_v19, 0.0  ;;  %v737_v22 = vmul.f32 0.2, %v1616_v19  ;;  %v490_v23 = vpop.f32.mrb[27].mxu0  ;;  %v618_v24 = vpop.f32.mrb[27].mxu1  ;;  %v832_v29 = vsel %vm704_vm2, %v1647_v10, %v768_v16 }
 0x116   :  { %vm702_vm5 = vcmp.ge.f32.partialorder %v615_v15, 0.0  ;;  %vm705_vm6 = vcmp.ge.f32.partialorder %v1648_v20, 0.0  ;;  %v769_v25 = vmul.f32 0.2, %v1648_v20  ;;  %vm671_vm7 = vcmp.ge.f32.partialorder %v490_v23, 0.0 }
 0x117   :  { %v801_v26 = vsel %vm673_vm4, %v1616_v19, %v737_v22  ;;  %v735_v27 = vmul.f32 0.2, %v490_v23  ;;  %vm703_vm8 = vcmp.ge.f32.partialorder %v618_v24, 0.0  ;;  %v767_v28 = vmul.f32 0.2, %v618_v24 }
 0x118   :  { %v798_v30 = vsel %vm670_vm3, %v487_v14, %v734_v17  ;;  %v1425_v31 = vpack.c.bf16 %v801_v26, %v800_v21  ;;  %v833_v32 = vsel %vm705_vm6, %v1648_v20, %v769_v25  ;;  %v830_v33 = vsel %vm702_vm5, %v615_v15, %v766_v18 }
 0x119   :  { %v1505_v34 = vpack.c.bf16 %v833_v32, %v832_v29  ;;  %v799_v35 = vsel %vm671_vm7, %v490_v23, %v735_v27  ;;  %v831_v36 = vsel %vm703_vm8, %v618_v24, %v767_v28  ;;  %v1619_v37 = vpop.f32.mrb[28].mxu0  ;;  %v1651_v38 = vpop.f32.mrb[28].mxu1 }
 0x11a   :  { %1529 = vst [vmem:[%s1951_s2 + $0x68] sm:$0xff] %v1425_v31   ;;  %v1420_v39 = vpack.c.bf16 %v799_v35, %v798_v30  ;;  %v1500_v40 = vpack.c.bf16 %v831_v36, %v830_v33  ;;  %vm676_vm9 = vcmp.ge.f32.partialorder %v1619_v37, 0.0  ;;  %v740_v41 = vmul.f32 0.2, %v1619_v37  ;;  %v503_v42 = vpop.f32.mrb[29].mxu0  ;;  %v631_v43 = vpop.f32.mrb[29].mxu1 }
 0x11b   :  { %1545 = vst [vmem:[%s1951_s2 + $0xe8] sm:$0xff] %v1505_v34   ;;  %vm708_vm10 = vcmp.ge.f32.partialorder %v1651_v38, 0.0  ;;  %v772_v44 = vmul.f32 0.2, %v1651_v38  ;;  %v738_v45 = vmul.f32 0.2, %v503_v42 }
 0x11c   :  { %1528 = vst [vmem:[%s1951_s2 + $0x60] sm:$0xff] %v1420_v39   ;;  %1544 = vst [vmem:[%s1951_s2 + $0xe0] sm:$0xff] %v1500_v40   ;;  %v770_v46 = vmul.f32 0.2, %v631_v43  ;;  %v1620_v47 = vpop.f32.mrb[30].mxu0  ;;  %v1652_v48 = vpop.f32.mrb[30].mxu1  ;;  %v804_v49 = vsel %vm676_vm9, %v1619_v37, %v740_v41 }
 0x11d   :  { %vm674_vm11 = vcmp.ge.f32.partialorder %v503_v42, 0.0  ;;  %vm677_vm12 = vcmp.ge.f32.partialorder %v1620_v47, 0.0  ;;  %v741_v50 = vmul.f32 0.2, %v1620_v47  ;;  %v506_v51 = vpop.f32.mrb[31].mxu0  ;;  %v634_v52 = vpop.f32.mrb[31].mxu1  ;;  %v836_v57 = vsel %vm708_vm10, %v1651_v38, %v772_v44 }
 0x11e   :  { %vm706_vm13 = vcmp.ge.f32.partialorder %v631_v43, 0.0  ;;  %vm709_vm14 = vcmp.ge.f32.partialorder %v1652_v48, 0.0  ;;  %v773_v53 = vmul.f32 0.2, %v1652_v48  ;;  %vm675_vm15 = vcmp.ge.f32.partialorder %v506_v51, 0.0 }
 0x11f   :  { %v805_v54 = vsel %vm677_vm12, %v1620_v47, %v741_v50  ;;  %v739_v55 = vmul.f32 0.2, %v506_v51  ;;  %vm707_vm0 = vcmp.ge.f32.partialorder %v634_v52, 0.0  ;;  %v771_v56 = vmul.f32 0.2, %v634_v52 }
 0x120   :  { %v802_v58 = vsel %vm674_vm11, %v503_v42, %v738_v45  ;;  %v1435_v59 = vpack.c.bf16 %v805_v54, %v804_v49  ;;  %v837_v60 = vsel %vm709_vm14, %v1652_v48, %v773_v53  ;;  %v834_v61 = vsel %vm706_vm13, %v631_v43, %v770_v46 }
 0x121   :  { %v1515_v62 = vpack.c.bf16 %v837_v60, %v836_v57  ;;  %v803_v63 = vsel %vm675_vm15, %v506_v51, %v739_v55  ;;  %v835_v0 = vsel %vm707_vm0, %v634_v52, %v771_v56 }
 0x122   :  { %1531 = vst [vmem:[%s1951_s2 + $0x78] sm:$0xff] %v1435_v59   ;;  %v1430_v1 = vpack.c.bf16 %v803_v63, %v802_v58  ;;  %v1510_v2 = vpack.c.bf16 %v835_v0, %v834_v61 }
 0x123   :  { %1547 = vst [vmem:[%s1951_s2 + $0xf8] sm:$0xff] %v1515_v62  }
 0x124   :  { %1530 = vst [vmem:[%s1951_s2 + $0x70] sm:$0xff] %v1430_v1   ;;  %1546 = vst [vmem:[%s1951_s2 + $0xf0] sm:$0xff] %v1510_v2  }

// kernel: discriminator70.11
= control target key start
LH: loop header
LB: loop body
LE: loop exit
PB: predicated region body
PF: predicated region fallthrough
CT: control target
= control target key end

     0   :  { %s1489_s9 = smov 0   ;;  %s1491_s10 = smov 0   ;;  %s1835_s0 = inlined_call_operand.vmem [shape: bf16[128,1024], index: 0, kind: input, shape index: {}]   ;;  %s1836_s1 = inlined_call_operand.vmem [shape: bf16[1024,128], index: 1, kind: input, shape index: {}]   ;;  %s1837_s2 = inlined_call_operand.vmem [shape: f32[128,128], index: 2, kind: output, shape index: {}]  }
   0x1   :  { %s1493_s11 = smov 0   ;;  %s1495_s12 = smov 0  }
   0x2   :  { %s1497_s13 = smov 0  }
   0x3 LB: > { %s24_s14 = sadd.s32 1, %s1467_s12  ;;  %p47_p1 = scmp.ne.s32.totalorder %s1459_s10, %s1455_s9  ;;  %s1471_s13 = sphi %s1497_s13, %s12_s13   ;;  %s1467_s12 = sphi %s1495_s12, %s1841_s12   ;;  %s1463_s11 = sphi %s1493_s11, %s1840_s11   ;;  %s1459_s10 = sphi %s1491_s10, %s1839_s10   ;;  %s1455_s9 = sphi %s1489_s9, %s1838_s9  }
   0x4   : > { %p25_p0 = scmp.ge.s32.totalorder %s24_s14, 2  ;;  %p48_p2 = scmp.eq.s32.totalorder %s1471_s13, 0 }
   0x5   : > { %s40_s16 = sadd.s32 1, %s1459_s10  ;;  %p1106_p5 = scmp.ge.s32.totalorder %s1471_s13, 2 }
   0x6   : > { %s1843_s14 = smov (%p25_p0, %s24_s14), 0  ;;  %p49_p3 = por %p48_p2, %p47_p1 }
   0x7   : > { %s36_s15 = ssub.s32 %s1467_s12, %s1843_s14  ;;  %129 = sbr.rel (%p1106_p5) target bundleno = 34 (0x22), region = 16 }
   0x8   : > { %p38_p4 = scmp.eq.s32.totalorder %s36_s15, 0 }
   0xa   : > { %s1524_s17 = scalar_select %p38_p4, %s1459_s10, %s40_s16  }
   0xe   : > { %132 = sbr.rel (!%p49_p3) target bundleno = 34 (0x22), region = 20  ;;  %s134_s18 = sand.u32 (%p49_p3), 1, %s1459_s10  }
   0xf   : > { %s1183_s19 = sshll.u32 (%p49_p3), %s1467_s12, 4  ;;  %s1107_s20 = sshll.u32 (%p49_p3), %s134_s18, 8 }
  0x10   : > { %s1532_s23 = scalar_lea.vmem (%p49_p3), %s1835_s0, %s1183_s19  ;;  %s1537_s24 = scalar_lea.vmem (%p49_p3), [#allocation2], %s1107_s20 }
  0x11   : > { %v155_v0 = vld [vmem:[%s1532_s23] sm:$0xff] (%p49_p3)  ;;  %v157_v1 = vld [vmem:[%s1532_s23 + $0x8] sm:$0xff] (%p49_p3) }
  0x12   : > { %v159_v2 = vld [vmem:[%s1532_s23 + $0x20] sm:$0xff] (%p49_p3)  ;;  %156 = vst [vmem:[%s1537_s24] sm:$0xff] (%p49_p3), %v155_v0  ;;  %158 = vst [vmem:[%s1537_s24 + $0x8] sm:$0xff] (%p49_p3), %v157_v1  ;;  %v161_v3 = vld [vmem:[%s1532_s23 + $0x28] sm:$0xff] (%p49_p3) }
  0x13   : > { %160 = vst [vmem:[%s1537_s24 + $0x10] sm:$0xff] (%p49_p3), %v159_v2  ;;  %v163_v4 = vld [vmem:[%s1532_s23 + $0x40] sm:$0xff] (%p49_p3)  ;;  %v165_v5 = vld [vmem:[%s1532_s23 + $0x48] sm:$0xff] (%p49_p3)  ;;  %162 = vst [vmem:[%s1537_s24 + $0x18] sm:$0xff] (%p49_p3), %v161_v3 }
  0x14   : > { %164 = vst [vmem:[%s1537_s24 + $0x20] sm:$0xff] (%p49_p3), %v163_v4  ;;  %166 = vst [vmem:[%s1537_s24 + $0x28] sm:$0xff] (%p49_p3), %v165_v5  ;;  %v167_v6 = vld [vmem:[%s1532_s23 + $0x60] sm:$0xff] (%p49_p3)  ;;  %v169_v7 = vld [vmem:[%s1532_s23 + $0x68] sm:$0xff] (%p49_p3) }
  0x15   : > { %v171_v8 = vld [vmem:[%s1532_s23 + $0x80] sm:$0xff]  ;;  %168 = vst [vmem:[%s1537_s24 + $0x30] sm:$0xff] %v167_v6  ;;  %170 = vst [vmem:[%s1537_s24 + $0x38] sm:$0xff] %v169_v7  ;;  %v173_v9 = vld [vmem:[%s1532_s23 + $0x88] sm:$0xff] }
  0x16   : > { %172 = vst [vmem:[%s1537_s24 + $0x40] sm:$0xff] %v171_v8  ;;  %v175_v10 = vld [vmem:[%s1532_s23 + $0xa0] sm:$0xff]  ;;  %v177_v11 = vld [vmem:[%s1532_s23 + $0xa8] sm:$0xff]  ;;  %174 = vst [vmem:[%s1537_s24 + $0x48] sm:$0xff] %v173_v9 }
  0x17   : > { %176 = vst [vmem:[%s1537_s24 + $0x50] sm:$0xff] %v175_v10  ;;  %178 = vst [vmem:[%s1537_s24 + $0x58] sm:$0xff] %v177_v11  ;;  %v179_v12 = vld [vmem:[%s1532_s23 + $0xc0] sm:$0xff]  ;;  %v181_v13 = vld [vmem:[%s1532_s23 + $0xc8] sm:$0xff] }
  0x18   : > { %v183_v14 = vld [vmem:[%s1532_s23 + $0xe0] sm:$0xff]  ;;  %180 = vst [vmem:[%s1537_s24 + $0x60] sm:$0xff] %v179_v12  ;;  %182 = vst [vmem:[%s1537_s24 + $0x68] sm:$0xff] %v181_v13  ;;  %v185_v15 = vld [vmem:[%s1532_s23 + $0xe8] sm:$0xff] }
  0x19   : > { %184 = vst [vmem:[%s1537_s24 + $0x70] sm:$0xff] %v183_v14  ;;  %v187_v16 = vld [vmem:[%s1532_s23 + $0x100] sm:$0xff]  ;;  %v189_v17 = vld [vmem:[%s1532_s23 + $0x108] sm:$0xff]  ;;  %186 = vst [vmem:[%s1537_s24 + $0x78] sm:$0xff] %v185_v15 }
  0x1a   : > { %188 = vst [vmem:[%s1537_s24 + $0x80] sm:$0xff] %v187_v16  ;;  %190 = vst [vmem:[%s1537_s24 + $0x88] sm:$0xff] %v189_v17  ;;  %v191_v18 = vld [vmem:[%s1532_s23 + $0x120] sm:$0xff]  ;;  %v193_v19 = vld [vmem:[%s1532_s23 + $0x128] sm:$0xff] }
  0x1b   : > { %v195_v20 = vld [vmem:[%s1532_s23 + $0x140] sm:$0xff]  ;;  %192 = vst [vmem:[%s1537_s24 + $0x90] sm:$0xff] %v191_v18  ;;  %194 = vst [vmem:[%s1537_s24 + $0x98] sm:$0xff] %v193_v19  ;;  %v197_v21 = vld [vmem:[%s1532_s23 + $0x148] sm:$0xff] }
  0x1c   : > { %196 = vst [vmem:[%s1537_s24 + $0xa0] sm:$0xff] %v195_v20  ;;  %v199_v22 = vld [vmem:[%s1532_s23 + $0x160] sm:$0xff]  ;;  %v201_v23 = vld [vmem:[%s1532_s23 + $0x168] sm:$0xff]  ;;  %198 = vst [vmem:[%s1537_s24 + $0xa8] sm:$0xff] %v197_v21 }
  0x1d   : > { %200 = vst [vmem:[%s1537_s24 + $0xb0] sm:$0xff] %v199_v22  ;;  %202 = vst [vmem:[%s1537_s24 + $0xb8] sm:$0xff] %v201_v23  ;;  %v203_v24 = vld [vmem:[%s1532_s23 + $0x180] sm:$0xff]  ;;  %v205_v25 = vld [vmem:[%s1532_s23 + $0x188] sm:$0xff] }
  0x1e   : > { %v207_v26 = vld [vmem:[%s1532_s23 + $0x1a0] sm:$0xff]  ;;  %204 = vst [vmem:[%s1537_s24 + $0xc0] sm:$0xff] %v203_v24  ;;  %206 = vst [vmem:[%s1537_s24 + $0xc8] sm:$0xff] %v205_v25  ;;  %v209_v27 = vld [vmem:[%s1532_s23 + $0x1a8] sm:$0xff] }
  0x1f   : > { %208 = vst [vmem:[%s1537_s24 + $0xd0] sm:$0xff] %v207_v26  ;;  %v211_v28 = vld [vmem:[%s1532_s23 + $0x1c0] sm:$0xff]  ;;  %v213_v29 = vld [vmem:[%s1532_s23 + $0x1c8] sm:$0xff]  ;;  %210 = vst [vmem:[%s1537_s24 + $0xd8] sm:$0xff] %v209_v27 }
  0x20   : > { %212 = vst [vmem:[%s1537_s24 + $0xe0] sm:$0xff] %v211_v28  ;;  %214 = vst [vmem:[%s1537_s24 + $0xe8] sm:$0xff] %v213_v29  ;;  %v215_v30 = vld [vmem:[%s1532_s23 + $0x1e0] sm:$0xff]  ;;  %v217_v31 = vld [vmem:[%s1532_s23 + $0x1e8] sm:$0xff] }
  0x21   : > { %216 = vst [vmem:[%s1537_s24 + $0xf0] sm:$0xff] %v215_v30  ;;  %218 = vst [vmem:[%s1537_s24 + $0xf8] sm:$0xff] %v217_v31 }
  0x22 PF: > { %p1110_p6 = scmp.ge.s32.totalorder %s1471_s13, 1  ;;  %p235_p7 = scmp.lt.s32.totalorder %s1471_s13, 3 }
  0x24   : > { %p236_p8 = pnand %p1110_p6, %p235_p7 }
  0x25   : > { %s242_s25 = sand.u32 (!%p236_p8), 1, %s1455_s9   ;;  %s1112_s26 = sshll.u32 (!%p236_p8), %s1463_s11, 6 }
  0x26   : > { %239 = sbr.rel (%p236_p8) target bundleno = 368 (0x170), region = 47  ;;  %s1111_s27 = sshll.u32 (!%p236_p8), %s242_s25, 8 }
  0x27   : > { %p277_p9 = scmp.lt.s32.totalorder (!%p236_p8), %s1112_s26, 127  ;;  %s1609_s4 = scalar_lea.vmem (!%p236_p8), [#allocation2], %s1111_s27 }
  0x28   : > { %p1114_p10 = scmp.ne.s32.totalorder (!%p236_p8), %s1463_s11, 0 }
  0x2d   : > { %s1845_s26 = smov (!%p277_p9, %s1112_s26), 127  ;;  %298 = sbr.rel (%p1114_p10) target bundleno = 55 (0x37), region = 55 }
  0x2e   : > { %s1113_s28 = sshll.u32 %s1845_s26, 2  ;;  %v1473_v32 = vmov (!%p1114_p10), 0.0  }
  0x2f   : > { %s1607_s3 = scalar_lea.vmem %s1836_s1, %s1113_s28  ;;  %299 = vst [vmem:[%s1837_s2] sm:$0xff] (!%p1114_p10), %v1473_v32  ;;  %300 = vst [vmem:[%s1837_s2 + $0x8] sm:$0xff] (!%p1114_p10), %v1473_v32 }
  0x30   : > { %301 = vst [vmem:[%s1837_s2 + $0x10] sm:$0xff] (!%p1114_p10), %v1473_v32  ;;  %302 = vst [vmem:[%s1837_s2 + $0x18] sm:$0xff] (!%p1114_p10), %v1473_v32 }
  0x31   : > { %303 = vst [vmem:[%s1837_s2 + $0x20] sm:$0xff] (!%p1114_p10), %v1473_v32  ;;  %304 = vst [vmem:[%s1837_s2 + $0x28] sm:$0xff] (!%p1114_p10), %v1473_v32 }
  0x32   : > { %305 = vst [vmem:[%s1837_s2 + $0x30] sm:$0xff] (!%p1114_p10), %v1473_v32  ;;  %306 = vst [vmem:[%s1837_s2 + $0x38] sm:$0xff] (!%p1114_p10), %v1473_v32 }
  0x33   : > { %307 = vst [vmem:[%s1837_s2 + $0x40] sm:$0xff] (!%p1114_p10), %v1473_v32  ;;  %308 = vst [vmem:[%s1837_s2 + $0x48] sm:$0xff] (!%p1114_p10), %v1473_v32 }
  0x34   : > { %309 = vst [vmem:[%s1837_s2 + $0x50] sm:$0xff] %v1473_v32  ;;  %310 = vst [vmem:[%s1837_s2 + $0x58] sm:$0xff] %v1473_v32 }
  0x35   : > { %311 = vst [vmem:[%s1837_s2 + $0x60] sm:$0xff] %v1473_v32  ;;  %312 = vst [vmem:[%s1837_s2 + $0x68] sm:$0xff] %v1473_v32 }
  0x36   : > { %313 = vst [vmem:[%s1837_s2 + $0x70] sm:$0xff] %v1473_v32  ;;  %314 = vst [vmem:[%s1837_s2 + $0x78] sm:$0xff] %v1473_v32 }
  0x37 PF: > { %v1353_v33 = vld [vmem:[%s1607_s3 + $0x40] sm:$0xff]   ;;  %v1357_v37 = vld [vmem:[%s1607_s3 + $0x48] sm:$0xff]   ;;  %v1361_v41 = vld [vmem:[%s1607_s3 + $0x50] sm:$0xff]  }
  0x38   : > { %v1354_v34 = vld [vmem:[%s1607_s3 + $0xc0] sm:$0xff]   ;;  %1184 = vmatprep.subr.bf16.mxu0 %v1353_v33  ;;  %v1358_v38 = vld [vmem:[%s1607_s3 + $0xc8] sm:$0xff]   ;;  %v1362_v42 = vld [vmem:[%s1607_s3 + $0xd0] sm:$0xff]  }
  0x39   : > { %v1355_v35 = vld [vmem:[%s1607_s3] sm:$0xff]   ;;  %1248 = vmatprep.subr.bf16.mxu1 %v1354_v34  ;;  %v1359_v39 = vld [vmem:[%s1607_s3 + $0x8] sm:$0xff]   ;;  %v1363_v43 = vld [vmem:[%s1607_s3 + $0x10] sm:$0xff]  }
  0x3a   : > { %v1356_v36 = vld [vmem:[%s1607_s3 + $0x80] sm:$0xff]   ;;  %1185 = vmatpush3.bf16.msra.mxu0 %v1355_v35  ;;  %v1360_v40 = vld [vmem:[%s1607_s3 + $0x88] sm:$0xff]   ;;  %v1364_v44 = vld [vmem:[%s1607_s3 + $0x90] sm:$0xff]  }
  0x3b   : > { %1249 = vmatpush3.bf16.msra.mxu1 %v1356_v36  ;;  %1186 = vmatprep.subr.bf16.mxu0 %v1357_v37  ;;  %v1365_v45 = vld [vmem:[%s1607_s3 + $0x58] sm:$0xff]   ;;  %v1369_v49 = vld [vmem:[%s1607_s3 + $0x60] sm:$0xff]   ;;  %v1373_v53 = vld [vmem:[%s1607_s3 + $0x68] sm:$0xff]  }
  0x3c   : > { %1250 = vmatprep.subr.bf16.mxu1 %v1358_v38  ;;  %v1366_v46 = vld [vmem:[%s1607_s3 + $0xd8] sm:$0xff]   ;;  %v1370_v50 = vld [vmem:[%s1607_s3 + $0xe0] sm:$0xff]   ;;  %v1374_v54 = vld [vmem:[%s1607_s3 + $0xe8] sm:$0xff]  }
  0x3d   : > { %v1367_v47 = vld [vmem:[%s1607_s3 + $0x18] sm:$0xff]   ;;  %v1371_v51 = vld [vmem:[%s1607_s3 + $0x20] sm:$0xff]   ;;  %v1375_v55 = vld [vmem:[%s1607_s3 + $0x28] sm:$0xff]  }
  0x3e   : > { %1187 = vmatpush3.bf16.msra.mxu0 %v1359_v39  ;;  %v1368_v48 = vld [vmem:[%s1607_s3 + $0x98] sm:$0xff]   ;;  %v1372_v52 = vld [vmem:[%s1607_s3 + $0xa0] sm:$0xff]   ;;  %v1376_v56 = vld [vmem:[%s1607_s3 + $0xa8] sm:$0xff]  }
  0x3f   : > { %1251 = vmatpush3.bf16.msra.mxu1 %v1360_v40  ;;  %1188 = vmatprep.subr.bf16.mxu0 %v1361_v41  ;;  %v1377_v57 = vld [vmem:[%s1607_s3 + $0x70] sm:$0xff]   ;;  %v1381_v61 = vld [vmem:[%s1607_s3 + $0x78] sm:$0xff]  }
  0x40   : > { %1252 = vmatprep.subr.bf16.mxu1 %v1362_v42  ;;  %v1378_v58 = vld [vmem:[%s1607_s3 + $0xf0] sm:$0xff]   ;;  %v1382_v62 = vld [vmem:[%s1607_s3 + $0xf8] sm:$0xff]   ;;  %v315_v42 = vld [vmem:[%s1837_s2] sm:$0xff] }
  0x41   : > { %v1379_v59 = vld [vmem:[%s1607_s3 + $0x30] sm:$0xff]   ;;  %v1383_v63 = vld [vmem:[%s1607_s3 + $0x38] sm:$0xff]  }
  0x42   : > { %1189 = vmatpush3.bf16.msra.mxu0 %v1363_v43  ;;  %v1380_v60 = vld [vmem:[%s1607_s3 + $0xb0] sm:$0xff]   ;;  %v1384_v0 = vld [vmem:[%s1607_s3 + $0xb8] sm:$0xff]  }
  0x43   : > { %1253 = vmatpush3.bf16.msra.mxu1 %v1364_v44  ;;  %1190 = vmatprep.subr.bf16.mxu0 %v1365_v45  ;;  %v1385_v1 = vld [vmem:[%s1609_s4] ss:$16 sps:$4 sm:$0xff]   ;;  %v1387_v2 = vld [vmem:[%s1609_s4 + $0x4] ss:$16 sps:$4 sm:$0xff]   ;;  %v1388_v3 = vld [vmem:[%s1609_s4 + $0x8] ss:$16 sps:$4 sm:$0xff]  }
  0x44   : > { %1254 = vmatprep.subr.bf16.mxu1 %v1366_v46  ;;  %v1390_v4 = vld [vmem:[%s1609_s4 + $0xc] ss:$16 sps:$4 sm:$0xff]   ;;  %811 = vmatprep.mubr.bf16.mxu0 %v1387_v2  ;;  %v1391_v5 = vld [vmem:[%s1609_s4 + $0x24] ss:$16 sps:$4 sm:$0xff]   ;;  %v1395_v7 = vld [vmem:[%s1609_s4 + $0x20] ss:$16 sps:$4 sm:$0xff]  }
  0x45   : > { %908 = vmatprep.mubr.bf16.mxu1 %v1390_v4  ;;  %v1393_v6 = vld [vmem:[%s1609_s4 + $0x2c] ss:$16 sps:$4 sm:$0xff]   ;;  %v1396_v8 = vld [vmem:[%s1609_s4 + $0x28] ss:$16 sps:$4 sm:$0xff]   ;;  %v1397_v9 = vld [vmem:[%s1609_s4 + $0x44] ss:$16 sps:$4 sm:$0xff]  }
  0x46   : > { %1191 = vmatpush3.bf16.msra.mxu0 %v1367_v47  ;;  %v1399_v10 = vld [vmem:[%s1609_s4 + $0x4c] ss:$16 sps:$4 sm:$0xff]   ;;  %v1401_v11 = vld [vmem:[%s1609_s4 + $0x40] ss:$16 sps:$4 sm:$0xff]   ;;  %v1402_v12 = vld [vmem:[%s1609_s4 + $0x48] ss:$16 sps:$4 sm:$0xff]  }
  0x47   : > { %1255 = vmatpush3.bf16.msra.mxu1 %v1368_v48  ;;  %1192 = vmatprep.subr.bf16.mxu0 %v1369_v49  ;;  %v1403_v13 = vld [vmem:[%s1609_s4 + $0x64] ss:$16 sps:$4 sm:$0xff]   ;;  %v1405_v14 = vld [vmem:[%s1609_s4 + $0x6c] ss:$16 sps:$4 sm:$0xff]   ;;  %v1407_v15 = vld [vmem:[%s1609_s4 + $0x60] ss:$16 sps:$4 sm:$0xff]  }
  0x48   : > { %1256 = vmatprep.subr.bf16.mxu1 %v1370_v50  ;;  %v1408_v16 = vld [vmem:[%s1609_s4 + $0x68] ss:$16 sps:$4 sm:$0xff]   ;;  %v1409_v17 = vld [vmem:[%s1609_s4 + $0x84] ss:$16 sps:$4 sm:$0xff]   ;;  %v1411_v18 = vld [vmem:[%s1609_s4 + $0x8c] ss:$16 sps:$4 sm:$0xff]  }
  0x49   : > { %v1413_v19 = vld [vmem:[%s1609_s4 + $0x80] ss:$16 sps:$4 sm:$0xff]   ;;  %v1414_v20 = vld [vmem:[%s1609_s4 + $0x88] ss:$16 sps:$4 sm:$0xff]   ;;  %v1415_v21 = vld [vmem:[%s1609_s4 + $0xa4] ss:$16 sps:$4 sm:$0xff]  }
  0x4a   : > { %1193 = vmatpush3.bf16.msra.mxu0 %v1371_v51  ;;  %v1417_v22 = vld [vmem:[%s1609_s4 + $0xac] ss:$16 sps:$4 sm:$0xff]   ;;  %v1419_v23 = vld [vmem:[%s1609_s4 + $0xa0] ss:$16 sps:$4 sm:$0xff]   ;;  %v1420_v24 = vld [vmem:[%s1609_s4 + $0xa8] ss:$16 sps:$4 sm:$0xff]  }
  0x4b   : > { %1257 = vmatpush3.bf16.msra.mxu1 %v1372_v52  ;;  %1194 = vmatprep.subr.bf16.mxu0 %v1373_v53  ;;  %v1421_v25 = vld [vmem:[%s1609_s4 + $0xc4] ss:$16 sps:$4 sm:$0xff]   ;;  %v1423_v26 = vld [vmem:[%s1609_s4 + $0xcc] ss:$16 sps:$4 sm:$0xff]   ;;  %v1425_v27 = vld [vmem:[%s1609_s4 + $0xc0] ss:$16 sps:$4 sm:$0xff]  }
  0x4c   : > { %1258 = vmatprep.subr.bf16.mxu1 %v1374_v54  ;;  %v1426_v28 = vld [vmem:[%s1609_s4 + $0xc8] ss:$16 sps:$4 sm:$0xff]   ;;  %v1427_v29 = vld [vmem:[%s1609_s4 + $0xe4] ss:$16 sps:$4 sm:$0xff]   ;;  %v1429_v30 = vld [vmem:[%s1609_s4 + $0xec] ss:$16 sps:$4 sm:$0xff]  }
  0x4d   : > { %v1431_v31 = vld [vmem:[%s1609_s4 + $0xe0] ss:$16 sps:$4 sm:$0xff]   ;;  %v1432_v32 = vld [vmem:[%s1609_s4 + $0xe8] ss:$16 sps:$4 sm:$0xff]  }
  0x4e   : > { %1195 = vmatpush3.bf16.msra.mxu0 %v1375_v55  ;;  %v316_v47 = vld [vmem:[%s1837_s2 + $0x8] sm:$0xff] }
  0x4f   : > { %1259 = vmatpush3.bf16.msra.mxu1 %v1376_v56  ;;  %1196 = vmatprep.subr.bf16.mxu0 %v1377_v57 }
  0x50   : > { %1260 = vmatprep.subr.bf16.mxu1 %v1378_v58 }
  0x52   : > { %1197 = vmatpush3.bf16.msra.mxu0 %v1379_v59 }
  0x53   : > { %1261 = vmatpush3.bf16.msra.mxu1 %v1380_v60  ;;  %1198 = vmatprep.subr.bf16.mxu0 %v1381_v61  ;;  %v317_v60 = vld [vmem:[%s1837_s2 + $0x10] sm:$0xff] }
  0x54   : > { %1262 = vmatprep.subr.bf16.mxu1 %v1382_v62 }
  0x56   : > { %1199 = vmatpush3.bf16.msra.mxu0 %v1383_v63 }
  0x57   : > { %1263 = vmatpush3.bf16.msra.mxu1 %v1384_v0 }
  0x59   : > { %812 = vmatmul.mubr.bf16.vlgmr.msra.gmra.mrb[0].mxu0 %v1385_v1  ;;  %v318_v1 = vld [vmem:[%s1837_s2 + $0x18] sm:$0xff] }
  0x5a   : > { %909 = vmatmul.mubr.bf16.vlgmr.msra.gmra.mrb[0].mxu1 %v1388_v3  ;;  %819 = vmatprep.mubr.bf16.mxu0 %v1391_v5 }
  0x5b   : > { %916 = vmatprep.mubr.bf16.mxu1 %v1393_v6 }
  0x61   : > { %820 = vmatmul.mubr.bf16.gmra.mrb[4].mxu0 %v1395_v7 }
  0x62   : > { %917 = vmatmul.mubr.bf16.gmra.mrb[4].mxu1 %v1396_v8  ;;  %827 = vmatprep.mubr.bf16.mxu0 %v1397_v9 }
  0x63   : > { %924 = vmatprep.mubr.bf16.mxu1 %v1399_v10 }
  0x69   : > { %828 = vmatmul.mubr.bf16.gmra.mrb[8].mxu0 %v1401_v11 }
  0x6a   : > { %925 = vmatmul.mubr.bf16.gmra.mrb[8].mxu1 %v1402_v12  ;;  %835 = vmatprep.mubr.bf16.mxu0 %v1403_v13 }
  0x6b   : > { %932 = vmatprep.mubr.bf16.mxu1 %v1405_v14  ;;  %v319_v14 = vld [vmem:[%s1837_s2 + $0x20] sm:$0xff] }
  0x71   : > { %836 = vmatmul.mubr.bf16.gmra.mrb[12].mxu0 %v1407_v15 }
  0x72   : > { %933 = vmatmul.mubr.bf16.gmra.mrb[12].mxu1 %v1408_v16  ;;  %843 = vmatprep.mubr.bf16.mxu0 %v1409_v17 }
  0x73   : > { %940 = vmatprep.mubr.bf16.mxu1 %v1411_v18 }
  0x79   : > { %844 = vmatmul.mubr.bf16.gmra.mrb[16].mxu0 %v1413_v19  ;;  %v320_v19 = vld [vmem:[%s1837_s2 + $0x28] sm:$0xff] }
  0x7a   : > { %941 = vmatmul.mubr.bf16.gmra.mrb[16].mxu1 %v1414_v20  ;;  %851 = vmatprep.mubr.bf16.mxu0 %v1415_v21 }
  0x7b   : > { %948 = vmatprep.mubr.bf16.mxu1 %v1417_v22 }
  0x81   : > { %852 = vmatmul.mubr.bf16.gmra.mrb[20].mxu0 %v1419_v23 }
  0x82   : > { %949 = vmatmul.mubr.bf16.gmra.mrb[20].mxu1 %v1420_v24  ;;  %859 = vmatprep.mubr.bf16.mxu0 %v1421_v25 }
  0x83   : > { %956 = vmatprep.mubr.bf16.mxu1 %v1423_v26 }
  0x89   : > { %860 = vmatmul.mubr.bf16.gmra.mrb[24].mxu0 %v1425_v27 }
  0x8a   : > { %957 = vmatmul.mubr.bf16.gmra.mrb[24].mxu1 %v1426_v28  ;;  %867 = vmatprep.mubr.bf16.mxu0 %v1427_v29 }
  0x8b   : > { %964 = vmatprep.mubr.bf16.mxu1 %v1429_v30 }
  0x91   : > { %868 = vmatmul.mubr.bf16.gmra.mrb[28].mxu0 %v1431_v31 }
  0x92   : > { %965 = vmatmul.mubr.bf16.gmra.mrb[28].mxu1 %v1432_v32  ;;  %v321_v32 = vld [vmem:[%s1837_s2 + $0x30] sm:$0xff] }
 0x12c   : > { %v1200_v33 = vpop.f32.mrb[0].mxu0 }
 0x12d   : > { %v1264_v34 = vpop.f32.mrb[0].mxu1  ;;  %v1201_v35 = vpop.f32.mrb[1].mxu0 }
 0x12e   : > { %v1202_v36 = vadd.f32 %v1201_v35, %v1200_v33  ;;  %v1265_v37 = vpop.f32.mrb[1].mxu1  ;;  %v1203_v38 = vpop.f32.mrb[2].mxu0 }
 0x12f   : > { %v1266_v39 = vadd.f32 %v1265_v37, %v1264_v34  ;;  %v1267_v40 = vpop.f32.mrb[2].mxu1  ;;  %v1204_v41 = vpop.f32.mrb[3].mxu0  ;;  %v322_v37 = vld [vmem:[%s1837_s2 + $0x38] sm:$0xff] }
 0x130   : > { %v1205_v43 = vadd.f32 %v1204_v41, %v1203_v38  ;;  %v1268_v44 = vpop.f32.mrb[3].mxu1 }
 0x131   : > { %v911_v45 = vadd.f32 %v1266_v39, %v1202_v36  ;;  %v1269_v46 = vadd.f32 %v1268_v44, %v1267_v40 }
 0x133   : > { %v973_v48 = vadd.f32 %v911_v45, %v315_v42  ;;  %v914_v49 = vadd.f32 %v1269_v46, %v1205_v43 }
 0x134   : > { %v1206_v50 = vpop.f32.mrb[4].mxu0 }
 0x135   : > { %989 = vst [vmem:[%s1837_s2] sm:$0xff] %v973_v48  ;;  %v974_v51 = vadd.f32 %v914_v49, %v316_v47  ;;  %v1270_v52 = vpop.f32.mrb[4].mxu1  ;;  %v1207_v53 = vpop.f32.mrb[5].mxu0 }
 0x136   : > { %v1208_v54 = vadd.f32 %v1207_v53, %v1206_v50  ;;  %v1271_v55 = vpop.f32.mrb[5].mxu1  ;;  %v1209_v56 = vpop.f32.mrb[6].mxu0  ;;  %v323_v50 = vld [vmem:[%s1837_s2 + $0x40] sm:$0xff] }
 0x137   : > { %990 = vst [vmem:[%s1837_s2 + $0x8] sm:$0xff] %v974_v51  ;;  %v1272_v57 = vadd.f32 %v1271_v55, %v1270_v52  ;;  %v1273_v58 = vpop.f32.mrb[6].mxu1  ;;  %v1210_v59 = vpop.f32.mrb[7].mxu0  ;;  %v324_v55 = vld [vmem:[%s1837_s2 + $0x48] sm:$0xff] }
 0x138   : > { %v1211_v61 = vadd.f32 %v1210_v59, %v1209_v56  ;;  %v1274_v62 = vpop.f32.mrb[7].mxu1 }
 0x139   : > { %v919_v63 = vadd.f32 %v1272_v57, %v1208_v54  ;;  %v1275_v0 = vadd.f32 %v1274_v62, %v1273_v58 }
 0x13b   : > { %v975_v2 = vadd.f32 %v919_v63, %v317_v60  ;;  %v922_v3 = vadd.f32 %v1275_v0, %v1211_v61 }
 0x13c   : > { %v1212_v4 = vpop.f32.mrb[8].mxu0 }
 0x13d   : > { %991 = vst [vmem:[%s1837_s2 + $0x10] sm:$0xff] %v975_v2  ;;  %v976_v5 = vadd.f32 %v922_v3, %v318_v1  ;;  %v1276_v6 = vpop.f32.mrb[8].mxu1  ;;  %v1213_v7 = vpop.f32.mrb[9].mxu0 }
 0x13e   : > { %v1214_v8 = vadd.f32 %v1213_v7, %v1212_v4  ;;  %v1277_v9 = vpop.f32.mrb[9].mxu1  ;;  %v1215_v10 = vpop.f32.mrb[10].mxu0  ;;  %v325_v4 = vld [vmem:[%s1837_s2 + $0x50] sm:$0xff] }
 0x13f   : > { %992 = vst [vmem:[%s1837_s2 + $0x18] sm:$0xff] %v976_v5  ;;  %v1278_v11 = vadd.f32 %v1277_v9, %v1276_v6  ;;  %v1279_v12 = vpop.f32.mrb[10].mxu1  ;;  %v1216_v13 = vpop.f32.mrb[11].mxu0  ;;  %v326_v9 = vld [vmem:[%s1837_s2 + $0x58] sm:$0xff] }
 0x140   : > { %v1217_v15 = vadd.f32 %v1216_v13, %v1215_v10  ;;  %v1280_v16 = vpop.f32.mrb[11].mxu1 }
 0x141   : > { %v927_v17 = vadd.f32 %v1278_v11, %v1214_v8  ;;  %v1281_v18 = vadd.f32 %v1280_v16, %v1279_v12 }
 0x143   : > { %v977_v20 = vadd.f32 %v927_v17, %v319_v14  ;;  %v930_v21 = vadd.f32 %v1281_v18, %v1217_v15 }
 0x144   : > { %v1218_v22 = vpop.f32.mrb[12].mxu0 }
 0x145   : > { %993 = vst [vmem:[%s1837_s2 + $0x20] sm:$0xff] %v977_v20  ;;  %v978_v23 = vadd.f32 %v930_v21, %v320_v19  ;;  %v1282_v24 = vpop.f32.mrb[12].mxu1  ;;  %v1219_v25 = vpop.f32.mrb[13].mxu0 }
 0x146   : > { %v1220_v26 = vadd.f32 %v1219_v25, %v1218_v22  ;;  %v1283_v27 = vpop.f32.mrb[13].mxu1  ;;  %v1221_v28 = vpop.f32.mrb[14].mxu0  ;;  %v327_v22 = vld [vmem:[%s1837_s2 + $0x60] sm:$0xff] }
 0x147   : > { %994 = vst [vmem:[%s1837_s2 + $0x28] sm:$0xff] %v978_v23  ;;  %v1284_v29 = vadd.f32 %v1283_v27, %v1282_v24  ;;  %v1285_v30 = vpop.f32.mrb[14].mxu1  ;;  %v1222_v31 = vpop.f32.mrb[15].mxu0  ;;  %v328_v27 = vld [vmem:[%s1837_s2 + $0x68] sm:$0xff] }
 0x148   : > { %v1223_v33 = vadd.f32 %v1222_v31, %v1221_v28  ;;  %v1286_v34 = vpop.f32.mrb[15].mxu1 }
 0x149   : > { %v935_v35 = vadd.f32 %v1284_v29, %v1220_v26  ;;  %v1287_v36 = vadd.f32 %v1286_v34, %v1285_v30 }
 0x14b   : > { %v979_v38 = vadd.f32 %v935_v35, %v321_v32  ;;  %v938_v39 = vadd.f32 %v1287_v36, %v1223_v33 }
 0x14c   : > { %v1224_v40 = vpop.f32.mrb[16].mxu0 }
 0x14d   : > { %995 = vst [vmem:[%s1837_s2 + $0x30] sm:$0xff] %v979_v38  ;;  %v980_v41 = vadd.f32 %v938_v39, %v322_v37  ;;  %v1288_v42 = vpop.f32.mrb[16].mxu1  ;;  %v1225_v43 = vpop.f32.mrb[17].mxu0 }
 0x14e   : > { %v1226_v44 = vadd.f32 %v1225_v43, %v1224_v40  ;;  %v1289_v45 = vpop.f32.mrb[17].mxu1  ;;  %v1227_v46 = vpop.f32.mrb[18].mxu0  ;;  %v329_v40 = vld [vmem:[%s1837_s2 + $0x70] sm:$0xff] }
 0x14f   : > { %996 = vst [vmem:[%s1837_s2 + $0x38] sm:$0xff] %v980_v41  ;;  %v1290_v47 = vadd.f32 %v1289_v45, %v1288_v42  ;;  %v1291_v48 = vpop.f32.mrb[18].mxu1  ;;  %v1228_v49 = vpop.f32.mrb[19].mxu0  ;;  %v330_v45 = vld [vmem:[%s1837_s2 + $0x78] sm:$0xff] }
 0x150   : > { %v1229_v51 = vadd.f32 %v1228_v49, %v1227_v46  ;;  %v1292_v52 = vpop.f32.mrb[19].mxu1 }
 0x151   : > { %v943_v53 = vadd.f32 %v1290_v47, %v1226_v44  ;;  %v1293_v54 = vadd.f32 %v1292_v52, %v1291_v48 }
 0x153   : > { %v981_v56 = vadd.f32 %v943_v53, %v323_v50  ;;  %v946_v57 = vadd.f32 %v1293_v54, %v1229_v51 }
 0x154   : > { %v1230_v58 = vpop.f32.mrb[20].mxu0 }
 0x155   : > { %997 = vst [vmem:[%s1837_s2 + $0x40] sm:$0xff] %v981_v56  ;;  %v982_v59 = vadd.f32 %v946_v57, %v324_v55  ;;  %v1294_v60 = vpop.f32.mrb[20].mxu1  ;;  %v1231_v61 = vpop.f32.mrb[21].mxu0 }
 0x156   : > { %v1232_v62 = vadd.f32 %v1231_v61, %v1230_v58  ;;  %v1295_v63 = vpop.f32.mrb[21].mxu1  ;;  %v1233_v0 = vpop.f32.mrb[22].mxu0 }
 0x157   : > { %998 = vst [vmem:[%s1837_s2 + $0x48] sm:$0xff] %v982_v59  ;;  %v1296_v1 = vadd.f32 %v1295_v63, %v1294_v60  ;;  %v1297_v2 = vpop.f32.mrb[22].mxu1  ;;  %v1234_v3 = vpop.f32.mrb[23].mxu0 }
 0x158   : > { %v1235_v5 = vadd.f32 %v1234_v3, %v1233_v0  ;;  %v1298_v6 = vpop.f32.mrb[23].mxu1 }
 0x159   : > { %v951_v7 = vadd.f32 %v1296_v1, %v1232_v62  ;;  %v1299_v8 = vadd.f32 %v1298_v6, %v1297_v2 }
 0x15b   : > { %v983_v10 = vadd.f32 %v951_v7, %v325_v4  ;;  %v954_v11 = vadd.f32 %v1299_v8, %v1235_v5 }
 0x15c   : > { %v1236_v12 = vpop.f32.mrb[24].mxu0 }
 0x15d   : > { %999 = vst [vmem:[%s1837_s2 + $0x50] sm:$0xff] %v983_v10  ;;  %v984_v13 = vadd.f32 %v954_v11, %v326_v9  ;;  %v1300_v14 = vpop.f32.mrb[24].mxu1  ;;  %v1237_v15 = vpop.f32.mrb[25].mxu0 }
 0x15e   : > { %v1238_v16 = vadd.f32 %v1237_v15, %v1236_v12  ;;  %v1301_v17 = vpop.f32.mrb[25].mxu1  ;;  %v1239_v18 = vpop.f32.mrb[26].mxu0 }
 0x15f   : > { %1000 = vst [vmem:[%s1837_s2 + $0x58] sm:$0xff] %v984_v13  ;;  %v1302_v19 = vadd.f32 %v1301_v17, %v1300_v14  ;;  %v1303_v20 = vpop.f32.mrb[26].mxu1  ;;  %v1240_v21 = vpop.f32.mrb[27].mxu0 }
 0x160   : > { %v1241_v23 = vadd.f32 %v1240_v21, %v1239_v18  ;;  %v1304_v24 = vpop.f32.mrb[27].mxu1 }
 0x161   : > { %v959_v25 = vadd.f32 %v1302_v19, %v1238_v16  ;;  %v1305_v26 = vadd.f32 %v1304_v24, %v1303_v20 }
 0x163   : > { %v985_v28 = vadd.f32 %v959_v25, %v327_v22  ;;  %v962_v29 = vadd.f32 %v1305_v26, %v1241_v23 }
 0x164   : > { %v1242_v30 = vpop.f32.mrb[28].mxu0 }
 0x165   : > { %1001 = vst [vmem:[%s1837_s2 + $0x60] sm:$0xff] %v985_v28  ;;  %v986_v31 = vadd.f32 %v962_v29, %v328_v27  ;;  %v1306_v32 = vpop.f32.mrb[28].mxu1  ;;  %v1243_v33 = vpop.f32.mrb[29].mxu0 }
 0x166   : > { %v1244_v34 = vadd.f32 %v1243_v33, %v1242_v30  ;;  %v1307_v35 = vpop.f32.mrb[29].mxu1  ;;  %v1245_v36 = vpop.f32.mrb[30].mxu0 }
 0x167   : > { %1002 = vst [vmem:[%s1837_s2 + $0x68] sm:$0xff] %v986_v31  ;;  %v1308_v37 = vadd.f32 %v1307_v35, %v1306_v32  ;;  %v1309_v38 = vpop.f32.mrb[30].mxu1  ;;  %v1246_v39 = vpop.f32.mrb[31].mxu0 }
 0x168   : > { %v1247_v41 = vadd.f32 %v1246_v39, %v1245_v36  ;;  %v1310_v42 = vpop.f32.mrb[31].mxu1 }
 0x169   : > { %v967_v43 = vadd.f32 %v1308_v37, %v1244_v34  ;;  %v1311_v44 = vadd.f32 %v1310_v42, %v1309_v38 }
 0x16b   : > { %v987_v46 = vadd.f32 %v967_v43, %v329_v40  ;;  %v970_v47 = vadd.f32 %v1311_v44, %v1247_v41 }
 0x16d   : > { %1003 = vst [vmem:[%s1837_s2 + $0x70] sm:$0xff] %v987_v46  ;;  %v988_v48 = vadd.f32 %v970_v47, %v330_v45 }
 0x16f   : > { %1004 = vst [vmem:[%s1837_s2 + $0x78] sm:$0xff] %v988_v48 }
 0x170 PF: > { %s12_s13 = sadd.s32 1, %s1471_s13   ;;  %s1838_s9 = smov %s1459_s10 }
 0x171   : > { %p9_p11 = scmp.ge.s32.totalorder %s12_s13, 4   ;;  %s1839_s10 = smov %s1524_s17 }
 0x172   : > { %s1840_s11 = smov %s1467_s12  ;;  %s1841_s12 = smov %s1843_s14 }
 0x173   :  { %11 = sbr.rel (!%p9_p11) target bundleno = 3 (0x3), region = 93 }

// kernel: discriminator70.12
= control target key start
LH: loop header
LB: loop body
LE: loop exit
PB: predicated region body
PF: predicated region fallthrough
CT: control target
= control target key end

     0   :  { %v105_v0 = vmov 0.0   ;;  %s187_s1 = inlined_call_operand.vmem [shape: f32[1,128], index: 1, kind: output, shape index: {0}]   ;;  %s188_s2 = inlined_call_operand.vmem [shape: f32[1,128], index: 2, kind: output, shape index: {1}]   ;;  %s189_s0 = inlined_call_operand.vmem [shape: f32[128,128], index: 0, kind: input, shape index: {}]  }
   0x1   :  { %14 = vst [vmem:[%s187_s1] sm:$0x1] %v105_v0  ;;  %15 = vst [vmem:[%s188_s2] sm:$0x1] %v105_v0  ;;  %v16_v1 = vld [vmem:[%s189_s0] sm:$0xff]  ;;  %v17_v2 = vld [vmem:[%s189_s0 + $0x8] sm:$0xff] }
   0x2   :  { %v18_v3 = vld [vmem:[%s189_s0 + $0x10] sm:$0xff]  ;;  %v19_v4 = vld [vmem:[%s189_s0 + $0x18] sm:$0xff]  ;;  %v33_v5 = vadd.f32 %v17_v2, %v16_v1  ;;  %v57_v6 = vmul.f32 %v16_v1, %v16_v1  ;;  %v58_v7 = vmul.f32 %v17_v2, %v17_v2  ;;  %v20_v9 = vld [vmem:[%s189_s0 + $0x20] sm:$0xff] }
   0x3   :  { %v59_v8 = vmul.f32 %v18_v3, %v18_v3  ;;  %v60_v11 = vmul.f32 %v19_v4, %v19_v4  ;;  %v21_v13 = vld [vmem:[%s189_s0 + $0x28] sm:$0xff]  ;;  %v61_v15 = vmul.f32 %v20_v9, %v20_v9  ;;  %v22_v17 = vld [vmem:[%s189_s0 + $0x30] sm:$0xff]  ;;  %v23_v21 = vld [vmem:[%s189_s0 + $0x38] sm:$0xff] }
   0x4   :  { %v34_v10 = vadd.f32 %v33_v5, %v18_v3  ;;  %v73_v12 = vadd.f32 %v58_v7, %v57_v6  ;;  %v62_v19 = vmul.f32 %v21_v13, %v21_v13  ;;  %v63_v23 = vmul.f32 %v22_v17, %v22_v17  ;;  %v24_v25 = vld [vmem:[%s189_s0 + $0x40] sm:$0xff]  ;;  %v25_v29 = vld [vmem:[%s189_s0 + $0x48] sm:$0xff]  ;;  %v26_v33 = vld [vmem:[%s189_s0 + $0x50] sm:$0xff] }
   0x5   :  { %v64_v27 = vmul.f32 %v23_v21, %v23_v21  ;;  %v65_v31 = vmul.f32 %v24_v25, %v24_v25  ;;  %v66_v35 = vmul.f32 %v25_v29, %v25_v29  ;;  %v27_v37 = vld [vmem:[%s189_s0 + $0x58] sm:$0xff]  ;;  %v67_v39 = vmul.f32 %v26_v33, %v26_v33  ;;  %v28_v41 = vld [vmem:[%s189_s0 + $0x60] sm:$0xff]  ;;  %v29_v45 = vld [vmem:[%s189_s0 + $0x68] sm:$0xff] }
   0x6   :  { %v35_v14 = vadd.f32 %v34_v10, %v19_v4  ;;  %v74_v16 = vadd.f32 %v73_v12, %v59_v8  ;;  %v68_v43 = vmul.f32 %v27_v37, %v27_v37  ;;  %v69_v47 = vmul.f32 %v28_v41, %v28_v41  ;;  %v30_v49 = vld [vmem:[%s189_s0 + $0x70] sm:$0xff]  ;;  %v31_v53 = vld [vmem:[%s189_s0 + $0x78] sm:$0xff] }
   0x7   :  { %v70_v51 = vmul.f32 %v29_v45, %v29_v45  ;;  %v71_v55 = vmul.f32 %v30_v49, %v30_v49  ;;  %v72_v58 = vmul.f32 %v31_v53, %v31_v53 }
   0x8   :  { %v36_v18 = vadd.f32 %v35_v14, %v20_v9  ;;  %v75_v20 = vadd.f32 %v74_v16, %v60_v11  ;;  %v32_v7 = vld [vmem:[%s187_s1] sm:$0x1] }
   0x9   :  { %v56_v12 = vld [vmem:[%s188_s2] sm:$0x1] }
   0xa   :  { %v37_v22 = vadd.f32 %v36_v18, %v21_v13  ;;  %v76_v24 = vadd.f32 %v75_v20, %v61_v15 }
   0xc   :  { %v38_v26 = vadd.f32 %v37_v22, %v22_v17  ;;  %v77_v28 = vadd.f32 %v76_v24, %v62_v19 }
   0xe   :  { %v39_v30 = vadd.f32 %v38_v26, %v23_v21  ;;  %v78_v32 = vadd.f32 %v77_v28, %v63_v23 }
  0x10   :  { %v40_v34 = vadd.f32 %v39_v30, %v24_v25  ;;  %v79_v36 = vadd.f32 %v78_v32, %v64_v27 }
  0x12   :  { %v41_v38 = vadd.f32 %v40_v34, %v25_v29  ;;  %v80_v40 = vadd.f32 %v79_v36, %v65_v31 }
  0x14   :  { %v42_v42 = vadd.f32 %v41_v38, %v26_v33  ;;  %v81_v44 = vadd.f32 %v80_v40, %v66_v35 }
  0x16   :  { %v43_v46 = vadd.f32 %v42_v42, %v27_v37  ;;  %v82_v48 = vadd.f32 %v81_v44, %v67_v39 }
  0x18   :  { %v44_v50 = vadd.f32 %v43_v46, %v28_v41  ;;  %v83_v52 = vadd.f32 %v82_v48, %v68_v43 }
  0x1a   :  { %v45_v54 = vadd.f32 %v44_v50, %v29_v45  ;;  %v84_v56 = vadd.f32 %v83_v52, %v69_v47 }
  0x1c   :  { %v46_v57 = vadd.f32 %v45_v54, %v30_v49  ;;  %v85_v59 = vadd.f32 %v84_v56, %v70_v51 }
  0x1e   :  { %v47_v60 = vadd.f32 %v46_v57, %v31_v53  ;;  %v86_v61 = vadd.f32 %v85_v59, %v71_v55 }
  0x20   :  { %v48_v62 = vrot.slane %v47_v60, 4  ;;  %v87_v63 = vadd.f32 %v86_v61, %v72_v58 }
  0x22   :  { %v49_v0 = vadd.f32 %v48_v62, %v47_v60  ;;  %v88_v1 = vrot.slane %v87_v63, 4 }
  0x24   :  { %v50_v2 = vrot.slane %v49_v0, 2  ;;  %v89_v3 = vadd.f32 %v88_v1, %v87_v63 }
  0x26   :  { %v51_v4 = vadd.f32 %v50_v2, %v49_v0  ;;  %v90_v5 = vrot.slane %v89_v3, 2 }
  0x28   :  { %v52_v6 = vrot.slane %v51_v4, 1  ;;  %v91_v8 = vadd.f32 %v90_v5, %v89_v3 }
  0x2a   :  { %v53_v9 = vadd.f32 %v52_v6, %v51_v4  ;;  %v92_v10 = vrot.slane %v91_v8, 1 }
  0x2c   :  { %v54_v11 = vadd.f32 %v53_v9, %v32_v7  ;;  %v93_v13 = vadd.f32 %v92_v10, %v91_v8 }
  0x2e   :  { %55 = vst [vmem:[%s187_s1] sm:$0x1] %v54_v11  ;;  %v94_v14 = vadd.f32 %v93_v13, %v56_v12 }
  0x30   :  { %95 = vst [vmem:[%s188_s2] sm:$0x1] %v94_v14 }

// kernel: discriminator70.13
= control target key start
LH: loop header
LB: loop body
LE: loop exit
PB: predicated region body
PF: predicated region fallthrough
CT: control target
= control target key end

     0   :  { %s423_s0 = inlined_call_operand.vmem [shape: f32[128,128], index: 0, kind: input, shape index: {}]   ;;  %s424_s1 = inlined_call_operand.vmem [shape: f32[1,128], index: 1, kind: input, shape index: {}]   ;;  %s425_s2 = inlined_call_operand.vmem [shape: f32[1,128], index: 2, kind: input, shape index: {}]   ;;  %s426_s3 = inlined_call_operand.vmem [shape: bf16[128,128], index: 3, kind: output, shape index: {}]  }
   0x1   :  { %v14_v0 = vld [vmem:[%s423_s0] sm:$0xff]  ;;  %v15_v1 = vld [vmem:[%s423_s0 + $0x8] sm:$0xff]  ;;  %v16_v6 = vld [vmem:[%s423_s0 + $0x10] sm:$0xff] }
   0x2   :  { %v318_v2 = vld [vmem:[%s424_s1] ss:$0 sm:$0xff]  ;;  %v17_v7 = vld [vmem:[%s423_s0 + $0x18] sm:$0xff]  ;;  %v19_v11 = vld [vmem:[%s423_s0 + $0x28] sm:$0xff] }
   0x3   :  { %v37_v3 = vmul.f32 %v318_v2, %v14_v0  ;;  %v38_v4 = vmul.f32 %v318_v2, %v15_v1  ;;  %v325_v5 = vld [vmem:[%s425_s2] ss:$0 sm:$0xff]  ;;  %v39_v8 = vmul.f32 %v318_v2, %v16_v6  ;;  %v40_v9 = vmul.f32 %v318_v2, %v17_v7  ;;  %v20_v12 = vld [vmem:[%s423_s0 + $0x30] sm:$0xff]  ;;  %v21_v17 = vld [vmem:[%s423_s0 + $0x38] sm:$0xff] }
   0x4   :  { %v18_v10 = vld [vmem:[%s423_s0 + $0x20] sm:$0xff]  ;;  %v42_v16 = vmul.f32 %v318_v2, %v19_v11  ;;  %v43_v20 = vmul.f32 %v318_v2, %v20_v12  ;;  %v44_v21 = vmul.f32 %v318_v2, %v21_v17  ;;  %v23_v35 = vld [vmem:[%s423_s0 + $0x48] sm:$0xff]  ;;  %v24_v36 = vld [vmem:[%s423_s0 + $0x50] sm:$0xff] }
   0x5   :  { %v60_v13 = vadd.f32 %v325_v5, %v37_v3  ;;  %v61_v14 = vadd.f32 %v325_v5, %v38_v4  ;;  %v41_v15 = vmul.f32 %v318_v2, %v18_v10  ;;  %v62_v18 = vadd.f32 %v325_v5, %v39_v8  ;;  %v22_v34 = vld [vmem:[%s423_s0 + $0x40] sm:$0xff]  ;;  %v25_v42 = vld [vmem:[%s423_s0 + $0x58] sm:$0xff]  ;;  %v27_v48 = vld [vmem:[%s423_s0 + $0x68] sm:$0xff] }
   0x6   :  { %v63_v19 = vadd.f32 %v325_v5, %v40_v9  ;;  %v65_v29 = vadd.f32 %v325_v5, %v42_v16  ;;  %v66_v33 = vadd.f32 %v325_v5, %v43_v20  ;;  %v67_v40 = vadd.f32 %v325_v5, %v44_v21  ;;  %v26_v47 = vld [vmem:[%s423_s0 + $0x60] sm:$0xff]  ;;  %v28_v60 = vld [vmem:[%s423_s0 + $0x70] sm:$0xff]  ;;  %v29_v7 = vld [vmem:[%s423_s0 + $0x78] sm:$0xff] }
   0x7   :  { %vm76_vm0 = vcmp.ge.f32.partialorder %v60_v13, 0.0  ;;  %vm77_vm1 = vcmp.ge.f32.partialorder %v61_v14, 0.0  ;;  %v92_v22 = vmul.f32 0.2, %v60_v13  ;;  %v93_v23 = vmul.f32 0.2, %v61_v14 }
   0x8   :  { %vm78_vm2 = vcmp.ge.f32.partialorder %v62_v18, 0.0  ;;  %vm79_vm3 = vcmp.ge.f32.partialorder %v63_v19, 0.0  ;;  %v94_v24 = vmul.f32 0.2, %v62_v18  ;;  %v95_v25 = vmul.f32 0.2, %v63_v19 }
   0x9   :  { %v108_v26 = vsel %vm76_vm0, %v60_v13, %v92_v22  ;;  %v109_v27 = vsel %vm77_vm1, %v61_v14, %v93_v23  ;;  %v64_v28 = vadd.f32 %v325_v5, %v41_v15  ;;  %vm81_vm5 = vcmp.ge.f32.partialorder %v65_v29, 0.0 }
   0xa   :  { %v245_v30 = vpack.c.bf16 %v109_v27, %v108_v26  ;;  %v110_v31 = vsel %vm78_vm2, %v62_v18, %v94_v24  ;;  %v111_v32 = vsel %vm79_vm3, %v63_v19, %v95_v25  ;;  %v97_v39 = vmul.f32 0.2, %v65_v29 }
   0xb   :  { %v250_v37 = vpack.c.bf16 %v111_v32, %v110_v31  ;;  %vm80_vm4 = vcmp.ge.f32.partialorder %v64_v28, 0.0  ;;  %v96_v38 = vmul.f32 0.2, %v64_v28  ;;  %vm82_vm6 = vcmp.ge.f32.partialorder %v66_v33, 0.0 }
   0xc   :  { %246 = vst [vmem:[%s426_s3] sm:$0xff] %v245_v30   ;;  %v98_v41 = vmul.f32 0.2, %v66_v33  ;;  %v45_v44 = vmul.f32 %v318_v2, %v22_v34  ;;  %v46_v45 = vmul.f32 %v318_v2, %v23_v35  ;;  %v47_v46 = vmul.f32 %v318_v2, %v24_v36 }
   0xd   :  { %282 = vst [vmem:[%s426_s3 + $0x8] sm:$0xff] %v250_v37   ;;  %v112_v43 = vsel %vm80_vm4, %v64_v28, %v96_v38  ;;  %v113_v49 = vsel %vm81_vm5, %v65_v29, %v97_v39  ;;  %vm83_vm7 = vcmp.ge.f32.partialorder %v67_v40, 0.0  ;;  %v99_v50 = vmul.f32 0.2, %v67_v40 }
   0xe   :  { %v114_v51 = vsel %vm82_vm6, %v66_v33, %v98_v41  ;;  %v255_v52 = vpack.c.bf16 %v113_v49, %v112_v43  ;;  %v68_v53 = vadd.f32 %v325_v5, %v45_v44  ;;  %v69_v54 = vadd.f32 %v325_v5, %v46_v45 }
   0xf   :  { %v48_v55 = vmul.f32 %v318_v2, %v25_v42  ;;  %v115_v56 = vsel %vm83_vm7, %v67_v40, %v99_v50  ;;  %v70_v57 = vadd.f32 %v325_v5, %v47_v46  ;;  %v49_v58 = vmul.f32 %v318_v2, %v26_v47 }
  0x10   :  { %v50_v59 = vmul.f32 %v318_v2, %v27_v48  ;;  %283 = vst [vmem:[%s426_s3 + $0x10] sm:$0xff] %v255_v52   ;;  %v260_v61 = vpack.c.bf16 %v115_v56, %v114_v51  ;;  %vm84_vm8 = vcmp.ge.f32.partialorder %v68_v53, 0.0  ;;  %vm85_vm9 = vcmp.ge.f32.partialorder %v69_v54, 0.0 }
  0x11   :  { %v100_v62 = vmul.f32 0.2, %v68_v53  ;;  %v101_v63 = vmul.f32 0.2, %v69_v54  ;;  %v71_v0 = vadd.f32 %v325_v5, %v48_v55  ;;  %vm86_vm10 = vcmp.ge.f32.partialorder %v70_v57, 0.0 }
  0x12   :  { %v102_v1 = vmul.f32 0.2, %v70_v57  ;;  %284 = vst [vmem:[%s426_s3 + $0x18] sm:$0xff] %v260_v61   ;;  %v72_v4 = vadd.f32 %v325_v5, %v49_v58  ;;  %v73_v6 = vadd.f32 %v325_v5, %v50_v59  ;;  %v51_v8 = vmul.f32 %v318_v2, %v28_v60 }
  0x13   :  { %v116_v3 = vsel %vm84_vm8, %v68_v53, %v100_v62  ;;  %v117_v9 = vsel %vm85_vm9, %v69_v54, %v101_v63  ;;  %vm87_vm11 = vcmp.ge.f32.partialorder %v71_v0, 0.0  ;;  %v103_v10 = vmul.f32 0.2, %v71_v0 }
  0x14   :  { %v118_v11 = vsel %vm86_vm10, %v70_v57, %v102_v1  ;;  %v265_v12 = vpack.c.bf16 %v117_v9, %v116_v3  ;;  %vm88_vm12 = vcmp.ge.f32.partialorder %v72_v4, 0.0  ;;  %vm89_vm13 = vcmp.ge.f32.partialorder %v73_v6, 0.0 }
  0x15   :  { %v104_v13 = vmul.f32 0.2, %v72_v4  ;;  %v119_v14 = vsel %vm87_vm11, %v71_v0, %v103_v10  ;;  %v105_v15 = vmul.f32 0.2, %v73_v6  ;;  %v52_v16 = vmul.f32 %v318_v2, %v29_v7 }
  0x16   :  { %v74_v17 = vadd.f32 %v325_v5, %v51_v8  ;;  %285 = vst [vmem:[%s426_s3 + $0x20] sm:$0xff] %v265_v12   ;;  %v270_v18 = vpack.c.bf16 %v119_v14, %v118_v11 }
  0x17   :  { %v120_v19 = vsel %vm88_vm12, %v72_v4, %v104_v13  ;;  %v121_v20 = vsel %vm89_vm13, %v73_v6, %v105_v15  ;;  %v75_v21 = vadd.f32 %v325_v5, %v52_v16 }
  0x18   :  { %vm90_vm14 = vcmp.ge.f32.partialorder %v74_v17, 0.0  ;;  %v106_v22 = vmul.f32 0.2, %v74_v17  ;;  %286 = vst [vmem:[%s426_s3 + $0x28] sm:$0xff] %v270_v18   ;;  %v275_v23 = vpack.c.bf16 %v121_v20, %v120_v19 }
  0x19   :  { %vm91_vm15 = vcmp.ge.f32.partialorder %v75_v21, 0.0  ;;  %v107_v2 = vmul.f32 0.2, %v75_v21 }
  0x1a   :  { %v122_v24 = vsel %vm90_vm14, %v74_v17, %v106_v22  ;;  %287 = vst [vmem:[%s426_s3 + $0x30] sm:$0xff] %v275_v23  }
  0x1b   :  { %v123_v25 = vsel %vm91_vm15, %v75_v21, %v107_v2 }
  0x1c   :  { %v280_v26 = vpack.c.bf16 %v123_v25, %v122_v24 }
  0x1e   :  { %288 = vst [vmem:[%s426_s3 + $0x38] sm:$0xff] %v280_v26  }

// kernel: discriminator70.14
= control target key start
LH: loop header
LB: loop body
LE: loop exit
PB: predicated region body
PF: predicated region fallthrough
CT: control target
= control target key end

     0   :  { %s1450_s9 = smov 0   ;;  %s1452_s10 = smov 0   ;;  %s1803_s0 = inlined_call_operand.vmem [shape: bf16[32,2048], index: 0, kind: input, shape index: {}]   ;;  %s1804_s1 = inlined_call_operand.vmem [shape: bf16[2048,256], index: 1, kind: input, shape index: {}]   ;;  %s1805_s2 = inlined_call_operand.vmem [shape: f32[32,256], index: 2, kind: output, shape index: {}]  }
   0x1   :  { %s1454_s11 = smov 0   ;;  %s1456_s12 = smov 0  }
   0x2   :  { %s1458_s13 = smov 0   ;;  %s1460_s14 = smov 0  }
   0x3   :  { %s1462_s15 = smov 0   ;;  %s1464_s16 = smov 0  }
   0x4   :  { %s1466_s17 = smov 0   ;;  %s1468_s18 = smov 0  }
   0x5   :  { %s1470_s19 = smov 0  }
   0x6 LB: > { %s1095_s20 = sadd.s32 4294967295, %s1432_s19   ;;  %s24_s21 = sadd.s32 1, %s1424_s17  ;;  %s1432_s19 = sphi %s1470_s19, %s12_s19   ;;  %s1428_s18 = sphi %s1468_s18, %s1818_s18   ;;  %s1424_s17 = sphi %s1466_s17, %s1817_s17   ;;  %s1420_s16 = sphi %s1464_s16, %s1816_s16   ;;  %s1416_s15 = sphi %s1462_s15, %s1815_s15   ;;  %s1412_s14 = sphi %s1460_s14, %s1814_s14   ;;  %s1408_s13 = sphi %s1458_s13, %s1813_s13   ;;  %s1404_s12 = sphi %s1456_s12, %s1812_s12   ;;  %s1400_s11 = sphi %s1454_s11, %s1811_s11   ;;  %s1396_s10 = sphi %s1452_s10, %s1810_s10   ;;  %s1392_s9 = sphi %s1450_s9, %s1809_s9  }
   0x7   : > { %p25_p0 = scmp.ge.s32.totalorder %s24_s21, 4  ;;  %s27_s22 = sadd.s32 1, %s1428_s18 }
   0x8   : > { %s40_s23 = sadd.s32 1, %s1412_s14  ;;  %p47_p1 = scmp.ne.s32.totalorder %s1412_s14, %s1408_s13 }
   0x9   : > { %s1820_s21 = smov (%p25_p0, %s24_s21), 0  ;;  %s1822_s22 = smov (!%p25_p0, %s27_s22), %s1428_s18 }
   0xa   : > { %s36_s24 = ssub.s32 %s1424_s17, %s1820_s21  ;;  %p48_p2 = scmp.eq.s32.totalorder %s1432_s19, 0 }
   0xb   : > { %p29_p3 = scmp.ge.s32.totalorder %s1822_s22, 2  ;;  %p38_p4 = scmp.eq.s32.totalorder %s36_s24, 0 }
   0xc   : > { %p1517_p5 = por %p48_p2, %p47_p1  ;;  %s68_s26 = sadd.s32 1, %s1404_s12 }
   0xd   : > { %s1824_s22 = smov (%p29_p3, %s1822_s22), 0  ;;  %p75_p6 = scmp.ne.s32.totalorder %s1404_s12, %s1400_s11 }
   0xe   : > { %s1525_s27 = scalar_select %p38_p4, %s1412_s14, %s40_s23  }
   0xf   : > { %s64_s28 = ssub.s32 %s1428_s18, %s1824_s22  ;;  %p1531_p9 = por %p75_p6, %p48_p2 }
  0x10   : > { %s65_s29 = sor.u32 %s64_s28, %s36_s24  ;;  %p94_p7 = scmp.eq.s32.totalorder %s64_s28, 0 }
  0x11   : > { %p66_p8 = scmp.eq.s32.totalorder %s65_s29, 0  ;;  %s96_s3 = sadd.s32 1, %s1396_s10 }
  0x12   : > { %p106_p10 = scmp.ne.s32.totalorder %s1396_s10, %s1392_s9  ;;  %p107_p11 = scmp.eq.s32.totalorder %s1095_s20, 7 }
  0x13   : > { %s1539_s4 = scalar_select %p66_p8, %s1404_s12, %s68_s26  }
  0x14   : > { %s1542_s5 = scalar_select %p94_p7, %s1396_s10, %s96_s3  }
  0x15   : > { %p1544_p12 = por %p107_p11, %p106_p10  ;;  %p1098_p13 = scmp.ge.s32.totalorder %s1432_s19, 8 }
  0x17   : > { %129 = sbr.rel (%p1098_p13) target bundleno = 86 (0x56), region = 16 }
  0x1e   : > { %132 = sbr.rel (!%p1517_p5) target bundleno = 38 (0x26), region = 20  ;;  %s134_s7 = sand.u32 (%p1517_p5), 1, %s1412_s14  }
  0x1f   : > { %s1155_s8 = sshll.u32 (%p1517_p5), %s1424_s17, 4  ;;  %s1099_s23 = sshll.u32 (%p1517_p5), %s134_s7, 6 }
  0x20   : > { %s142_s28 = scalar_lea.vmem (%p1517_p5), %s1803_s0, %s1155_s8  ;;  %s136_s20 = scalar_lea.vmem (%p1517_p5), [#allocation2], %s1099_s23 }
  0x21   : > { %v155_v0 = vld [vmem:[%s142_s28] sm:$0xff] (%p1517_p5)  ;;  %v157_v1 = vld [vmem:[%s142_s28 + $0x8] sm:$0xff] (%p1517_p5) }
  0x22   : > { %v159_v2 = vld [vmem:[%s142_s28 + $0x40] sm:$0xff] (%p1517_p5)  ;;  %156 = vst [vmem:[%s136_s20] sm:$0xff] (%p1517_p5), %v155_v0  ;;  %158 = vst [vmem:[%s136_s20 + $0x8] sm:$0xff] (%p1517_p5), %v157_v1  ;;  %v161_v3 = vld [vmem:[%s142_s28 + $0x48] sm:$0xff] (%p1517_p5) }
  0x23   : > { %160 = vst [vmem:[%s136_s20 + $0x10] sm:$0xff] (%p1517_p5), %v159_v2  ;;  %v163_v4 = vld [vmem:[%s142_s28 + $0x80] sm:$0xff] (%p1517_p5)  ;;  %v165_v5 = vld [vmem:[%s142_s28 + $0x88] sm:$0xff] (%p1517_p5)  ;;  %162 = vst [vmem:[%s136_s20 + $0x18] sm:$0xff] (%p1517_p5), %v161_v3 }
  0x24   : > { %164 = vst [vmem:[%s136_s20 + $0x20] sm:$0xff] (%p1517_p5), %v163_v4  ;;  %166 = vst [vmem:[%s136_s20 + $0x28] sm:$0xff] (%p1517_p5), %v165_v5  ;;  %v167_v6 = vld [vmem:[%s142_s28 + $0xc0] sm:$0xff] (%p1517_p5)  ;;  %v169_v7 = vld [vmem:[%s142_s28 + $0xc8] sm:$0xff] (%p1517_p5) }
  0x25   : > { %168 = vst [vmem:[%s136_s20 + $0x30] sm:$0xff] %v167_v6  ;;  %170 = vst [vmem:[%s136_s20 + $0x38] sm:$0xff] %v169_v7 }
  0x26 PF: > { %176 = sbr.rel (!%p1531_p9) target bundleno = 86 (0x56), region = 43  ;;  %s178_s25 = sand.u32 (%p1531_p9), 1, %s1404_s12  }
  0x27   : > { %s1156_s29 = sshll.u32 (%p1531_p9), %s1424_s17, 7  ;;  %s1102_s3 = sshll.u32 (%p1531_p9), %s178_s25, 8 }
  0x28   : > { %s183_s7 = sadd.s32 (%p1531_p9), %s1428_s18, %s1156_s29  ;;  %s1569_s30 = scalar_lea.vmem (%p1531_p9), [#allocation3], %s1102_s3 }
  0x29   : > { %s1105_s8 = sshll.u32 (%p1531_p9), %s183_s7, 2 }
  0x2a   : > { %s1564_s26 = scalar_lea.vmem (%p1531_p9), %s1804_s1, %s1105_s8 }
  0x2b   : > { %v201_v8 = vld [vmem:[%s1564_s26] sm:$0xf] (%p1531_p9)  ;;  %v203_v9 = vld [vmem:[%s1564_s26 + $0x8] sm:$0xf] (%p1531_p9)  ;;  %v205_v10 = vld [vmem:[%s1564_s26 + $0x10] sm:$0xf] (%p1531_p9) }
  0x2c   : > { %202 = vst [vmem:[%s1569_s30] sm:$0xf] (%p1531_p9), %v201_v8  ;;  %204 = vst [vmem:[%s1569_s30 + $0x4] sm:$0xf] (%p1531_p9), %v203_v9  ;;  %v207_v11 = vld [vmem:[%s1564_s26 + $0x18] sm:$0xf] (%p1531_p9) }
  0x2d   : > { %206 = vst [vmem:[%s1569_s30 + $0x8] sm:$0xf] %v205_v10  ;;  %v209_v12 = vld [vmem:[%s1564_s26 + $0x20] sm:$0xf]  ;;  %v211_v13 = vld [vmem:[%s1564_s26 + $0x28] sm:$0xf] }
  0x2e   : > { %208 = vst [vmem:[%s1569_s30 + $0xc] sm:$0xf] %v207_v11  ;;  %210 = vst [vmem:[%s1569_s30 + $0x10] sm:$0xf] %v209_v12  ;;  %v213_v14 = vld [vmem:[%s1564_s26 + $0x30] sm:$0xf] }
  0x2f   : > { %212 = vst [vmem:[%s1569_s30 + $0x14] sm:$0xf] %v211_v13  ;;  %v215_v15 = vld [vmem:[%s1564_s26 + $0x38] sm:$0xf]  ;;  %v217_v16 = vld [vmem:[%s1564_s26 + $0x40] sm:$0xf] }
  0x30   : > { %214 = vst [vmem:[%s1569_s30 + $0x18] sm:$0xf] %v213_v14  ;;  %216 = vst [vmem:[%s1569_s30 + $0x1c] sm:$0xf] %v215_v15  ;;  %v219_v17 = vld [vmem:[%s1564_s26 + $0x48] sm:$0xf] }
  0x31   : > { %218 = vst [vmem:[%s1569_s30 + $0x20] sm:$0xf] %v217_v16  ;;  %v221_v18 = vld [vmem:[%s1564_s26 + $0x50] sm:$0xf]  ;;  %v223_v19 = vld [vmem:[%s1564_s26 + $0x58] sm:$0xf] }
  0x32   : > { %220 = vst [vmem:[%s1569_s30 + $0x24] sm:$0xf] %v219_v17  ;;  %222 = vst [vmem:[%s1569_s30 + $0x28] sm:$0xf] %v221_v18  ;;  %v225_v20 = vld [vmem:[%s1564_s26 + $0x60] sm:$0xf] }
  0x33   : > { %224 = vst [vmem:[%s1569_s30 + $0x2c] sm:$0xf] %v223_v19  ;;  %v227_v21 = vld [vmem:[%s1564_s26 + $0x68] sm:$0xf]  ;;  %v229_v22 = vld [vmem:[%s1564_s26 + $0x70] sm:$0xf] }
  0x34   : > { %226 = vst [vmem:[%s1569_s30 + $0x30] sm:$0xf] %v225_v20  ;;  %228 = vst [vmem:[%s1569_s30 + $0x34] sm:$0xf] %v227_v21  ;;  %v231_v23 = vld [vmem:[%s1564_s26 + $0x78] sm:$0xf] }
  0x35   : > { %230 = vst [vmem:[%s1569_s30 + $0x38] sm:$0xf] %v229_v22  ;;  %v233_v24 = vld [vmem:[%s1564_s26 + $0x80] sm:$0xf]  ;;  %v235_v25 = vld [vmem:[%s1564_s26 + $0x88] sm:$0xf] }
  0x36   : > { %232 = vst [vmem:[%s1569_s30 + $0x3c] sm:$0xf] %v231_v23  ;;  %234 = vst [vmem:[%s1569_s30 + $0x40] sm:$0xf] %v233_v24  ;;  %v237_v26 = vld [vmem:[%s1564_s26 + $0x90] sm:$0xf] }
  0x37   : > { %236 = vst [vmem:[%s1569_s30 + $0x44] sm:$0xf] %v235_v25  ;;  %v239_v27 = vld [vmem:[%s1564_s26 + $0x98] sm:$0xf]  ;;  %v241_v28 = vld [vmem:[%s1564_s26 + $0xa0] sm:$0xf] }
  0x38   : > { %238 = vst [vmem:[%s1569_s30 + $0x48] sm:$0xf] %v237_v26  ;;  %240 = vst [vmem:[%s1569_s30 + $0x4c] sm:$0xf] %v239_v27  ;;  %v243_v29 = vld [vmem:[%s1564_s26 + $0xa8] sm:$0xf] }
  0x39   : > { %242 = vst [vmem:[%s1569_s30 + $0x50] sm:$0xf] %v241_v28  ;;  %v245_v30 = vld [vmem:[%s1564_s26 + $0xb0] sm:$0xf]  ;;  %v247_v31 = vld [vmem:[%s1564_s26 + $0xb8] sm:$0xf] }
  0x3a   : > { %244 = vst [vmem:[%s1569_s30 + $0x54] sm:$0xf] %v243_v29  ;;  %246 = vst [vmem:[%s1569_s30 + $0x58] sm:$0xf] %v245_v30  ;;  %v249_v32 = vld [vmem:[%s1564_s26 + $0xc0] sm:$0xf] }
  0x3b   : > { %248 = vst [vmem:[%s1569_s30 + $0x5c] sm:$0xf] %v247_v31  ;;  %v251_v33 = vld [vmem:[%s1564_s26 + $0xc8] sm:$0xf]  ;;  %v253_v34 = vld [vmem:[%s1564_s26 + $0xd0] sm:$0xf] }
  0x3c   : > { %250 = vst [vmem:[%s1569_s30 + $0x60] sm:$0xf] %v249_v32  ;;  %252 = vst [vmem:[%s1569_s30 + $0x64] sm:$0xf] %v251_v33  ;;  %v255_v35 = vld [vmem:[%s1564_s26 + $0xd8] sm:$0xf] }
  0x3d   : > { %254 = vst [vmem:[%s1569_s30 + $0x68] sm:$0xf] %v253_v34  ;;  %v257_v36 = vld [vmem:[%s1564_s26 + $0xe0] sm:$0xf]  ;;  %v259_v37 = vld [vmem:[%s1564_s26 + $0xe8] sm:$0xf] }
  0x3e   : > { %256 = vst [vmem:[%s1569_s30 + $0x6c] sm:$0xf] %v255_v35  ;;  %258 = vst [vmem:[%s1569_s30 + $0x70] sm:$0xf] %v257_v36  ;;  %v261_v38 = vld [vmem:[%s1564_s26 + $0xf0] sm:$0xf] }
  0x3f   : > { %260 = vst [vmem:[%s1569_s30 + $0x74] sm:$0xf] %v259_v37  ;;  %v263_v39 = vld [vmem:[%s1564_s26 + $0xf8] sm:$0xf]  ;;  %v265_v40 = vld [vmem:[%s1564_s26 + $0x100] sm:$0xf] }
  0x40   : > { %262 = vst [vmem:[%s1569_s30 + $0x78] sm:$0xf] %v261_v38  ;;  %264 = vst [vmem:[%s1569_s30 + $0x7c] sm:$0xf] %v263_v39  ;;  %v267_v41 = vld [vmem:[%s1564_s26 + $0x108] sm:$0xf] }
  0x41   : > { %266 = vst [vmem:[%s1569_s30 + $0x80] sm:$0xf] %v265_v40  ;;  %v269_v42 = vld [vmem:[%s1564_s26 + $0x110] sm:$0xf]  ;;  %v271_v43 = vld [vmem:[%s1564_s26 + $0x118] sm:$0xf] }
  0x42   : > { %268 = vst [vmem:[%s1569_s30 + $0x84] sm:$0xf] %v267_v41  ;;  %270 = vst [vmem:[%s1569_s30 + $0x88] sm:$0xf] %v269_v42  ;;  %v273_v44 = vld [vmem:[%s1564_s26 + $0x120] sm:$0xf] }
  0x43   : > { %272 = vst [vmem:[%s1569_s30 + $0x8c] sm:$0xf] %v271_v43  ;;  %v275_v45 = vld [vmem:[%s1564_s26 + $0x128] sm:$0xf]  ;;  %v277_v46 = vld [vmem:[%s1564_s26 + $0x130] sm:$0xf] }
  0x44   : > { %274 = vst [vmem:[%s1569_s30 + $0x90] sm:$0xf] %v273_v44  ;;  %276 = vst [vmem:[%s1569_s30 + $0x94] sm:$0xf] %v275_v45  ;;  %v279_v47 = vld [vmem:[%s1564_s26 + $0x138] sm:$0xf] }
  0x45   : > { %278 = vst [vmem:[%s1569_s30 + $0x98] sm:$0xf] %v277_v46  ;;  %v281_v48 = vld [vmem:[%s1564_s26 + $0x140] sm:$0xf]  ;;  %v283_v49 = vld [vmem:[%s1564_s26 + $0x148] sm:$0xf] }
  0x46   : > { %280 = vst [vmem:[%s1569_s30 + $0x9c] sm:$0xf] %v279_v47  ;;  %282 = vst [vmem:[%s1569_s30 + $0xa0] sm:$0xf] %v281_v48  ;;  %v285_v50 = vld [vmem:[%s1564_s26 + $0x150] sm:$0xf] }
  0x47   : > { %284 = vst [vmem:[%s1569_s30 + $0xa4] sm:$0xf] %v283_v49  ;;  %v287_v51 = vld [vmem:[%s1564_s26 + $0x158] sm:$0xf]  ;;  %v289_v52 = vld [vmem:[%s1564_s26 + $0x160] sm:$0xf] }
  0x48   : > { %286 = vst [vmem:[%s1569_s30 + $0xa8] sm:$0xf] %v285_v50  ;;  %288 = vst [vmem:[%s1569_s30 + $0xac] sm:$0xf] %v287_v51  ;;  %v291_v53 = vld [vmem:[%s1564_s26 + $0x168] sm:$0xf] }
  0x49   : > { %290 = vst [vmem:[%s1569_s30 + $0xb0] sm:$0xf] %v289_v52  ;;  %v293_v54 = vld [vmem:[%s1564_s26 + $0x170] sm:$0xf]  ;;  %v295_v55 = vld [vmem:[%s1564_s26 + $0x178] sm:$0xf] }
  0x4a   : > { %292 = vst [vmem:[%s1569_s30 + $0xb4] sm:$0xf] %v291_v53  ;;  %294 = vst [vmem:[%s1569_s30 + $0xb8] sm:$0xf] %v293_v54  ;;  %v297_v56 = vld [vmem:[%s1564_s26 + $0x180] sm:$0xf] }
  0x4b   : > { %296 = vst [vmem:[%s1569_s30 + $0xbc] sm:$0xf] %v295_v55  ;;  %v299_v57 = vld [vmem:[%s1564_s26 + $0x188] sm:$0xf]  ;;  %v301_v58 = vld [vmem:[%s1564_s26 + $0x190] sm:$0xf] }
  0x4c   : > { %298 = vst [vmem:[%s1569_s30 + $0xc0] sm:$0xf] %v297_v56  ;;  %300 = vst [vmem:[%s1569_s30 + $0xc4] sm:$0xf] %v299_v57  ;;  %v303_v59 = vld [vmem:[%s1564_s26 + $0x198] sm:$0xf] }
  0x4d   : > { %302 = vst [vmem:[%s1569_s30 + $0xc8] sm:$0xf] %v301_v58  ;;  %v305_v60 = vld [vmem:[%s1564_s26 + $0x1a0] sm:$0xf]  ;;  %v307_v61 = vld [vmem:[%s1564_s26 + $0x1a8] sm:$0xf] }
  0x4e   : > { %304 = vst [vmem:[%s1569_s30 + $0xcc] sm:$0xf] %v303_v59  ;;  %306 = vst [vmem:[%s1569_s30 + $0xd0] sm:$0xf] %v305_v60  ;;  %v309_v62 = vld [vmem:[%s1564_s26 + $0x1b0] sm:$0xf] }
  0x4f   : > { %308 = vst [vmem:[%s1569_s30 + $0xd4] sm:$0xf] %v307_v61  ;;  %v311_v63 = vld [vmem:[%s1564_s26 + $0x1b8] sm:$0xf]  ;;  %v313_v0 = vld [vmem:[%s1564_s26 + $0x1c0] sm:$0xf] }
  0x50   : > { %310 = vst [vmem:[%s1569_s30 + $0xd8] sm:$0xf] %v309_v62  ;;  %312 = vst [vmem:[%s1569_s30 + $0xdc] sm:$0xf] %v311_v63  ;;  %v315_v1 = vld [vmem:[%s1564_s26 + $0x1c8] sm:$0xf] }
  0x51   : > { %314 = vst [vmem:[%s1569_s30 + $0xe0] sm:$0xf] %v313_v0  ;;  %v317_v2 = vld [vmem:[%s1564_s26 + $0x1d0] sm:$0xf]  ;;  %v319_v3 = vld [vmem:[%s1564_s26 + $0x1d8] sm:$0xf] }
  0x52   : > { %316 = vst [vmem:[%s1569_s30 + $0xe4] sm:$0xf] %v315_v1  ;;  %318 = vst [vmem:[%s1569_s30 + $0xe8] sm:$0xf] %v317_v2  ;;  %v321_v4 = vld [vmem:[%s1564_s26 + $0x1e0] sm:$0xf] }
  0x53   : > { %320 = vst [vmem:[%s1569_s30 + $0xec] sm:$0xf] %v319_v3  ;;  %v323_v5 = vld [vmem:[%s1564_s26 + $0x1e8] sm:$0xf]  ;;  %v325_v6 = vld [vmem:[%s1564_s26 + $0x1f0] sm:$0xf] }
  0x54   : > { %322 = vst [vmem:[%s1569_s30 + $0xf0] sm:$0xf] %v321_v4  ;;  %324 = vst [vmem:[%s1569_s30 + $0xf4] sm:$0xf] %v323_v5  ;;  %v327_v7 = vld [vmem:[%s1564_s26 + $0x1f8] sm:$0xf] }
  0x55   : > { %326 = vst [vmem:[%s1569_s30 + $0xf8] sm:$0xf] %v325_v6  ;;  %328 = vst [vmem:[%s1569_s30 + $0xfc] sm:$0xf] %v327_v7 }
  0x56 PF: > { %p1106_p0 = scmp.ge.s32.totalorder %s1432_s19, 1  ;;  %p478_p1 = scmp.lt.s32.totalorder %s1432_s19, 9 }
  0x58   : > { %p479_p2 = pnand %p1106_p0, %p478_p1 }
  0x59   : > { %s485_s28 = sand.u32 (!%p479_p2), 1, %s1408_s13   ;;  %s492_s20 = sand.u32 (!%p479_p2), 1, %s1400_s11  }
  0x5a   : > { %482 = sbr.rel (%p479_p2) target bundleno = 377 (0x179), region = 84  ;;  %s1107_s25 = sshll.u32 (!%p479_p2), %s485_s28, 6 }
  0x5b   : > { %s1108_s29 = sshll.u32 (!%p479_p2), %s492_s20, 8  ;;  %s513_s3 = sand.u32 (!%p479_p2), 1, %s1392_s9  }
  0x5c   : > { %s1109_s7 = sshll.u32 (!%p479_p2), %s513_s3, 5  ;;  %s1701_s8 = scalar_lea.vmem (!%p479_p2), [#allocation2], %s1107_s25 }
  0x5d   : > { %s1703_s23 = scalar_lea.vmem (!%p479_p2), [#allocation3], %s1108_s29  ;;  %s1705_s24 = scalar_lea.vmem (!%p479_p2), [#allocation4], %s1109_s7 }
  0x5e   : > { %p1110_p3 = scmp.ne.s32.totalorder (!%p479_p2), %s1416_s15, 0 }
  0x61   : > { %524 = sbr.rel (%p1110_p3) target bundleno = 104 (0x68), region = 96  ;;  %v1434_v8 = vmov (!%p1110_p3), 0.0  }
  0x62   : > { %525 = vst [vmem:[%s1705_s24] sm:$0xff] (!%p1110_p3), %v1434_v8  ;;  %526 = vst [vmem:[%s1705_s24 + $0x8] sm:$0xff] (!%p1110_p3), %v1434_v8 }
  0x63   : > { %527 = vst [vmem:[%s1705_s24 + $0x10] sm:$0xff] (!%p1110_p3), %v1434_v8  ;;  %528 = vst [vmem:[%s1705_s24 + $0x18] sm:$0xff] (!%p1110_p3), %v1434_v8 }
  0x68 PF: > { %v1302_v9 = vld [vmem:[%s1703_s23 + $0x40] sm:$0xff]   ;;  %v1306_v13 = vld [vmem:[%s1703_s23 + $0x48] sm:$0xff]   ;;  %v1310_v17 = vld [vmem:[%s1703_s23 + $0x50] sm:$0xff]   ;;  %s1152_s9 = sshll.u32 (%p1544_p12), %s1420_s16, 3 }
  0x69   : > { %v1303_v10 = vld [vmem:[%s1703_s23 + $0xc0] sm:$0xff]   ;;  %1157 = vmatprep.subr.bf16.mxu0 %v1302_v9  ;;  %v1307_v14 = vld [vmem:[%s1703_s23 + $0xc8] sm:$0xff]   ;;  %v1311_v18 = vld [vmem:[%s1703_s23 + $0xd0] sm:$0xff]   ;;  %s954_s15 = scalar_lea.vmem (%p1544_p12), %s1805_s2, %s1152_s9 }
  0x6a   : > { %v1304_v11 = vld [vmem:[%s1703_s23] sm:$0xff]   ;;  %1185 = vmatprep.subr.bf16.mxu1 %v1303_v10  ;;  %v1308_v15 = vld [vmem:[%s1703_s23 + $0x8] sm:$0xff]   ;;  %v1312_v19 = vld [vmem:[%s1703_s23 + $0x10] sm:$0xff]  }
  0x6b   : > { %v1305_v12 = vld [vmem:[%s1703_s23 + $0x80] sm:$0xff]   ;;  %1158 = vmatpush3.bf16.msra.mxu0 %v1304_v11  ;;  %v1309_v16 = vld [vmem:[%s1703_s23 + $0x88] sm:$0xff]   ;;  %v1313_v20 = vld [vmem:[%s1703_s23 + $0x90] sm:$0xff]  }
  0x6c   : > { %1186 = vmatpush3.bf16.msra.mxu1 %v1305_v12  ;;  %1159 = vmatprep.subr.bf16.mxu0 %v1306_v13  ;;  %v1314_v21 = vld [vmem:[%s1703_s23 + $0x58] sm:$0xff]   ;;  %v1318_v25 = vld [vmem:[%s1703_s23 + $0x60] sm:$0xff]   ;;  %v1322_v29 = vld [vmem:[%s1703_s23 + $0x68] sm:$0xff]  }
  0x6d   : > { %1187 = vmatprep.subr.bf16.mxu1 %v1307_v14  ;;  %v1315_v22 = vld [vmem:[%s1703_s23 + $0xd8] sm:$0xff]   ;;  %v1319_v26 = vld [vmem:[%s1703_s23 + $0xe0] sm:$0xff]   ;;  %v1323_v30 = vld [vmem:[%s1703_s23 + $0xe8] sm:$0xff]  }
  0x6e   : > { %v1316_v23 = vld [vmem:[%s1703_s23 + $0x18] sm:$0xff]   ;;  %v1320_v27 = vld [vmem:[%s1703_s23 + $0x20] sm:$0xff]   ;;  %v1324_v31 = vld [vmem:[%s1703_s23 + $0x28] sm:$0xff]  }
  0x6f   : > { %1160 = vmatpush3.bf16.msra.mxu0 %v1308_v15  ;;  %v1317_v24 = vld [vmem:[%s1703_s23 + $0x98] sm:$0xff]   ;;  %v1321_v28 = vld [vmem:[%s1703_s23 + $0xa0] sm:$0xff]   ;;  %v1325_v32 = vld [vmem:[%s1703_s23 + $0xa8] sm:$0xff]  }
  0x70   : > { %1188 = vmatpush3.bf16.msra.mxu1 %v1309_v16  ;;  %1161 = vmatprep.subr.bf16.mxu0 %v1310_v17  ;;  %v1326_v33 = vld [vmem:[%s1703_s23 + $0x70] sm:$0xff]   ;;  %v1330_v37 = vld [vmem:[%s1703_s23 + $0x78] sm:$0xff]   ;;  %v529_v58 = vld [vmem:[%s1705_s24] sm:$0xff] }
  0x71   : > { %1189 = vmatprep.subr.bf16.mxu1 %v1311_v18  ;;  %v1327_v34 = vld [vmem:[%s1703_s23 + $0xf0] sm:$0xff]   ;;  %v1331_v38 = vld [vmem:[%s1703_s23 + $0xf8] sm:$0xff]   ;;  %v530_v63 = vld [vmem:[%s1705_s24 + $0x8] sm:$0xff] }
  0x72   : > { %v1328_v35 = vld [vmem:[%s1703_s23 + $0x30] sm:$0xff]   ;;  %v1332_v39 = vld [vmem:[%s1703_s23 + $0x38] sm:$0xff]  }
  0x73   : > { %1162 = vmatpush3.bf16.msra.mxu0 %v1312_v19  ;;  %v1329_v36 = vld [vmem:[%s1703_s23 + $0xb0] sm:$0xff]   ;;  %v1333_v40 = vld [vmem:[%s1703_s23 + $0xb8] sm:$0xff]  }
  0x74   : > { %1190 = vmatpush3.bf16.msra.mxu1 %v1313_v20  ;;  %1163 = vmatprep.subr.bf16.mxu0 %v1314_v21  ;;  %v1334_v41 = vld [vmem:[%s1701_s8] ss:$16 sps:$4 sm:$0xff]   ;;  %v1336_v42 = vld [vmem:[%s1701_s8 + $0x4] ss:$16 sps:$4 sm:$0xff]   ;;  %v1337_v43 = vld [vmem:[%s1701_s8 + $0x8] ss:$16 sps:$4 sm:$0xff]  }
  0x75   : > { %1191 = vmatprep.subr.bf16.mxu1 %v1315_v22  ;;  %v1339_v44 = vld [vmem:[%s1701_s8 + $0xc] ss:$16 sps:$4 sm:$0xff]   ;;  %869 = vmatprep.mubr.bf16.mxu0 %v1336_v42  ;;  %v1340_v45 = vld [vmem:[%s1701_s8 + $0x24] ss:$16 sps:$4 sm:$0xff]   ;;  %v1344_v47 = vld [vmem:[%s1701_s8 + $0x20] ss:$16 sps:$4 sm:$0xff]  }
  0x76   : > { %918 = vmatprep.mubr.bf16.mxu1 %v1339_v44  ;;  %v1342_v46 = vld [vmem:[%s1701_s8 + $0x2c] ss:$16 sps:$4 sm:$0xff]   ;;  %v1345_v48 = vld [vmem:[%s1701_s8 + $0x28] ss:$16 sps:$4 sm:$0xff]   ;;  %v531_v12 = vld [vmem:[%s1705_s24 + $0x10] sm:$0xff] }
  0x77   : > { %1164 = vmatpush3.bf16.msra.mxu0 %v1316_v23  ;;  %v532_v17 = vld [vmem:[%s1705_s24 + $0x18] sm:$0xff] }
  0x78   : > { %1192 = vmatpush3.bf16.msra.mxu1 %v1317_v24  ;;  %1165 = vmatprep.subr.bf16.mxu0 %v1318_v25 }
  0x79   : > { %1193 = vmatprep.subr.bf16.mxu1 %v1319_v26 }
  0x7b   : > { %1166 = vmatpush3.bf16.msra.mxu0 %v1320_v27 }
  0x7c   : > { %1194 = vmatpush3.bf16.msra.mxu1 %v1321_v28  ;;  %1167 = vmatprep.subr.bf16.mxu0 %v1322_v29 }
  0x7d   : > { %1195 = vmatprep.subr.bf16.mxu1 %v1323_v30 }
  0x7f   : > { %1168 = vmatpush3.bf16.msra.mxu0 %v1324_v31 }
  0x80   : > { %1196 = vmatpush3.bf16.msra.mxu1 %v1325_v32  ;;  %1169 = vmatprep.subr.bf16.mxu0 %v1326_v33 }
  0x81   : > { %1197 = vmatprep.subr.bf16.mxu1 %v1327_v34 }
  0x83   : > { %1170 = vmatpush3.bf16.msra.mxu0 %v1328_v35 }
  0x84   : > { %1198 = vmatpush3.bf16.msra.mxu1 %v1329_v36  ;;  %1171 = vmatprep.subr.bf16.mxu0 %v1330_v37 }
  0x85   : > { %1199 = vmatprep.subr.bf16.mxu1 %v1331_v38 }
  0x87   : > { %1172 = vmatpush3.bf16.msra.mxu0 %v1332_v39 }
  0x88   : > { %1200 = vmatpush3.bf16.msra.mxu1 %v1333_v40 }
  0x8a   : > { %870 = vmatmul.mubr.bf16.vlgmr.msra.gmra.mrb[0].mxu0 %v1334_v41 }
  0x8b   : > { %919 = vmatmul.mubr.bf16.vlgmr.msra.gmra.mrb[0].mxu1 %v1337_v43  ;;  %877 = vmatprep.mubr.bf16.mxu0 %v1340_v45 }
  0x8c   : > { %926 = vmatprep.mubr.bf16.mxu1 %v1342_v46 }
  0x92   : > { %878 = vmatmul.mubr.bf16.gmra.mrb[4].mxu0 %v1344_v47 }
  0x93   : > { %927 = vmatmul.mubr.bf16.gmra.mrb[4].mxu1 %v1345_v48 }
 0x15d   : > { %v1173_v49 = vpop.f32.mrb[0].mxu0 }
 0x15e   : > { %v1201_v50 = vpop.f32.mrb[0].mxu1  ;;  %v1174_v51 = vpop.f32.mrb[1].mxu0 }
 0x15f   : > { %v1175_v52 = vadd.f32 %v1174_v51, %v1173_v49  ;;  %v1202_v53 = vpop.f32.mrb[1].mxu1  ;;  %v1176_v54 = vpop.f32.mrb[2].mxu0 }
 0x160   : > { %v1203_v55 = vadd.f32 %v1202_v53, %v1201_v50  ;;  %v1204_v56 = vpop.f32.mrb[2].mxu1  ;;  %v1177_v57 = vpop.f32.mrb[3].mxu0 }
 0x161   : > { %v1178_v59 = vadd.f32 %v1177_v57, %v1176_v54  ;;  %v1205_v60 = vpop.f32.mrb[3].mxu1 }
 0x162   : > { %v921_v61 = vadd.f32 %v1203_v55, %v1175_v52  ;;  %v1206_v62 = vadd.f32 %v1205_v60, %v1204_v56 }
 0x164   : > { %v935_v0 = vadd.f32 %v921_v61, %v529_v58  ;;  %v924_v1 = vadd.f32 %v1206_v62, %v1178_v59 }
 0x165   : > { %v1179_v2 = vpop.f32.mrb[4].mxu0 }
 0x166   : > { %939 = vst [vmem:[%s1705_s24] sm:$0xff] %v935_v0  ;;  %v936_v3 = vadd.f32 %v924_v1, %v530_v63  ;;  %v1207_v4 = vpop.f32.mrb[4].mxu1  ;;  %v1180_v5 = vpop.f32.mrb[5].mxu0 }
 0x167   : > { %v1181_v6 = vadd.f32 %v1180_v5, %v1179_v2  ;;  %v1208_v7 = vpop.f32.mrb[5].mxu1  ;;  %v1182_v8 = vpop.f32.mrb[6].mxu0 }
 0x168   : > { %940 = vst [vmem:[%s1705_s24 + $0x8] sm:$0xff] %v936_v3  ;;  %v1209_v9 = vadd.f32 %v1208_v7, %v1207_v4  ;;  %v1210_v10 = vpop.f32.mrb[6].mxu1  ;;  %v1183_v11 = vpop.f32.mrb[7].mxu0 }
 0x169   : > { %v1184_v13 = vadd.f32 %v1183_v11, %v1182_v8  ;;  %v1211_v14 = vpop.f32.mrb[7].mxu1 }
 0x16a   : > { %v929_v15 = vadd.f32 %v1209_v9, %v1181_v6  ;;  %v1212_v16 = vadd.f32 %v1211_v14, %v1210_v10  ;;  %949 = sbr.rel (!%p1544_p12) target bundleno = 377 (0x179), region = 100 }
 0x16c   : > { %v937_v18 = vadd.f32 %v929_v15, %v531_v12  ;;  %v932_v19 = vadd.f32 %v1212_v16, %v1184_v13 }
 0x16d   : > { %v988_v21 = vld [vmem:[%s1705_s24] sm:$0xff] (%p1544_p12) }
 0x16e   : > { %941 = vst [vmem:[%s1705_s24 + $0x10] sm:$0xff] %v937_v18  ;;  %v938_v20 = vadd.f32 %v932_v19, %v532_v17  ;;  %989 = vst [vmem:[%s954_s15] sm:$0xff] (%p1544_p12), %v988_v21 }
 0x16f   : > { %v990_v22 = vld [vmem:[%s1705_s24 + $0x8] sm:$0xff] (%p1544_p12) }
 0x170   : > { %942 = vst [vmem:[%s1705_s24 + $0x18] sm:$0xff] %v938_v20  ;;  %991 = vst [vmem:[%s954_s15 + $0x10] sm:$0xff] (%p1544_p12), %v990_v22 }
 0x175   : > { %v992_v23 = vld [vmem:[%s1705_s24 + $0x10] sm:$0xff] }
 0x176   : > { %993 = vst [vmem:[%s954_s15 + $0x20] sm:$0xff] %v992_v23 }
 0x177   : > { %v994_v24 = vld [vmem:[%s1705_s24 + $0x18] sm:$0xff] }
 0x178   : > { %995 = vst [vmem:[%s954_s15 + $0x30] sm:$0xff] %v994_v24 }
 0x179 PF: > { %s12_s19 = sadd.s32 1, %s1432_s19   ;;  %s1809_s9 = smov %s1396_s10 }
 0x17a   : > { %p9_p4 = scmp.ge.s32.totalorder %s12_s19, 10   ;;  %s1810_s10 = smov %s1542_s5 }
 0x17b   : > { %s1811_s11 = smov %s1404_s12  ;;  %s1812_s12 = smov %s1539_s4 }
 0x17c   : > { %s1813_s13 = smov %s1412_s14  ;;  %s1814_s14 = smov %s1525_s27 }
 0x17d   : > { %s1815_s15 = smov %s1424_s17  ;;  %s1816_s16 = smov %s1428_s18 }
 0x17e   : > { %s1817_s17 = smov %s1820_s21  ;;  %s1818_s18 = smov %s1824_s22 }
 0x17f   :  { %11 = sbr.rel (!%p9_p4) target bundleno = 6 (0x6), region = 177 }

// kernel: discriminator70.15
= control target key start
LH: loop header
LB: loop body
LE: loop exit
PB: predicated region body
PF: predicated region fallthrough
CT: control target
= control target key end

     0   :  { %v14_v0 = vlaneseq  ;;  %v128_v10 = vmov 0.0   ;;  %v129_v35 = vmov 1966171168   ;;  %s199_s0 = inlined_call_operand.vmem [shape: f32[32,256], index: 0, kind: input, shape index: {}]   ;;  %s200_s1 = inlined_call_operand.vmem [shape: f32[1,256], index: 1, kind: output, shape index: {0}]   ;;  %s201_s2 = inlined_call_operand.vmem [shape: f32[1,256], index: 2, kind: output, shape index: {1}]  }
   0x1   :  { %v20_v1 = vld [vmem:[%s199_s0] sm:$0xff]  ;;  %v21_v2 = vld [vmem:[%s199_s0 + $0x8] sm:$0xff]  ;;  %v22_v3 = vld [vmem:[%s199_s0 + $0x10] sm:$0xff]  ;;  %v51_v36 = vunpack.c.l.s4 %v129_v35 }
   0x2   :  { %vm154_vm0 = vcmp.lt.s32.totalorder %v14_v0, 256  ;;  %v23_v5 = vld [vmem:[%s199_s0 + $0x18] sm:$0xff]  ;;  %v24_v6 = vld [vmem:[%s199_s0 + $0x20] sm:$0xff]  ;;  %v25_v7 = vld [vmem:[%s199_s0 + $0x28] sm:$0xff]  ;;  %v29_v8 = vadd.f32 %v22_v3, %v20_v1  ;;  %v72_v9 = vmul.f32 %v20_v1, %v20_v1  ;;  %v73_v14 = vmul.f32 %v21_v2, %v21_v2 }
   0x3   :  { %18 = vst.msk [vmem:[%s200_s1] sm:$0x3] %vm154_vm0, %v128_v10  ;;  %v26_v11 = vld [vmem:[%s199_s0 + $0x30] sm:$0xff]  ;;  %v27_v12 = vld [vmem:[%s199_s0 + $0x38] sm:$0xff]  ;;  %v38_v13 = vadd.f32 %v23_v5, %v21_v2  ;;  %19 = vst.msk [vmem:[%s201_s2] sm:$0x3] %vm154_vm0, %v128_v10  ;;  %v74_v15 = vmul.f32 %v22_v3, %v22_v3  ;;  %v75_v17 = vmul.f32 %v23_v5, %v23_v5  ;;  %v52_v45 = vunpack.c.0.s8 %v51_v36 }
   0x4   :  { %v30_v16 = vadd.f32 %v29_v8, %v24_v6  ;;  %v76_v18 = vmul.f32 %v24_v6, %v24_v6  ;;  %v77_v19 = vmul.f32 %v25_v7, %v25_v7  ;;  %v78_v21 = vmul.f32 %v26_v11, %v26_v11 }
   0x5   :  { %v39_v20 = vadd.f32 %v38_v13, %v25_v7  ;;  %v79_v23 = vmul.f32 %v27_v12, %v27_v12  ;;  %v80_v24 = vadd.f32 %v74_v15, %v72_v9  ;;  %v89_v25 = vadd.f32 %v75_v17, %v73_v14 }
   0x6   :  { %v31_v22 = vadd.f32 %v30_v16, %v26_v11  ;;  %v54_v46 = vshrl.u32 %v14_v0, 7 }
   0x7   :  { %v40_v26 = vadd.f32 %v39_v20, %v27_v12  ;;  %v81_v28 = vadd.f32 %v80_v24, %v76_v18  ;;  %v90_v29 = vadd.f32 %v89_v25, %v77_v19 }
   0x8   :  { %v32_v27 = vrot.slane %v31_v22, 4  ;;  %v55_v55 = vsub.s32 %v52_v45, %v54_v46 }
   0x9   :  { %v41_v30 = vrot.slane %v40_v26, 4  ;;  %v82_v32 = vadd.f32 %v81_v28, %v78_v21  ;;  %v91_v33 = vadd.f32 %v90_v29, %v79_v23 }
   0xa   :  { %v33_v31 = vadd.f32 %v32_v27, %v31_v22  ;;  %v28_v62 = vld [vmem:[%s200_s1] sm:$0x3] }
   0xb   :  { %v42_v34 = vadd.f32 %v41_v30, %v40_v26  ;;  %v83_v38 = vrot.slane %v82_v32, 4  ;;  %v92_v39 = vrot.slane %v91_v33, 4  ;;  %v71_v3 = vld [vmem:[%s201_s2] sm:$0x3] }
   0xc   :  { %v34_v37 = vrot.slane %v33_v31, 2 }
   0xd   :  { %v43_v40 = vrot.slane %v42_v34, 2  ;;  %v84_v42 = vadd.f32 %v83_v38, %v82_v32  ;;  %v93_v43 = vadd.f32 %v92_v39, %v91_v33 }
   0xe   :  { %v35_v41 = vadd.f32 %v34_v37, %v33_v31 }
   0xf   :  { %v44_v44 = vadd.f32 %v43_v40, %v42_v34  ;;  %v85_v48 = vrot.slane %v84_v42, 2  ;;  %v94_v49 = vrot.slane %v93_v43, 2 }
  0x10   :  { %v36_v47 = vrot.slane %v35_v41, 1 }
  0x11   :  { %v45_v50 = vrot.slane %v44_v44, 1  ;;  %v86_v52 = vadd.f32 %v85_v48, %v84_v42  ;;  %v95_v53 = vadd.f32 %v94_v49, %v93_v43 }
  0x12   :  { %v37_v51 = vadd.f32 %v36_v47, %v35_v41 }
  0x13   :  { %v46_v54 = vadd.f32 %v45_v50, %v44_v44  ;;  %v87_v56 = vrot.slane %v86_v52, 1  ;;  %v96_v57 = vrot.slane %v95_v53, 1 }
  0x15   :  { %v49_v58 = vcombine.low %v37_v51, %v46_v54  ;;  %v88_v59 = vadd.f32 %v87_v56, %v86_v52  ;;  %v97_v60 = vadd.f32 %v96_v57, %v95_v53 }
  0x17   :  { %v56_v61 = vrot.slane %v49_v58, %v55_v55  ;;  %v100_v63 = vcombine.low %v88_v59, %v97_v60 }
  0x19   :  { %v63_v0 = vrot.slane %v56_v61, %v55_v55  ;;  %v107_v1 = vrot.slane %v100_v63, %v55_v55 }
  0x1b   :  { %v65_v2 = vadd.f32 %v63_v0, %v28_v62  ;;  %v114_v5 = vrot.slane %v107_v1, %v55_v55 }
  0x1d   :  { %70 = vst.msk [vmem:[%s200_s1] sm:$0x3] %vm154_vm0, %v65_v2  ;;  %v116_v6 = vadd.f32 %v114_v5, %v71_v3 }
  0x1f   :  { %117 = vst.msk [vmem:[%s201_s2] sm:$0x3] %vm154_vm0, %v116_v6 }

// kernel: discriminator70.16
= control target key start
LH: loop header
LB: loop body
LE: loop exit
PB: predicated region body
PF: predicated region fallthrough
CT: control target
= control target key end

     0   :  { %v24_v0 = vlaneseq  ;;  %s188_s1 = inlined_call_operand.vmem [shape: f32[1,256], index: 1, kind: input, shape index: {}]   ;;  %s189_s2 = inlined_call_operand.vmem [shape: f32[1,256], index: 2, kind: input, shape index: {}]   ;;  %s190_s0 = inlined_call_operand.vmem [shape: f32[32,256], index: 0, kind: input, shape index: {}]   ;;  %s191_s3 = inlined_call_operand.vmem [shape: bf16[32,256], index: 3, kind: output, shape index: {}]  }
   0x1   :  { %v22_v2 = vld [vmem:[%s188_s1] sm:$0x3]  ;;  %v15_v5 = vld [vmem:[%s190_s0 + $0x8] sm:$0xff]  ;;  %v16_v8 = vld [vmem:[%s190_s0 + $0x10] sm:$0xff] }
   0x2   :  { %v25_v1 = vshrl.u32 %v24_v0, 7  ;;  %v42_v3 = vld [vmem:[%s189_s2] sm:$0x3]  ;;  %v17_v9 = vld [vmem:[%s190_s0 + $0x18] sm:$0xff]  ;;  %v19_v15 = vld [vmem:[%s190_s0 + $0x28] sm:$0xff] }
   0x3   :  { %v14_v4 = vld [vmem:[%s190_s0] sm:$0xff]  ;;  %v20_v16 = vld [vmem:[%s190_s0 + $0x30] sm:$0xff]  ;;  %v21_v17 = vld [vmem:[%s190_s0 + $0x38] sm:$0xff] }
   0x4   :  { %v26_v6 = vsub.s32 0, %v25_v1  ;;  %v30_v7 = vsub.s32 1, %v25_v1  ;;  %v18_v10 = vld [vmem:[%s190_s0 + $0x20] sm:$0xff] }
   0x6   :  { %v27_v11 = vrot.slane %v22_v2, %v26_v6  ;;  %v31_v12 = vrot.slane %v22_v2, %v30_v7  ;;  %v47_v13 = vrot.slane %v42_v3, %v26_v6  ;;  %v51_v14 = vrot.slane %v42_v3, %v30_v7 }
   0x8   :  { %v34_v18 = vmul.f32 %v27_v11, %v14_v4  ;;  %v35_v19 = vmul.f32 %v31_v12, %v15_v5  ;;  %v36_v20 = vmul.f32 %v27_v11, %v16_v8  ;;  %v37_v21 = vmul.f32 %v31_v12, %v17_v9 }
   0x9   :  { %v38_v22 = vmul.f32 %v27_v11, %v18_v10  ;;  %v39_v23 = vmul.f32 %v31_v12, %v19_v15  ;;  %v40_v24 = vmul.f32 %v27_v11, %v20_v16  ;;  %v41_v25 = vmul.f32 %v31_v12, %v21_v17 }
   0xa   :  { %v54_v26 = vadd.f32 %v47_v13, %v34_v18  ;;  %v55_v27 = vadd.f32 %v51_v14, %v35_v19  ;;  %v56_v28 = vadd.f32 %v47_v13, %v36_v20  ;;  %v57_v29 = vadd.f32 %v51_v14, %v37_v21 }
   0xb   :  { %v58_v30 = vadd.f32 %v47_v13, %v38_v22  ;;  %v59_v31 = vadd.f32 %v51_v14, %v39_v23  ;;  %v60_v32 = vadd.f32 %v47_v13, %v40_v24  ;;  %v61_v33 = vadd.f32 %v51_v14, %v41_v25 }
   0xc   :  { %vm62_vm0 = vcmp.ge.f32.partialorder %v54_v26, 0.0  ;;  %vm63_vm1 = vcmp.ge.f32.partialorder %v55_v27, 0.0  ;;  %v70_v34 = vmul.f32 0.2, %v54_v26  ;;  %v71_v35 = vmul.f32 0.2, %v55_v27 }
   0xd   :  { %vm64_vm2 = vcmp.ge.f32.partialorder %v56_v28, 0.0  ;;  %vm65_vm3 = vcmp.ge.f32.partialorder %v57_v29, 0.0  ;;  %v72_v36 = vmul.f32 0.2, %v56_v28  ;;  %v73_v37 = vmul.f32 0.2, %v57_v29 }
   0xe   :  { %v78_v38 = vsel %vm62_vm0, %v54_v26, %v70_v34  ;;  %v79_v39 = vsel %vm63_vm1, %v55_v27, %v71_v35  ;;  %vm66_vm4 = vcmp.ge.f32.partialorder %v58_v30, 0.0  ;;  %vm67_vm5 = vcmp.ge.f32.partialorder %v59_v31, 0.0 }
   0xf   :  { %v122_v40 = vpack.c.bf16 %v79_v39, %v78_v38  ;;  %v80_v41 = vsel %vm64_vm2, %v56_v28, %v72_v36  ;;  %v81_v42 = vsel %vm65_vm3, %v57_v29, %v73_v37  ;;  %v74_v43 = vmul.f32 0.2, %v58_v30 }
  0x10   :  { %v123_v44 = vpack.c.bf16 %v81_v42, %v80_v41  ;;  %v75_v45 = vmul.f32 0.2, %v59_v31  ;;  %vm68_vm6 = vcmp.ge.f32.partialorder %v60_v32, 0.0  ;;  %vm69_vm7 = vcmp.ge.f32.partialorder %v61_v33, 0.0 }
  0x11   :  { %110 = vst [vmem:[%s191_s3] sm:$0xff] %v122_v40  ;;  %v82_v46 = vsel %vm66_vm4, %v58_v30, %v74_v43  ;;  %v76_v47 = vmul.f32 0.2, %v60_v32  ;;  %v77_v48 = vmul.f32 0.2, %v61_v33 }
  0x12   :  { %111 = vst [vmem:[%s191_s3 + $0x8] sm:$0xff] %v123_v44  ;;  %v83_v49 = vsel %vm67_vm5, %v59_v31, %v75_v45 }
  0x13   :  { %v124_v50 = vpack.c.bf16 %v83_v49, %v82_v46  ;;  %v84_v51 = vsel %vm68_vm6, %v60_v32, %v76_v47  ;;  %v85_v52 = vsel %vm69_vm7, %v61_v33, %v77_v48 }
  0x14   :  { %v125_v53 = vpack.c.bf16 %v85_v52, %v84_v51 }
  0x15   :  { %112 = vst [vmem:[%s191_s3 + $0x10] sm:$0xff] %v124_v50 }
  0x16   :  { %113 = vst [vmem:[%s191_s3 + $0x18] sm:$0xff] %v125_v53 }

// kernel: discriminator70.17
= control target key start
LH: loop header
LB: loop body
LE: loop exit
PB: predicated region body
PF: predicated region fallthrough
CT: control target
= control target key end

     0   :  { %s1238_s9 = smov 0   ;;  %s1240_s10 = smov 0   ;;  %s1507_s0 = inlined_call_operand.vmem [shape: bf16[8,4096], index: 0, kind: input, shape index: {}]   ;;  %s1508_s1 = inlined_call_operand.vmem [shape: bf16[4096,512], index: 1, kind: input, shape index: {}]   ;;  %s1509_s2 = inlined_call_operand.vmem [shape: f32[8,512], index: 2, kind: output, shape index: {}]  }
   0x1   :  { %s1242_s11 = smov 0   ;;  %s1244_s12 = smov 0  }
   0x2   :  { %s1246_s13 = smov 0   ;;  %s1248_s14 = smov 0  }
   0x3   :  { %s1250_s15 = smov 0  }
   0x4 LB: > { %s24_s16 = sadd.s32 1, %s1212_s13  ;;  %s27_s17 = sadd.s32 1, %s1216_s14  ;;  %s1220_s15 = sphi %s1250_s15, %s12_s15   ;;  %s1216_s14 = sphi %s1248_s14, %s1515_s14   ;;  %s1212_s13 = sphi %s1246_s13, %s1514_s13   ;;  %s1208_s12 = sphi %s1244_s12, %s1513_s12   ;;  %s1204_s11 = sphi %s1242_s11, %s1512_s11   ;;  %s1200_s10 = sphi %s1240_s10, %s1511_s10   ;;  %s1196_s9 = sphi %s1238_s9, %s1510_s9  }
   0x5   : > { %p25_p0 = scmp.ge.s32.totalorder %s24_s16, 8  ;;  %p75_p1 = scmp.ne.s32.totalorder %s1200_s10, %s1196_s9 }
   0x6   : > { %p76_p2 = scmp.eq.s32.totalorder %s1220_s15, 0  ;;  %s68_s21 = sadd.s32 1, %s1200_s10 }
   0x7   : > { %s1517_s16 = smov (%p25_p0, %s24_s16), 0  ;;  %s1519_s17 = smov (!%p25_p0, %s27_s17), %s1216_s14 }
   0x8   : > { %p77_p3 = por %p76_p2, %p75_p1  ;;  %p29_p4 = scmp.ge.s32.totalorder %s1519_s17, 4 }
   0x9   : > { %s63_s18 = ssub.s32 %s1212_s13, %s1517_s16  ;;  %p979_p6 = scmp.ge.s32.totalorder %s1220_s15, 32 }
   0xa   : > { %s1521_s17 = smov (%p29_p4, %s1519_s17), 0 }
   0xb   : > { %s64_s19 = ssub.s32 %s1216_s14, %s1521_s17  ;;  %129 = sbr.rel (%p979_p6) target bundleno = 67 (0x43), region = 16 }
   0xc   : > { %s65_s20 = sor.u32 %s64_s19, %s63_s18 }
   0xd   : > { %p66_p5 = scmp.eq.s32.totalorder %s65_s20, 0 }
   0xf   : > { %s1289_s22 = scalar_select %p66_p5, %s1200_s10, %s68_s21  }
  0x12   : > { %145 = sbr.rel (!%p77_p3) target bundleno = 67 (0x43), region = 24  ;;  %s147_s23 = sand.u32 (%p77_p3), 1, %s1200_s10  }
  0x13   : > { %s1028_s24 = sshll.u32 (%p77_p3), %s1212_s13, 8  ;;  %s980_s25 = sshll.u32 (%p77_p3), %s147_s23, 8 }
  0x14   : > { %s152_s26 = sadd.s32 (%p77_p3), %s1216_s14, %s1028_s24  ;;  %s1303_s3 = scalar_lea.vmem (%p77_p3), [#allocation2], %s980_s25 }
  0x15   : > { %s983_s27 = sshll.u32 (%p77_p3), %s152_s26, 2 }
  0x16   : > { %s1298_s30 = scalar_lea.vmem (%p77_p3), %s1508_s1, %s983_s27 }
  0x17   : > { %v170_v0 = vld [vmem:[%s1298_s30] sm:$0xf] (%p77_p3)  ;;  %v172_v1 = vld [vmem:[%s1298_s30 + $0x10] sm:$0xf] (%p77_p3) }
  0x18   : > { %v174_v2 = vld [vmem:[%s1298_s30 + $0x20] sm:$0xf] (%p77_p3)  ;;  %171 = vst [vmem:[%s1303_s3] sm:$0xf] (%p77_p3), %v170_v0  ;;  %173 = vst [vmem:[%s1303_s3 + $0x4] sm:$0xf] (%p77_p3), %v172_v1 }
  0x19   : > { %175 = vst [vmem:[%s1303_s3 + $0x8] sm:$0xf] %v174_v2  ;;  %v176_v3 = vld [vmem:[%s1298_s30 + $0x30] sm:$0xf]  ;;  %v178_v4 = vld [vmem:[%s1298_s30 + $0x40] sm:$0xf] }
  0x1a   : > { %v180_v5 = vld [vmem:[%s1298_s30 + $0x50] sm:$0xf]  ;;  %177 = vst [vmem:[%s1303_s3 + $0xc] sm:$0xf] %v176_v3  ;;  %179 = vst [vmem:[%s1303_s3 + $0x10] sm:$0xf] %v178_v4 }
  0x1b   : > { %181 = vst [vmem:[%s1303_s3 + $0x14] sm:$0xf] %v180_v5  ;;  %v182_v6 = vld [vmem:[%s1298_s30 + $0x60] sm:$0xf]  ;;  %v184_v7 = vld [vmem:[%s1298_s30 + $0x70] sm:$0xf] }
  0x1c   : > { %v186_v8 = vld [vmem:[%s1298_s30 + $0x80] sm:$0xf]  ;;  %183 = vst [vmem:[%s1303_s3 + $0x18] sm:$0xf] %v182_v6  ;;  %185 = vst [vmem:[%s1303_s3 + $0x1c] sm:$0xf] %v184_v7 }
  0x1d   : > { %187 = vst [vmem:[%s1303_s3 + $0x20] sm:$0xf] %v186_v8  ;;  %v188_v9 = vld [vmem:[%s1298_s30 + $0x90] sm:$0xf]  ;;  %v190_v10 = vld [vmem:[%s1298_s30 + $0xa0] sm:$0xf] }
  0x1e   : > { %v192_v11 = vld [vmem:[%s1298_s30 + $0xb0] sm:$0xf]  ;;  %189 = vst [vmem:[%s1303_s3 + $0x24] sm:$0xf] %v188_v9  ;;  %191 = vst [vmem:[%s1303_s3 + $0x28] sm:$0xf] %v190_v10 }
  0x1f   : > { %193 = vst [vmem:[%s1303_s3 + $0x2c] sm:$0xf] %v192_v11  ;;  %v194_v12 = vld [vmem:[%s1298_s30 + $0xc0] sm:$0xf]  ;;  %v196_v13 = vld [vmem:[%s1298_s30 + $0xd0] sm:$0xf] }
  0x20   : > { %v198_v14 = vld [vmem:[%s1298_s30 + $0xe0] sm:$0xf]  ;;  %195 = vst [vmem:[%s1303_s3 + $0x30] sm:$0xf] %v194_v12  ;;  %197 = vst [vmem:[%s1303_s3 + $0x34] sm:$0xf] %v196_v13 }
  0x21   : > { %199 = vst [vmem:[%s1303_s3 + $0x38] sm:$0xf] %v198_v14  ;;  %v200_v15 = vld [vmem:[%s1298_s30 + $0xf0] sm:$0xf]  ;;  %v202_v16 = vld [vmem:[%s1298_s30 + $0x100] sm:$0xf] }
  0x22   : > { %v204_v17 = vld [vmem:[%s1298_s30 + $0x110] sm:$0xf]  ;;  %201 = vst [vmem:[%s1303_s3 + $0x3c] sm:$0xf] %v200_v15  ;;  %203 = vst [vmem:[%s1303_s3 + $0x40] sm:$0xf] %v202_v16 }
  0x23   : > { %205 = vst [vmem:[%s1303_s3 + $0x44] sm:$0xf] %v204_v17  ;;  %v206_v18 = vld [vmem:[%s1298_s30 + $0x120] sm:$0xf]  ;;  %v208_v19 = vld [vmem:[%s1298_s30 + $0x130] sm:$0xf] }
  0x24   : > { %v210_v20 = vld [vmem:[%s1298_s30 + $0x140] sm:$0xf]  ;;  %207 = vst [vmem:[%s1303_s3 + $0x48] sm:$0xf] %v206_v18  ;;  %209 = vst [vmem:[%s1303_s3 + $0x4c] sm:$0xf] %v208_v19 }
  0x25   : > { %211 = vst [vmem:[%s1303_s3 + $0x50] sm:$0xf] %v210_v20  ;;  %v212_v21 = vld [vmem:[%s1298_s30 + $0x150] sm:$0xf]  ;;  %v214_v22 = vld [vmem:[%s1298_s30 + $0x160] sm:$0xf] }
  0x26   : > { %v216_v23 = vld [vmem:[%s1298_s30 + $0x170] sm:$0xf]  ;;  %213 = vst [vmem:[%s1303_s3 + $0x54] sm:$0xf] %v212_v21  ;;  %215 = vst [vmem:[%s1303_s3 + $0x58] sm:$0xf] %v214_v22 }
  0x27   : > { %217 = vst [vmem:[%s1303_s3 + $0x5c] sm:$0xf] %v216_v23  ;;  %v218_v24 = vld [vmem:[%s1298_s30 + $0x180] sm:$0xf]  ;;  %v220_v25 = vld [vmem:[%s1298_s30 + $0x190] sm:$0xf] }
  0x28   : > { %v222_v26 = vld [vmem:[%s1298_s30 + $0x1a0] sm:$0xf]  ;;  %219 = vst [vmem:[%s1303_s3 + $0x60] sm:$0xf] %v218_v24  ;;  %221 = vst [vmem:[%s1303_s3 + $0x64] sm:$0xf] %v220_v25 }
  0x29   : > { %223 = vst [vmem:[%s1303_s3 + $0x68] sm:$0xf] %v222_v26  ;;  %v224_v27 = vld [vmem:[%s1298_s30 + $0x1b0] sm:$0xf]  ;;  %v226_v28 = vld [vmem:[%s1298_s30 + $0x1c0] sm:$0xf] }
  0x2a   : > { %v228_v29 = vld [vmem:[%s1298_s30 + $0x1d0] sm:$0xf]  ;;  %225 = vst [vmem:[%s1303_s3 + $0x6c] sm:$0xf] %v224_v27  ;;  %227 = vst [vmem:[%s1303_s3 + $0x70] sm:$0xf] %v226_v28 }
  0x2b   : > { %229 = vst [vmem:[%s1303_s3 + $0x74] sm:$0xf] %v228_v29  ;;  %v230_v30 = vld [vmem:[%s1298_s30 + $0x1e0] sm:$0xf]  ;;  %v232_v31 = vld [vmem:[%s1298_s30 + $0x1f0] sm:$0xf] }
  0x2c   : > { %v234_v32 = vld [vmem:[%s1298_s30 + $0x200] sm:$0xf]  ;;  %231 = vst [vmem:[%s1303_s3 + $0x78] sm:$0xf] %v230_v30  ;;  %233 = vst [vmem:[%s1303_s3 + $0x7c] sm:$0xf] %v232_v31 }
  0x2d   : > { %235 = vst [vmem:[%s1303_s3 + $0x80] sm:$0xf] %v234_v32  ;;  %v236_v33 = vld [vmem:[%s1298_s30 + $0x210] sm:$0xf]  ;;  %v238_v34 = vld [vmem:[%s1298_s30 + $0x220] sm:$0xf] }
  0x2e   : > { %v240_v35 = vld [vmem:[%s1298_s30 + $0x230] sm:$0xf]  ;;  %237 = vst [vmem:[%s1303_s3 + $0x84] sm:$0xf] %v236_v33  ;;  %239 = vst [vmem:[%s1303_s3 + $0x88] sm:$0xf] %v238_v34 }
  0x2f   : > { %241 = vst [vmem:[%s1303_s3 + $0x8c] sm:$0xf] %v240_v35  ;;  %v242_v36 = vld [vmem:[%s1298_s30 + $0x240] sm:$0xf]  ;;  %v244_v37 = vld [vmem:[%s1298_s30 + $0x250] sm:$0xf] }
  0x30   : > { %v246_v38 = vld [vmem:[%s1298_s30 + $0x260] sm:$0xf]  ;;  %243 = vst [vmem:[%s1303_s3 + $0x90] sm:$0xf] %v242_v36  ;;  %245 = vst [vmem:[%s1303_s3 + $0x94] sm:$0xf] %v244_v37 }
  0x31   : > { %247 = vst [vmem:[%s1303_s3 + $0x98] sm:$0xf] %v246_v38  ;;  %v248_v39 = vld [vmem:[%s1298_s30 + $0x270] sm:$0xf]  ;;  %v250_v40 = vld [vmem:[%s1298_s30 + $0x280] sm:$0xf] }
  0x32   : > { %v252_v41 = vld [vmem:[%s1298_s30 + $0x290] sm:$0xf]  ;;  %249 = vst [vmem:[%s1303_s3 + $0x9c] sm:$0xf] %v248_v39  ;;  %251 = vst [vmem:[%s1303_s3 + $0xa0] sm:$0xf] %v250_v40 }
  0x33   : > { %253 = vst [vmem:[%s1303_s3 + $0xa4] sm:$0xf] %v252_v41  ;;  %v254_v42 = vld [vmem:[%s1298_s30 + $0x2a0] sm:$0xf]  ;;  %v256_v43 = vld [vmem:[%s1298_s30 + $0x2b0] sm:$0xf] }
  0x34   : > { %v258_v44 = vld [vmem:[%s1298_s30 + $0x2c0] sm:$0xf]  ;;  %255 = vst [vmem:[%s1303_s3 + $0xa8] sm:$0xf] %v254_v42  ;;  %257 = vst [vmem:[%s1303_s3 + $0xac] sm:$0xf] %v256_v43 }
  0x35   : > { %259 = vst [vmem:[%s1303_s3 + $0xb0] sm:$0xf] %v258_v44  ;;  %v260_v45 = vld [vmem:[%s1298_s30 + $0x2d0] sm:$0xf]  ;;  %v262_v46 = vld [vmem:[%s1298_s30 + $0x2e0] sm:$0xf] }
  0x36   : > { %v264_v47 = vld [vmem:[%s1298_s30 + $0x2f0] sm:$0xf]  ;;  %261 = vst [vmem:[%s1303_s3 + $0xb4] sm:$0xf] %v260_v45  ;;  %263 = vst [vmem:[%s1303_s3 + $0xb8] sm:$0xf] %v262_v46 }
  0x37   : > { %265 = vst [vmem:[%s1303_s3 + $0xbc] sm:$0xf] %v264_v47  ;;  %v266_v48 = vld [vmem:[%s1298_s30 + $0x300] sm:$0xf]  ;;  %v268_v49 = vld [vmem:[%s1298_s30 + $0x310] sm:$0xf] }
  0x38   : > { %v270_v50 = vld [vmem:[%s1298_s30 + $0x320] sm:$0xf]  ;;  %267 = vst [vmem:[%s1303_s3 + $0xc0] sm:$0xf] %v266_v48  ;;  %269 = vst [vmem:[%s1303_s3 + $0xc4] sm:$0xf] %v268_v49 }
  0x39   : > { %271 = vst [vmem:[%s1303_s3 + $0xc8] sm:$0xf] %v270_v50  ;;  %v272_v51 = vld [vmem:[%s1298_s30 + $0x330] sm:$0xf]  ;;  %v274_v52 = vld [vmem:[%s1298_s30 + $0x340] sm:$0xf] }
  0x3a   : > { %v276_v53 = vld [vmem:[%s1298_s30 + $0x350] sm:$0xf]  ;;  %273 = vst [vmem:[%s1303_s3 + $0xcc] sm:$0xf] %v272_v51  ;;  %275 = vst [vmem:[%s1303_s3 + $0xd0] sm:$0xf] %v274_v52 }
  0x3b   : > { %277 = vst [vmem:[%s1303_s3 + $0xd4] sm:$0xf] %v276_v53  ;;  %v278_v54 = vld [vmem:[%s1298_s30 + $0x360] sm:$0xf]  ;;  %v280_v55 = vld [vmem:[%s1298_s30 + $0x370] sm:$0xf] }
  0x3c   : > { %v282_v56 = vld [vmem:[%s1298_s30 + $0x380] sm:$0xf]  ;;  %279 = vst [vmem:[%s1303_s3 + $0xd8] sm:$0xf] %v278_v54  ;;  %281 = vst [vmem:[%s1303_s3 + $0xdc] sm:$0xf] %v280_v55 }
  0x3d   : > { %283 = vst [vmem:[%s1303_s3 + $0xe0] sm:$0xf] %v282_v56  ;;  %v284_v57 = vld [vmem:[%s1298_s30 + $0x390] sm:$0xf]  ;;  %v286_v58 = vld [vmem:[%s1298_s30 + $0x3a0] sm:$0xf] }
  0x3e   : > { %v288_v59 = vld [vmem:[%s1298_s30 + $0x3b0] sm:$0xf]  ;;  %285 = vst [vmem:[%s1303_s3 + $0xe4] sm:$0xf] %v284_v57  ;;  %287 = vst [vmem:[%s1303_s3 + $0xe8] sm:$0xf] %v286_v58 }
  0x3f   : > { %289 = vst [vmem:[%s1303_s3 + $0xec] sm:$0xf] %v288_v59  ;;  %v290_v60 = vld [vmem:[%s1298_s30 + $0x3c0] sm:$0xf]  ;;  %v292_v61 = vld [vmem:[%s1298_s30 + $0x3d0] sm:$0xf] }
  0x40   : > { %v294_v62 = vld [vmem:[%s1298_s30 + $0x3e0] sm:$0xf]  ;;  %291 = vst [vmem:[%s1303_s3 + $0xf0] sm:$0xf] %v290_v60  ;;  %293 = vst [vmem:[%s1303_s3 + $0xf4] sm:$0xf] %v292_v61 }
  0x41   : > { %295 = vst [vmem:[%s1303_s3 + $0xf8] sm:$0xf] %v294_v62  ;;  %v296_v63 = vld [vmem:[%s1298_s30 + $0x3f0] sm:$0xf] }
  0x42   : > { %297 = vst [vmem:[%s1303_s3 + $0xfc] sm:$0xf] %v296_v63 }
  0x43 PF: > { %p984_p7 = scmp.ge.s32.totalorder %s1220_s15, 1  ;;  %p447_p8 = scmp.lt.s32.totalorder %s1220_s15, 33 }
  0x45   : > { %p448_p9 = pnand %p984_p7, %p447_p8 }
  0x46   : > { %s454_s4 = sand.u32 (!%p448_p9), 1, %s1196_s9   ;;  %s986_s5 = sshll.u32 (!%p448_p9), %s1204_s11, 2 }
  0x47   : > { %451 = sbr.rel (%p448_p9) target bundleno = 343 (0x157), region = 65  ;;  %s985_s6 = sshll.u32 (!%p448_p9), %s454_s4, 8 }
  0x48   : > { %p490_p10 = scmp.lt.s32.totalorder (!%p448_p9), %s986_s5, 31  ;;  %p500_p11 = scmp.lt.s32.totalorder (!%p448_p9), %s1208_s12, 3 }
  0x49   : > { %s1446_s25 = scalar_lea.vmem (!%p448_p9), [#allocation2], %s985_s6  ;;  %p989_p12 = scmp.ne.s32.totalorder (!%p448_p9), %s1204_s11, 0 }
  0x4e   : > { %s1523_s5 = smov (!%p490_p10, %s986_s5), 31  ;;  %s1525_s12 = smov (!%p500_p11, %s1208_s12), 3 }
  0x4f   : > { %s987_s7 = sshll.u32 %s1523_s5, 2  ;;  %s988_s20 = sshll.u32 %s1525_s12, 3  ;;  %v1222_v0 = vmov (!%p989_p12), 0.0  }
  0x50   : > { %s1439_s19 = scalar_lea.vmem %s1507_s0, %s987_s7  ;;  %s1444_s24 = scalar_lea.vmem %s1509_s2, %s988_s20 }
  0x51   : > { %510 = sbr.rel (%p989_p12) target bundleno = 88 (0x58), region = 73  ;;  %511 = vst [vmem:[%s1444_s24] sm:$0xff] (!%p989_p12), %v1222_v0 }
  0x58 PF: > { %v1130_v1 = vld [vmem:[%s1446_s25 + $0x40] sm:$0xff]   ;;  %v1134_v5 = vld [vmem:[%s1446_s25 + $0x48] sm:$0xff]   ;;  %v1138_v9 = vld [vmem:[%s1446_s25 + $0x50] sm:$0xff]  }
  0x59   : > { %v1131_v2 = vld [vmem:[%s1446_s25 + $0xc0] sm:$0xff]   ;;  %1029 = vmatprep.subr.bf16.mxu0 %v1130_v1  ;;  %v1135_v6 = vld [vmem:[%s1446_s25 + $0xc8] sm:$0xff]   ;;  %v1139_v10 = vld [vmem:[%s1446_s25 + $0xd0] sm:$0xff]  }
  0x5a   : > { %v1132_v3 = vld [vmem:[%s1446_s25] sm:$0xff]   ;;  %1051 = vmatprep.subr.bf16.mxu1 %v1131_v2  ;;  %v1136_v7 = vld [vmem:[%s1446_s25 + $0x8] sm:$0xff]   ;;  %v1140_v11 = vld [vmem:[%s1446_s25 + $0x10] sm:$0xff]  }
  0x5b   : > { %v1133_v4 = vld [vmem:[%s1446_s25 + $0x80] sm:$0xff]   ;;  %1030 = vmatpush3.bf16.msra.mxu0 %v1132_v3  ;;  %v1137_v8 = vld [vmem:[%s1446_s25 + $0x88] sm:$0xff]   ;;  %v1141_v12 = vld [vmem:[%s1446_s25 + $0x90] sm:$0xff]  }
  0x5c   : > { %1052 = vmatpush3.bf16.msra.mxu1 %v1133_v4  ;;  %1031 = vmatprep.subr.bf16.mxu0 %v1134_v5  ;;  %v1142_v13 = vld [vmem:[%s1446_s25 + $0x58] sm:$0xff]   ;;  %v1146_v17 = vld [vmem:[%s1446_s25 + $0x60] sm:$0xff]   ;;  %v1150_v21 = vld [vmem:[%s1446_s25 + $0x68] sm:$0xff]  }
  0x5d   : > { %1053 = vmatprep.subr.bf16.mxu1 %v1135_v6  ;;  %v1143_v14 = vld [vmem:[%s1446_s25 + $0xd8] sm:$0xff]   ;;  %v1147_v18 = vld [vmem:[%s1446_s25 + $0xe0] sm:$0xff]   ;;  %v1151_v22 = vld [vmem:[%s1446_s25 + $0xe8] sm:$0xff]  }
  0x5e   : > { %v1144_v15 = vld [vmem:[%s1446_s25 + $0x18] sm:$0xff]   ;;  %v1148_v19 = vld [vmem:[%s1446_s25 + $0x20] sm:$0xff]   ;;  %v1152_v23 = vld [vmem:[%s1446_s25 + $0x28] sm:$0xff]  }
  0x5f   : > { %1032 = vmatpush3.bf16.msra.mxu0 %v1136_v7  ;;  %v1145_v16 = vld [vmem:[%s1446_s25 + $0x98] sm:$0xff]   ;;  %v1149_v20 = vld [vmem:[%s1446_s25 + $0xa0] sm:$0xff]   ;;  %v1153_v24 = vld [vmem:[%s1446_s25 + $0xa8] sm:$0xff]  }
  0x60   : > { %1054 = vmatpush3.bf16.msra.mxu1 %v1137_v8  ;;  %1033 = vmatprep.subr.bf16.mxu0 %v1138_v9  ;;  %v1154_v25 = vld [vmem:[%s1446_s25 + $0x70] sm:$0xff]   ;;  %v1158_v29 = vld [vmem:[%s1446_s25 + $0x78] sm:$0xff]   ;;  %v513_v33 = vld [vmem:[%s1439_s19] sm:$0xff] }
  0x61   : > { %1055 = vmatprep.subr.bf16.mxu1 %v1139_v10  ;;  %v1155_v26 = vld [vmem:[%s1446_s25 + $0xf0] sm:$0xff]   ;;  %v1159_v30 = vld [vmem:[%s1446_s25 + $0xf8] sm:$0xff]   ;;  %v514_v34 = vld [vmem:[%s1439_s19 + $0x8] sm:$0xff]  ;;  %v990_v35 = vcombine.low %v513_v33, %v513_v33  ;;  %v991_v36 = vcombine.high %v513_v33, %v513_v33 }
  0x62   : > { %v1156_v27 = vld [vmem:[%s1446_s25 + $0x30] sm:$0xff]   ;;  %v1160_v31 = vld [vmem:[%s1446_s25 + $0x38] sm:$0xff]   ;;  %v992_v37 = vcombine.low %v514_v34, %v514_v34  ;;  %v993_v38 = vcombine.high %v514_v34, %v514_v34  ;;  %v512_v47 = vld [vmem:[%s1444_s24] sm:$0xff] }
  0x63   : > { %1034 = vmatpush3.bf16.msra.mxu0 %v1140_v11  ;;  %v1157_v28 = vld [vmem:[%s1446_s25 + $0xb0] sm:$0xff]   ;;  %v1161_v32 = vld [vmem:[%s1446_s25 + $0xb8] sm:$0xff]   ;;  %817 = vmatprep.mubr.bf16.mxu0 %v991_v36 }
  0x64   : > { %1056 = vmatpush3.bf16.msra.mxu1 %v1141_v12  ;;  %1035 = vmatprep.subr.bf16.mxu0 %v1142_v13 }
  0x65   : > { %1057 = vmatprep.subr.bf16.mxu1 %v1143_v14  ;;  %857 = vmatprep.mubr.bf16.mxu1 %v993_v38 }
  0x67   : > { %1036 = vmatpush3.bf16.msra.mxu0 %v1144_v15 }
  0x68   : > { %1058 = vmatpush3.bf16.msra.mxu1 %v1145_v16  ;;  %1037 = vmatprep.subr.bf16.mxu0 %v1146_v17 }
  0x69   : > { %1059 = vmatprep.subr.bf16.mxu1 %v1147_v18 }
  0x6b   : > { %1038 = vmatpush3.bf16.msra.mxu0 %v1148_v19 }
  0x6c   : > { %1060 = vmatpush3.bf16.msra.mxu1 %v1149_v20  ;;  %1039 = vmatprep.subr.bf16.mxu0 %v1150_v21 }
  0x6d   : > { %1061 = vmatprep.subr.bf16.mxu1 %v1151_v22 }
  0x6f   : > { %1040 = vmatpush3.bf16.msra.mxu0 %v1152_v23 }
  0x70   : > { %1062 = vmatpush3.bf16.msra.mxu1 %v1153_v24  ;;  %1041 = vmatprep.subr.bf16.mxu0 %v1154_v25 }
  0x71   : > { %1063 = vmatprep.subr.bf16.mxu1 %v1155_v26 }
  0x73   : > { %1042 = vmatpush3.bf16.msra.mxu0 %v1156_v27 }
  0x74   : > { %1064 = vmatpush3.bf16.msra.mxu1 %v1157_v28  ;;  %1043 = vmatprep.subr.bf16.mxu0 %v1158_v29 }
  0x75   : > { %1065 = vmatprep.subr.bf16.mxu1 %v1159_v30 }
  0x77   : > { %1044 = vmatpush3.bf16.msra.mxu0 %v1160_v31 }
  0x78   : > { %1066 = vmatpush3.bf16.msra.mxu1 %v1161_v32 }
  0x7a   : > { %818 = vmatmul.mubr.bf16.vlgmr.msra.gmra.mrb[0].mxu0 %v990_v35 }
  0x7b   : > { %858 = vmatmul.mubr.bf16.vlgmr.msra.gmra.mrb[0].mxu1 %v992_v37 }
 0x14d   : > { %v1045_v39 = vpop.f32.mrb[0].mxu0 }
 0x14e   : > { %v1067_v40 = vpop.f32.mrb[0].mxu1  ;;  %v1046_v41 = vpop.f32.mrb[1].mxu0 }
 0x14f   : > { %v1068_v42 = vpop.f32.mrb[1].mxu1  ;;  %v1047_v43 = vadd.f32 %v1046_v41, %v1045_v39  ;;  %v1048_v45 = vpop.f32.mrb[2].mxu0 }
 0x150   : > { %v1069_v44 = vadd.f32 %v1068_v42, %v1067_v40  ;;  %v1070_v46 = vpop.f32.mrb[2].mxu1  ;;  %v1049_v48 = vpop.f32.mrb[3].mxu0 }
 0x151   : > { %v1071_v49 = vpop.f32.mrb[3].mxu1 }
 0x152   : > { %v860_v50 = vadd.f32 %v1069_v44, %v1047_v43 }
 0x154   : > { %v865_v51 = vadd.f32 %v860_v50, %v512_v47 }
 0x156   : > { %866 = vst [vmem:[%s1444_s24] sm:$0xff] %v865_v51 }
 0x157 PF: > { %s12_s15 = sadd.s32 1, %s1220_s15   ;;  %s1510_s9 = smov %s1200_s10 }
 0x158   : > { %p9_p13 = scmp.ge.s32.totalorder %s12_s15, 34   ;;  %s1511_s10 = smov %s1289_s22 }
 0x159   : > { %s1512_s11 = smov %s1212_s13  ;;  %s1513_s12 = smov %s1216_s14 }
 0x15a   : > { %s1514_s13 = smov %s1517_s16  ;;  %s1515_s14 = smov %s1521_s17 }
 0x15b   :  { %11 = sbr.rel (!%p9_p13) target bundleno = 4 (0x4), region = 111 }

// kernel: discriminator70.18
= control target key start
LH: loop header
LB: loop body
LE: loop exit
PB: predicated region body
PF: predicated region fallthrough
CT: control target
= control target key end

     0   :  { %v14_v0 = vlaneseq  ;;  %v154_v4 = vmov 1966171168   ;;  %v155_v11 = vmov 0.0   ;;  %s213_s0 = inlined_call_operand.vmem [shape: f32[8,512], index: 0, kind: input, shape index: {}]   ;;  %s214_s1 = inlined_call_operand.vmem [shape: f32[1,512], index: 1, kind: output, shape index: {0}]   ;;  %s215_s2 = inlined_call_operand.vmem [shape: f32[1,512], index: 2, kind: output, shape index: {1}]  }
   0x1   :  { %v20_v1 = vld [vmem:[%s213_s0] sm:$0xff]  ;;  %v21_v2 = vld [vmem:[%s213_s0 + $0x8] sm:$0xff]  ;;  %v22_v3 = vld [vmem:[%s213_s0 + $0x10] sm:$0xff]  ;;  %v56_v5 = vunpack.c.l.s4 %v154_v4 }
   0x2   :  { %vm180_vm0 = vcmp.lt.s32.totalorder %v14_v0, 512  ;;  %v23_v7 = vld [vmem:[%s213_s0 + $0x18] sm:$0xff]  ;;  %v25_v8 = vrot.slane %v20_v1, 4  ;;  %v31_v9 = vrot.slane %v21_v2, 4  ;;  %v37_v10 = vrot.slane %v22_v3, 4 }
   0x3   :  { %18 = vst.msk [vmem:[%s214_s1] sm:$0xf] %vm180_vm0, %v155_v11  ;;  %v43_v12 = vrot.slane %v23_v7, 4  ;;  %v57_v13 = vunpack.c.0.s8 %v56_v5  ;;  %v59_v14 = vshrl.u32 %v14_v0, 7  ;;  %19 = vst.msk [vmem:[%s215_s2] sm:$0xf] %vm180_vm0, %v155_v11  ;;  %v85_v15 = vmul.f32 %v20_v1, %v20_v1 }
   0x4   :  { %v26_v16 = vadd.f32 %v25_v8, %v20_v1  ;;  %v32_v17 = vadd.f32 %v31_v9, %v21_v2  ;;  %v38_v18 = vadd.f32 %v37_v10, %v22_v3  ;;  %v86_v19 = vmul.f32 %v21_v2, %v21_v2 }
   0x5   :  { %v44_v20 = vadd.f32 %v43_v12, %v23_v7  ;;  %v60_v21 = vsub.s32 %v57_v13, %v59_v14  ;;  %v87_v22 = vmul.f32 %v22_v3, %v22_v3  ;;  %v88_v23 = vmul.f32 %v23_v7, %v23_v7 }
   0x6   :  { %v27_v24 = vrot.slane %v26_v16, 2  ;;  %v33_v25 = vrot.slane %v32_v17, 2  ;;  %v39_v26 = vrot.slane %v38_v18, 2  ;;  %v89_v27 = vrot.slane %v85_v15, 4 }
   0x7   :  { %v45_v28 = vrot.slane %v44_v20, 2  ;;  %v95_v29 = vrot.slane %v86_v19, 4  ;;  %v101_v30 = vrot.slane %v87_v22, 4  ;;  %v107_v31 = vrot.slane %v88_v23, 4 }
   0x8   :  { %v28_v32 = vadd.f32 %v27_v24, %v26_v16  ;;  %v34_v33 = vadd.f32 %v33_v25, %v32_v17  ;;  %v40_v34 = vadd.f32 %v39_v26, %v38_v18  ;;  %v90_v35 = vadd.f32 %v89_v27, %v85_v15 }
   0x9   :  { %v46_v36 = vadd.f32 %v45_v28, %v44_v20  ;;  %v96_v37 = vadd.f32 %v95_v29, %v86_v19  ;;  %v102_v38 = vadd.f32 %v101_v30, %v87_v22  ;;  %v108_v39 = vadd.f32 %v107_v31, %v88_v23 }
   0xa   :  { %v29_v40 = vrot.slane %v28_v32, 1  ;;  %v35_v41 = vrot.slane %v34_v33, 1  ;;  %v41_v42 = vrot.slane %v40_v34, 1  ;;  %v91_v43 = vrot.slane %v90_v35, 2  ;;  %v24_v8 = vld [vmem:[%s214_s1] sm:$0xf] }
   0xb   :  { %v47_v44 = vrot.slane %v46_v36, 1  ;;  %v97_v45 = vrot.slane %v96_v37, 2  ;;  %v103_v46 = vrot.slane %v102_v38, 2  ;;  %v109_v47 = vrot.slane %v108_v39, 2  ;;  %v84_v14 = vld [vmem:[%s215_s2] sm:$0xf] }
   0xc   :  { %v30_v48 = vadd.f32 %v29_v40, %v28_v32  ;;  %v36_v49 = vadd.f32 %v35_v41, %v34_v33  ;;  %v42_v50 = vadd.f32 %v41_v42, %v40_v34  ;;  %v92_v51 = vadd.f32 %v91_v43, %v90_v35 }
   0xd   :  { %v48_v52 = vadd.f32 %v47_v44, %v46_v36  ;;  %v98_v53 = vadd.f32 %v97_v45, %v96_v37  ;;  %v104_v54 = vadd.f32 %v103_v46, %v102_v38  ;;  %v110_v55 = vadd.f32 %v109_v47, %v108_v39 }
   0xe   :  { %v53_v56 = vcombine.low %v30_v48, %v36_v49  ;;  %v93_v57 = vrot.slane %v92_v51, 1 }
   0xf   :  { %v54_v58 = vcombine.low %v42_v50, %v48_v52  ;;  %v99_v59 = vrot.slane %v98_v53, 1  ;;  %v105_v60 = vrot.slane %v104_v54, 1  ;;  %v111_v61 = vrot.slane %v110_v55, 1 }
  0x10   :  { %v61_v62 = vrot.slane %v53_v56, %v60_v21  ;;  %v94_v63 = vadd.f32 %v93_v57, %v92_v51 }
  0x11   :  { %v68_v0 = vrot.slane %v54_v58, %v60_v21  ;;  %v100_v1 = vadd.f32 %v99_v59, %v98_v53  ;;  %v106_v2 = vadd.f32 %v105_v60, %v104_v54  ;;  %v112_v3 = vadd.f32 %v111_v61, %v110_v55 }
  0x13   :  { %v69_v4 = vcombine.low %v61_v62, %v68_v0  ;;  %v117_v5 = vcombine.low %v94_v63, %v100_v1  ;;  %v118_v7 = vcombine.low %v106_v2, %v112_v3 }
  0x15   :  { %v76_v9 = vrot.slane %v69_v4, %v60_v21  ;;  %v125_v10 = vrot.slane %v117_v5, %v60_v21  ;;  %v132_v11 = vrot.slane %v118_v7, %v60_v21 }
  0x17   :  { %v78_v12 = vadd.f32 %v76_v9, %v24_v8  ;;  %v133_v13 = vcombine.low %v125_v10, %v132_v11 }
  0x19   :  { %83 = vst.msk [vmem:[%s214_s1] sm:$0xf] %vm180_vm0, %v78_v12  ;;  %v140_v15 = vrot.slane %v133_v13, %v60_v21 }
  0x1b   :  { %v142_v16 = vadd.f32 %v140_v15, %v84_v14 }
  0x1d   :  { %143 = vst.msk [vmem:[%s215_s2] sm:$0xf] %vm180_vm0, %v142_v16 }

// kernel: discriminator70.19
= control target key start
LH: loop header
LB: loop body
LE: loop exit
PB: predicated region body
PF: predicated region fallthrough
CT: control target
= control target key end

     0   :  { %v24_v20 = vlaneseq  ;;  %s692_s3 = inlined_call_operand.vmem [shape: bf16[512,128], index: 3, kind: input, shape index: {}]   ;;  %s693_s0 = inlined_call_operand.vmem [shape: f32[8,512], index: 0, kind: input, shape index: {}]   ;;  %s694_s1 = inlined_call_operand.vmem [shape: f32[1,512], index: 1, kind: input, shape index: {}]   ;;  %s695_s2 = inlined_call_operand.vmem [shape: f32[1,512], index: 2, kind: input, shape index: {}]   ;;  %s696_s4 = inlined_call_operand.vmem [shape: f32[8,128], index: 4, kind: output, shape index: {}]  }
   0x1   :  { %v514_v0 = vld [vmem:[%s692_s3 + $0x40] sm:$0xff]   ;;  %v518_v4 = vld [vmem:[%s692_s3 + $0x48] sm:$0xff]   ;;  %v522_v8 = vld [vmem:[%s692_s3 + $0x50] sm:$0xff]  }
   0x2   :  { %v515_v1 = vld [vmem:[%s692_s3 + $0xc0] sm:$0xff]   ;;  %470 = vmatprep.subr.bf16.mxu0 %v514_v0  ;;  %v519_v5 = vld [vmem:[%s692_s3 + $0xc8] sm:$0xff]   ;;  %v523_v9 = vld [vmem:[%s692_s3 + $0xd0] sm:$0xff]   ;;  %v25_v25 = vshrl.u32 %v24_v20, 7 }
   0x3   :  { %v516_v2 = vld [vmem:[%s692_s3] sm:$0xff]   ;;  %492 = vmatprep.subr.bf16.mxu1 %v515_v1  ;;  %v520_v6 = vld [vmem:[%s692_s3 + $0x8] sm:$0xff]   ;;  %v524_v10 = vld [vmem:[%s692_s3 + $0x10] sm:$0xff]  }
   0x4   :  { %v517_v3 = vld [vmem:[%s692_s3 + $0x80] sm:$0xff]   ;;  %471 = vmatpush3.bf16.msra.mxu0 %v516_v2  ;;  %v521_v7 = vld [vmem:[%s692_s3 + $0x88] sm:$0xff]   ;;  %v525_v11 = vld [vmem:[%s692_s3 + $0x90] sm:$0xff]   ;;  %v30_v30 = vsub.s32 1, %v25_v25  ;;  %v38_v32 = vsub.s32 3, %v25_v25  ;;  %v26_v34 = vsub.s32 0, %v25_v25 }
   0x5   :  { %493 = vmatpush3.bf16.msra.mxu1 %v517_v3  ;;  %472 = vmatprep.subr.bf16.mxu0 %v518_v4  ;;  %v526_v12 = vld [vmem:[%s692_s3 + $0x58] sm:$0xff]   ;;  %v530_v16 = vld [vmem:[%s692_s3 + $0x60] sm:$0xff]   ;;  %v534_v21 = vld [vmem:[%s692_s3 + $0x68] sm:$0xff]   ;;  %v34_v36 = vsub.s32 2, %v25_v25 }
   0x6   :  { %494 = vmatprep.subr.bf16.mxu1 %v519_v5  ;;  %v527_v13 = vld [vmem:[%s692_s3 + $0xd8] sm:$0xff]   ;;  %v531_v17 = vld [vmem:[%s692_s3 + $0xe0] sm:$0xff]   ;;  %v535_v22 = vld [vmem:[%s692_s3 + $0xe8] sm:$0xff]  }
   0x7   :  { %v528_v14 = vld [vmem:[%s692_s3 + $0x18] sm:$0xff]   ;;  %v532_v18 = vld [vmem:[%s692_s3 + $0x20] sm:$0xff]   ;;  %v536_v23 = vld [vmem:[%s692_s3 + $0x28] sm:$0xff]  }
   0x8   :  { %473 = vmatpush3.bf16.msra.mxu0 %v520_v6  ;;  %v529_v15 = vld [vmem:[%s692_s3 + $0x98] sm:$0xff]   ;;  %v533_v19 = vld [vmem:[%s692_s3 + $0xa0] sm:$0xff]   ;;  %v537_v24 = vld [vmem:[%s692_s3 + $0xa8] sm:$0xff]  }
   0x9   :  { %495 = vmatpush3.bf16.msra.mxu1 %v521_v7  ;;  %474 = vmatprep.subr.bf16.mxu0 %v522_v8  ;;  %v538_v26 = vld [vmem:[%s692_s3 + $0x70] sm:$0xff]   ;;  %v542_v31 = vld [vmem:[%s692_s3 + $0x78] sm:$0xff]   ;;  %v19_v38 = vld [vmem:[%s693_s0 + $0x8] sm:$0xff] }
   0xa   :  { %496 = vmatprep.subr.bf16.mxu1 %v523_v9  ;;  %v539_v27 = vld [vmem:[%s692_s3 + $0xf0] sm:$0xff]   ;;  %v543_v33 = vld [vmem:[%s692_s3 + $0xf8] sm:$0xff]   ;;  %v22_v39 = vld [vmem:[%s694_s1] sm:$0xf] }
   0xb   :  { %v540_v28 = vld [vmem:[%s692_s3 + $0x30] sm:$0xff]   ;;  %v544_v35 = vld [vmem:[%s692_s3 + $0x38] sm:$0xff]   ;;  %v48_v40 = vld [vmem:[%s695_s2] sm:$0xf]  ;;  %v31_v41 = vrot.slane %v22_v39, %v30_v30  ;;  %v39_v44 = vrot.slane %v22_v39, %v38_v32  ;;  %v27_v48 = vrot.slane %v22_v39, %v26_v34  ;;  %v35_v50 = vrot.slane %v22_v39, %v34_v36 }
   0xc   :  { %475 = vmatpush3.bf16.msra.mxu0 %v524_v10  ;;  %v541_v29 = vld [vmem:[%s692_s3 + $0xb0] sm:$0xff]   ;;  %v545_v37 = vld [vmem:[%s692_s3 + $0xb8] sm:$0xff]   ;;  %v57_v42 = vrot.slane %v48_v40, %v30_v30  ;;  %v65_v45 = vrot.slane %v48_v40, %v38_v32  ;;  %v18_v46 = vld [vmem:[%s693_s0] sm:$0xff]  ;;  %v53_v49 = vrot.slane %v48_v40, %v26_v34  ;;  %v61_v51 = vrot.slane %v48_v40, %v34_v36 }
   0xd   :  { %497 = vmatpush3.bf16.msra.mxu1 %v525_v11  ;;  %476 = vmatprep.subr.bf16.mxu0 %v526_v12  ;;  %v21_v43 = vld [vmem:[%s693_s0 + $0x18] sm:$0xff]  ;;  %v20_v47 = vld [vmem:[%s693_s0 + $0x10] sm:$0xff]  ;;  %v45_v52 = vmul.f32 %v31_v41, %v19_v38  ;;  %v44_v54 = vmul.f32 %v27_v48, %v18_v46 }
   0xe   :  { %498 = vmatprep.subr.bf16.mxu1 %v527_v13  ;;  %v47_v53 = vmul.f32 %v39_v44, %v21_v43  ;;  %v46_v55 = vmul.f32 %v35_v50, %v20_v47 }
   0xf   :  { %v71_v56 = vadd.f32 %v57_v42, %v45_v52  ;;  %v70_v58 = vadd.f32 %v53_v49, %v44_v54 }
  0x10   :  { %477 = vmatpush3.bf16.msra.mxu0 %v528_v14  ;;  %v73_v57 = vadd.f32 %v65_v45, %v47_v53  ;;  %v72_v59 = vadd.f32 %v61_v51, %v46_v55 }
  0x11   :  { %499 = vmatpush3.bf16.msra.mxu1 %v529_v15  ;;  %478 = vmatprep.subr.bf16.mxu0 %v530_v16  ;;  %vm75_vm0 = vcmp.ge.f32.partialorder %v71_v56, 0.0  ;;  %v79_v60 = vmul.f32 0.2, %v71_v56  ;;  %vm74_vm2 = vcmp.ge.f32.partialorder %v70_v58, 0.0  ;;  %v78_v62 = vmul.f32 0.2, %v70_v58 }
  0x12   :  { %500 = vmatprep.subr.bf16.mxu1 %v531_v17  ;;  %vm77_vm1 = vcmp.ge.f32.partialorder %v73_v57, 0.0  ;;  %v81_v61 = vmul.f32 0.2, %v73_v57  ;;  %vm76_vm3 = vcmp.ge.f32.partialorder %v72_v59, 0.0  ;;  %v80_v63 = vmul.f32 0.2, %v72_v59 }
  0x13   :  { %v83_v0 = vsel %vm75_vm0, %v71_v56, %v79_v60  ;;  %v82_v4 = vsel %vm74_vm2, %v70_v58, %v78_v62 }
  0x14   :  { %479 = vmatpush3.bf16.msra.mxu0 %v532_v18  ;;  %v85_v1 = vsel %vm77_vm1, %v73_v57, %v81_v61  ;;  %v87_v2 = vpack.c.bf16 %v83_v0, %v83_v0  ;;  %v84_v5 = vsel %vm76_vm3, %v72_v59, %v80_v63  ;;  %v86_v6 = vpack.c.bf16 %v82_v4, %v82_v4 }
  0x15   :  { %501 = vmatpush3.bf16.msra.mxu1 %v533_v19  ;;  %480 = vmatprep.subr.bf16.mxu0 %v534_v21  ;;  %v89_v3 = vpack.c.bf16 %v85_v1, %v85_v1  ;;  %v88_v7 = vpack.c.bf16 %v84_v5, %v84_v5 }
  0x16   :  { %502 = vmatprep.subr.bf16.mxu1 %v535_v22  ;;  %378 = vmatprep.mubr.bf16.mxu0 %v87_v2 }
  0x17   :  { %418 = vmatprep.mubr.bf16.mxu1 %v89_v3 }
  0x18   :  { %481 = vmatpush3.bf16.msra.mxu0 %v536_v23 }
  0x19   :  { %503 = vmatpush3.bf16.msra.mxu1 %v537_v24  ;;  %482 = vmatprep.subr.bf16.mxu0 %v538_v26 }
  0x1a   :  { %504 = vmatprep.subr.bf16.mxu1 %v539_v27 }
  0x1c   :  { %483 = vmatpush3.bf16.msra.mxu0 %v540_v28 }
  0x1d   :  { %505 = vmatpush3.bf16.msra.mxu1 %v541_v29  ;;  %484 = vmatprep.subr.bf16.mxu0 %v542_v31 }
  0x1e   :  { %506 = vmatprep.subr.bf16.mxu1 %v543_v33 }
  0x20   :  { %485 = vmatpush3.bf16.msra.mxu0 %v544_v35 }
  0x21   :  { %507 = vmatpush3.bf16.msra.mxu1 %v545_v37 }
  0x23   :  { %379 = vmatmul.mubr.bf16.vlgmr.msra.gmra.mrb[0].mxu0 %v86_v6 }
  0x24   :  { %419 = vmatmul.mubr.bf16.vlgmr.msra.gmra.mrb[0].mxu1 %v88_v7 }
  0xf6   :  { %v486_v8 = vpop.f32.mrb[0].mxu0 }
  0xf7   :  { %v508_v9 = vpop.f32.mrb[0].mxu1  ;;  %v487_v10 = vpop.f32.mrb[1].mxu0 }
  0xf8   :  { %v509_v11 = vpop.f32.mrb[1].mxu1  ;;  %v488_v12 = vadd.f32 %v487_v10, %v486_v8  ;;  %v489_v14 = vpop.f32.mrb[2].mxu0 }
  0xf9   :  { %v510_v13 = vadd.f32 %v509_v11, %v508_v9  ;;  %v511_v15 = vpop.f32.mrb[2].mxu1  ;;  %v490_v16 = vpop.f32.mrb[3].mxu0 }
  0xfa   :  { %v512_v17 = vpop.f32.mrb[3].mxu1 }
  0xfb   :  { %v421_v18 = vadd.f32 %v510_v13, %v488_v12 }
  0xfd   :  { %v469_v19 = vmul.f32 -1.442695, %v421_v18 }
  0xff   :  { %546 = vpow2.f32 %v469_v19 }
 0x109   :  { %v547_v20 = vpop.eup %546 }
 0x10a   :  { %v429_v21 = vadd.f32 1.0, %v547_v20 }
 0x10c   :  { %548 = vrcp.f32 %v429_v21 }
 0x116   :  { %v549_v22 = vpop.eup %548 }
 0x117   :  { %432 = vst [vmem:[%s696_s4] sm:$0xff] %v549_v22 }

</bundles_post_ra>
